<compile_context>
chip_gen: v7x
topology: tpu7x:2x2x1
jax: 0.10.0
libtpu: 0.0.40
codegen_flags: <defaults>
</compile_context>

<pallas_src>
import functools

import jax
import jax.numpy as jnp
from jax import lax
from jax.experimental import pallas as pl
from jax.experimental.pallas import tpu as pltpu


_TAPS = tuple((dy, dx) for dy in (-1, 0, 1) for dx in (-1, 0, 1))


# --------------------------------- kernel -----------------------------------

def _model3_kernel(x_ref, w_ref, mf_ref, mp_ref, psel_ref, upm_ref,
                   o1_ref, o2_ref, *, C, CP, HID, H, W):
    """Fused forward for one image: out1 = U1(x); out2 = U2(out1).

    Activations are (channels, H*W): the flattened spatial axis sits on the
    128-lane axis.  Every conv is a single tap-stacked MXU dot.
    """
    P = H * W
    h = HID

    def tap_stack(a, m_ref, scale):
        # 9 shifted + border-masked copies of `a` (tap-major, channel-minor).
        pieces = []
        for k, (dy, dx) in enumerate(_TAPS):
            d = scale * (dy * W + dx)
            if d == 0:
                pieces.append(a)
            else:
                t = pltpu.roll(a, shift=(-d) % P, axis=1)
                pieces.append(t * m_ref[k:k + 1, :])
        return pieces

    def bdot(w, a):  # bf16 MXU operands, f32 accumulation
        return jnp.dot(w.astype(jnp.bfloat16), a.astype(jnp.bfloat16),
                       preferred_element_type=jnp.float32)

    def unet(a, base):
        # Static slices of the packed parameter buffer (one DMA for all params).
        w1 = w_ref[base:base + h, 0:9 * CP]
        b1 = w_ref[base:base + h, 9 * CP:9 * CP + 1]
        w2 = w_ref[base + h:base + 3 * h, 0:9 * h]
        b2 = w_ref[base + h:base + 3 * h, 9 * h:9 * h + 1]
        w3 = w_ref[base + 3 * h:base + 4 * h, 0:27 * h]
        b3 = w_ref[base + 3 * h:base + 4 * h, 27 * h:27 * h + 1]
        w4 = w_ref[base + 4 * h:base + 4 * h + CP, 0:h]
        b4 = w_ref[base + 4 * h:base + 4 * h + CP, h:h + 1]

        # encoder conv (CP -> h): ONE dot, contraction 9*CP
        e1 = jnp.maximum(
            bdot(w1, jnp.concatenate(tap_stack(a, mf_ref, 1), axis=0)) + b1, 0.0)

        # 2x2 max pool stride 2 via roll-max.  The rolls wrap across row/image
        # boundaries; this is safe ONLY because the pool-selection matrix and
        # the +-2 tap masks read even rows/cols of an even-sized image
        # (H % 2 == 0 and W % 2 == 0 is asserted in the wrapper).
        m1 = jnp.maximum(e1, pltpu.roll(e1, shift=P - 1, axis=1))
        m2 = jnp.maximum(m1, pltpu.roll(m1, shift=P - W, axis=1))
        # All 9 half-res conv taps gathered by ONE selection dot, then the
        # half-res conv (h -> 2h) as ONE dot with contraction 9*h.
        pstk = jnp.concatenate(tap_stack(m2, mp_ref, 2), axis=0)          # (9h, P)
        g = jnp.dot(pstk.astype(jnp.bfloat16), psel_ref[...],
                    preferred_element_type=jnp.float32)                   # (9h, P2)
        e2 = jnp.maximum(bdot(w2, g) + b2, 0.0)                           # (2h, P2)

        # nearest 2x upsample (one selection dot) + decoder conv on
        # concat([up, e1]) as a single dot with contraction 27*h.
        up = jnp.dot(e2.astype(jnp.bfloat16), upm_ref[...],
                     preferred_element_type=jnp.float32)                  # (2h, P)
        dstk = jnp.concatenate(tap_stack(up, mf_ref, 1)
                               + tap_stack(e1, mf_ref, 1), axis=0)        # (27h, P)
        d1 = jnp.maximum(bdot(w3, dstk) + b3, 0.0)                        # (h, P)

        # 1x1 head (h -> CP; rows C..CP-1 are exactly zero), no ReLU
        return bdot(w4, d1) + b4                                          # (CP, P)

    rows_per_unet = 4 * h + CP
    x = x_ref[0]                          # (CP, P) f32, channels padded to CP
    o1 = unet(x, 0)
    o2 = unet(o1, rows_per_unet)
    o1_ref[0] = o1[:C].astype(o1_ref.dtype)
    o2_ref[0] = o2[:C].astype(o2_ref.dtype)


# ----------------------- wrapper-built constants / params -------------------

def _build_constants(H, W):
    """Border masks + pool/upsample selection matrices (static, XLA-folded)."""
    P, H2, W2 = H * W, H // 2, W // 2
    P2 = H2 * W2
    lane = jnp.arange(P, dtype=jnp.int32)
    row, col = lane // W, lane % W

    def mask_set(scale):
        ms = [((row + scale * dy >= 0) & (row + scale * dy < H) &
               (col + scale * dx >= 0) & (col + scale * dx < W))
              for (dy, dx) in _TAPS]
        return jnp.stack(ms).astype(jnp.float32)                         # (9, P)

    q = jnp.arange(P2, dtype=jnp.int32)
    src = 2 * (q // W2) * W + 2 * (q % W2)
    pool_sel = (lane[:, None] == src[None, :]).astype(jnp.bfloat16)      # (P, P2)
    up_src = (row // 2) * W2 + (col // 2)
    up_mat = (q[:, None] == up_src[None, :]).astype(jnp.bfloat16)        # (P2, P)
    return mask_set(1), mask_set(2), pool_sel, up_mat


def _pack_unet_params(p, c, h, cpad):
    """PyTorch-layout UNet params -> one (4h+cpad, 27h+1) tap-major f32 block.

    Row blocks: [w1|b1] (h rows), [w2|b2] (2h), [w3u|w3s|b3] (h), [w4|b4] (cpad).
    Conv weights become (Cout, 9*Cin) tap-major / channel-minor (cross-corr).
    """
    def taps(w, cin_pad):
        co, ci, kh, kw = w.shape
        t = jnp.transpose(w, (0, 2, 3, 1)).reshape(co, kh * kw, ci)
        if cin_pad > ci:
            t = jnp.pad(t, ((0, 0), (0, 0), (0, cin_pad - ci)))
        return t.reshape(co, kh * kw * cin_pad)

    w1f = taps(p["w1"], cpad)                                            # (h, 9*cpad)
    w2f = taps(p["w2"], h)                                               # (2h, 9h)
    w3f = jnp.concatenate([taps(p["w3"][:, :2 * h], 2 * h),
                           taps(p["w3"][:, 2 * h:], h)], axis=1)         # (h, 27h)
    w4f = jnp.pad(p["w4"].reshape(-1, h), ((0, cpad - c), (0, 0)))       # (cpad, h)
    b4f = jnp.pad(p["b4"], (0, cpad - c))

    cmax = max(9 * cpad, 27 * h, h) + 1

    def blk(wf, b):
        m = jnp.concatenate([wf, b.reshape(-1, 1)], axis=1)
        return jnp.pad(m, ((0, 0), (0, cmax - m.shape[1])))

    return jnp.concatenate(
        [blk(w1f, p["b1"]), blk(w2f, p["b2"]), blk(w3f, p["b3"]), blk(w4f, b4f)],
        axis=0).astype(jnp.float32)                                      # (4h+cpad, cmax)


# --------------------------------- wrapper ----------------------------------

def _const_spec(a):
    nd = a.ndim
    return pl.BlockSpec(a.shape, lambda n, _nd=nd: (0,) * _nd)


def model3_forward(params_u1, params_u2, x_nchw):
    """out1 = U1(x); out2 = U2(out1); returns [out1, out2] in NCHW."""
    N, C, H, W = x_nchw.shape
    # The roll-based 2x2 pool + even-position selection matrices require even
    # spatial dims (otherwise wrapped lanes would leak across rows/images).
    assert H % 2 == 0 and W % 2 == 0, (H, W)
    P = H * W
    h = params_u1["w1"].shape[0]
    CP = max(8, ((C + 7) // 8) * 8)      # pad channels to a sublane multiple

    wpacked = jnp.concatenate([_pack_unet_params(params_u1, C, h, CP),
                               _pack_unet_params(params_u2, C, h, CP)], axis=0)
    mf, mp, psel, upm = _build_constants(H, W)
    xp = jnp.pad(x_nchw.reshape(N, C, P).astype(jnp.float32),
                 ((0, 0), (0, CP - C), (0, 0)))

    kernel = functools.partial(_model3_kernel, C=C, CP=CP, HID=h, H=H, W=W)
    out_sd = jax.ShapeDtypeStruct((N, C, P), jnp.float32)
    io_spec = pl.BlockSpec((1, C, P), lambda n: (n, 0, 0))
    o1, o2 = pl.pallas_call(
        kernel,
        out_shape=(out_sd, out_sd),
        grid=(N,),
        in_specs=[pl.BlockSpec((1, CP, P), lambda n: (n, 0, 0)),
                  _const_spec(wpacked), _const_spec(mf), _const_spec(mp),
                  _const_spec(psel), _const_spec(upm)],
        out_specs=(io_spec, io_spec),
        compiler_params=pltpu.CompilerParams(
            dimension_semantics=("parallel",)),
    )(xp, wpacked, mf, mp, psel, upm)
    return [o1.reshape(N, C, H, W), o2.reshape(N, C, H, W)]


# ------------------------------ parameter init ------------------------------

def init_unet_params(key, c, h):
    """PyTorch-layout conv parameters: w (Cout, Cin, K, K), b (Cout,)."""
    ks = jax.random.split(key, 4)

    def conv_init(k, cout, cin, ksz):
        kw_, kb_ = jax.random.split(k)
        fan_in = cin * ksz * ksz
        w = jax.random.normal(kw_, (cout, cin, ksz, ksz), jnp.float32) / jnp.sqrt(fan_in)
        b = jax.random.normal(kb_, (cout,), jnp.float32) * 0.01
        return w, b

    w1, b1 = conv_init(ks[0], h, c, 3)
    w2, b2 = conv_init(ks[1], 2 * h, h, 3)
    w3, b3 = conv_init(ks[2], h, 3 * h, 3)
    w4, b4 = conv_init(ks[3], c, h, 1)
    return dict(w1=w1, b1=b1, w2=w2, b2=b2, w3=w3, b3=b3, w4=w4, b4=b4)


# --------------------- pure-JAX reference (correctness) ---------------------

def _conv_ref(x, w, b, pad):
    y = lax.conv_general_dilated(
        x, w, window_strides=(1, 1), padding=((pad, pad), (pad, pad)),
        dimension_numbers=("NCHW", "OIHW", "NCHW"),
        precision=lax.Precision.HIGHEST)
    return y + b.reshape(1, -1, 1, 1)


def _unet_ref(p, x):
    e1 = jax.nn.relu(_conv_ref(x, p["w1"], p["b1"], 1))
    p1 = lax.reduce_window(e1, -jnp.inf, lax.max, (1, 1, 2, 2), (1, 1, 2, 2), "VALID")
    e2 = jax.nn.relu(_conv_ref(p1, p["w2"], p["b2"], 1))
    up = jnp.repeat(jnp.repeat(e2, 2, axis=2), 2, axis=3)
    cat = jnp.concatenate([up, e1], axis=1)
    d1 = jax.nn.relu(_conv_ref(cat, p["w3"], p["b3"], 1))
    return _conv_ref(d1, p["w4"], p["b4"], 0)


def _model3_ref(p1, p2, x):
    o1 = _unet_ref(p1, x)
    return o1, _unet_ref(p2, o1)


# ----------------------------------- main ------------------------------------

if __name__ == "__main__":
    key = jax.random.PRNGKey(0)
    kx, k1, k2 = jax.random.split(key, 3)

    N, C, H, W = 2, 4, 16, 16      # x: (batch, channels, H, W)  -- PyTorch NCHW
    HIDDEN = 8

    x = jax.random.normal(kx, (N, C, H, W), jnp.float32)
    params_u1 = init_unet_params(k1, C, HIDDEN)
    params_u2 = init_unet_params(k2, C, HIDDEN)

    out1, out2 = jax.jit(model3_forward)(params_u1, params_u2, x)
    jax.block_until_ready(out1)
    jax.block_until_ready(out2)

    assert out1.shape == (N, C, H, W), out1.shape
    assert out2.shape == (N, C, H, W), out2.shape
    assert out1.dtype == jnp.float32 and out2.dtype == jnp.float32

    ref1, ref2 = jax.jit(_model3_ref)(params_u1, params_u2, x)
    err1 = float(jnp.max(jnp.abs(out1 - ref1)))
    err2 = float(jnp.max(jnp.abs(out2 - ref2)))
    # 5e-2 tolerance is for the bf16 MXU-operand path (f32 accumulation);
    # observed errors are typically ~1e-2.
    assert err1 < 5e-2 and err2 < 5e-2, (err1, err2)

    print("KERNEL_OK")
</pallas_src>

<mosaic_0001>
module attributes {stable_mosaic.version = 11 : i64} {
  func.func @_model3_kernel(%arg0: i32, %arg1: memref<1x8x256xf32, #tpu.memory_space<vmem>>, %arg2: memref<80x217xf32, #tpu.memory_space<vmem>>, %arg3: memref<9x256xf32, #tpu.memory_space<vmem>>, %arg4: memref<9x256xf32, #tpu.memory_space<vmem>>, %arg5: memref<256x64xbf16, #tpu.memory_space<vmem>>, %arg6: memref<64x256xbf16, #tpu.memory_space<vmem>>, %arg7: memref<1x4x256xf32, #tpu.memory_space<vmem>>, %arg8: memref<1x4x256xf32, #tpu.memory_space<vmem>>) attributes {dimension_semantics = [#tpu.dimension_semantics<parallel>], iteration_bounds = array<i64: 2>, scalar_prefetch = 0 : i64, scratch_operands = 0 : i64, tpu.core_type = #tpu.core_type<tc>, window_params = [{transform_indices = @transform_0, window_bounds = array<i64: 1, 8, 256>}, {pipeline_mode = #tpu.pipeline_mode<synchronous>, transform_indices = @transform_1, window_bounds = array<i64: 80, 217>}, {pipeline_mode = #tpu.pipeline_mode<synchronous>, transform_indices = @transform_2, window_bounds = array<i64: 9, 256>}, {pipeline_mode = #tpu.pipeline_mode<synchronous>, transform_indices = @transform_3, window_bounds = array<i64: 9, 256>}, {pipeline_mode = #tpu.pipeline_mode<synchronous>, transform_indices = @transform_4, window_bounds = array<i64: 256, 64>}, {pipeline_mode = #tpu.pipeline_mode<synchronous>, transform_indices = @transform_5, window_bounds = array<i64: 64, 256>}, {transform_indices = @transform_6, window_bounds = array<i64: 1, 4, 256>}, {transform_indices = @transform_7, window_bounds = array<i64: 1, 4, 256>}]} {
    %c0 = arith.constant 0 : index
    %c0_0 = arith.constant 0 : index
    %c0_1 = arith.constant 0 : index
    %0 = vector.load %arg1[%c0, %c0_0, %c0_1] : memref<1x8x256xf32, #tpu.memory_space<vmem>>, vector<1x8x256xf32>
    %1 = vector.shape_cast %0 : vector<1x8x256xf32> to vector<8x256xf32>
    %c0_2 = arith.constant 0 : index
    %c0_3 = arith.constant 0 : index
    %2 = vector.load %arg2[%c0_2, %c0_3] : memref<80x217xf32, #tpu.memory_space<vmem>>, vector<8x72xf32>
    %c0_4 = arith.constant 0 : index
    %c72 = arith.constant 72 : index
    %3 = vector.load %arg2[%c0_4, %c72] : memref<80x217xf32, #tpu.memory_space<vmem>>, vector<8x1xf32>
    %c8 = arith.constant 8 : index
    %c0_5 = arith.constant 0 : index
    %4 = vector.load %arg2[%c8, %c0_5] : memref<80x217xf32, #tpu.memory_space<vmem>>, vector<16x72xf32>
    %c8_6 = arith.constant 8 : index
    %c72_7 = arith.constant 72 : index
    %5 = vector.load %arg2[%c8_6, %c72_7] : memref<80x217xf32, #tpu.memory_space<vmem>>, vector<16x1xf32>
    %c24 = arith.constant 24 : index
    %c0_8 = arith.constant 0 : index
    %6 = vector.load %arg2[%c24, %c0_8] : memref<80x217xf32, #tpu.memory_space<vmem>>, vector<8x216xf32>
    %c24_9 = arith.constant 24 : index
    %c216 = arith.constant 216 : index
    %7 = vector.load %arg2[%c24_9, %c216] : memref<80x217xf32, #tpu.memory_space<vmem>>, vector<8x1xf32>
    %c32 = arith.constant 32 : index
    %c0_10 = arith.constant 0 : index
    %8 = vector.load %arg2[%c32, %c0_10] : memref<80x217xf32, #tpu.memory_space<vmem>>, vector<8x8xf32>
    %c32_11 = arith.constant 32 : index
    %c8_12 = arith.constant 8 : index
    %9 = vector.load %arg2[%c32_11, %c8_12] : memref<80x217xf32, #tpu.memory_space<vmem>>, vector<8x1xf32>
    %c17_i32 = arith.constant 17 : i32
    %10 = tpu.dynamic_rotate %1 by %c17_i32 dim 1 : vector<8x256xf32>, i32 -> vector<8x256xf32>
    %c0_13 = arith.constant 0 : index
    %c0_14 = arith.constant 0 : index
    %11 = vector.load %arg3[%c0_13, %c0_14] : memref<9x256xf32, #tpu.memory_space<vmem>>, vector<1x256xf32>
    %12 = vector.broadcast %11 : vector<1x256xf32> to vector<8x256xf32>
    %13 = arith.mulf %10, %12 : vector<8x256xf32>
    %c16_i32 = arith.constant 16 : i32
    %14 = tpu.dynamic_rotate %1 by %c16_i32 dim 1 : vector<8x256xf32>, i32 -> vector<8x256xf32>
    %c1 = arith.constant 1 : index
    %c0_15 = arith.constant 0 : index
    %15 = vector.load %arg3[%c1, %c0_15] : memref<9x256xf32, #tpu.memory_space<vmem>>, vector<1x256xf32>
    %16 = vector.broadcast %15 : vector<1x256xf32> to vector<8x256xf32>
    %17 = arith.mulf %14, %16 : vector<8x256xf32>
    %c15_i32 = arith.constant 15 : i32
    %18 = tpu.dynamic_rotate %1 by %c15_i32 dim 1 : vector<8x256xf32>, i32 -> vector<8x256xf32>
    %c2 = arith.constant 2 : index
    %c0_16 = arith.constant 0 : index
    %19 = vector.load %arg3[%c2, %c0_16] : memref<9x256xf32, #tpu.memory_space<vmem>>, vector<1x256xf32>
    %20 = vector.broadcast %19 : vector<1x256xf32> to vector<8x256xf32>
    %21 = arith.mulf %18, %20 : vector<8x256xf32>
    %c1_i32 = arith.constant 1 : i32
    %22 = tpu.dynamic_rotate %1 by %c1_i32 dim 1 : vector<8x256xf32>, i32 -> vector<8x256xf32>
    %c3 = arith.constant 3 : index
    %c0_17 = arith.constant 0 : index
    %23 = vector.load %arg3[%c3, %c0_17] : memref<9x256xf32, #tpu.memory_space<vmem>>, vector<1x256xf32>
    %24 = vector.broadcast %23 : vector<1x256xf32> to vector<8x256xf32>
    %25 = arith.mulf %22, %24 : vector<8x256xf32>
    %c255_i32 = arith.constant 255 : i32
    %26 = tpu.dynamic_rotate %1 by %c255_i32 dim 1 : vector<8x256xf32>, i32 -> vector<8x256xf32>
    %c5 = arith.constant 5 : index
    %c0_18 = arith.constant 0 : index
    %27 = vector.load %arg3[%c5, %c0_18] : memref<9x256xf32, #tpu.memory_space<vmem>>, vector<1x256xf32>
    %28 = vector.broadcast %27 : vector<1x256xf32> to vector<8x256xf32>
    %29 = arith.mulf %26, %28 : vector<8x256xf32>
    %c241_i32 = arith.constant 241 : i32
    %30 = tpu.dynamic_rotate %1 by %c241_i32 dim 1 : vector<8x256xf32>, i32 -> vector<8x256xf32>
    %c6 = arith.constant 6 : index
    %c0_19 = arith.constant 0 : index
    %31 = vector.load %arg3[%c6, %c0_19] : memref<9x256xf32, #tpu.memory_space<vmem>>, vector<1x256xf32>
    %32 = vector.broadcast %31 : vector<1x256xf32> to vector<8x256xf32>
    %33 = arith.mulf %30, %32 : vector<8x256xf32>
    %c240_i32 = arith.constant 240 : i32
    %34 = tpu.dynamic_rotate %1 by %c240_i32 dim 1 : vector<8x256xf32>, i32 -> vector<8x256xf32>
    %c7 = arith.constant 7 : index
    %c0_20 = arith.constant 0 : index
    %35 = vector.load %arg3[%c7, %c0_20] : memref<9x256xf32, #tpu.memory_space<vmem>>, vector<1x256xf32>
    %36 = vector.broadcast %35 : vector<1x256xf32> to vector<8x256xf32>
    %37 = arith.mulf %34, %36 : vector<8x256xf32>
    %c239_i32 = arith.constant 239 : i32
    %38 = tpu.dynamic_rotate %1 by %c239_i32 dim 1 : vector<8x256xf32>, i32 -> vector<8x256xf32>
    %c8_21 = arith.constant 8 : index
    %c0_22 = arith.constant 0 : index
    %39 = vector.load %arg3[%c8_21, %c0_22] : memref<9x256xf32, #tpu.memory_space<vmem>>, vector<1x256xf32>
    %40 = vector.broadcast %39 : vector<1x256xf32> to vector<8x256xf32>
    %41 = arith.mulf %38, %40 : vector<8x256xf32>
    %42 = tpu.concatenate %13, %17, %21, %25, %1, %29, %33, %37, %41 in 0 : vector<8x256xf32>, vector<8x256xf32>, vector<8x256xf32>, vector<8x256xf32>, vector<8x256xf32>, vector<8x256xf32>, vector<8x256xf32>, vector<8x256xf32>, vector<8x256xf32> -> vector<72x256xf32>
    %43 = arith.truncf %2 : vector<8x72xf32> to vector<8x72xbf16>
    %44 = arith.truncf %42 : vector<72x256xf32> to vector<72x256xbf16>
    %cst = arith.constant dense<0.000000e+00> : vector<8x256xf32>
    %45 = tpu.matmul %43, %44, %cst {dimension_numbers = #tpu.dot_dimension_numbers<[1], [0], [0], [1], [0, 0, 1, 1], [], []>} : vector<8x72xbf16>, vector<72x256xbf16>, vector<8x256xf32> -> vector<8x256xf32>
    %46 = vector.broadcast %3 : vector<8x1xf32> to vector<8x256xf32>
    %47 = arith.addf %45, %46 : vector<8x256xf32>
    %cst_23 = arith.constant 0.000000e+00 : f32
    %48 = vector.broadcast %cst_23 : f32 to vector<8x256xf32>
    %49 = arith.maximumf %47, %48 : vector<8x256xf32>
    %c255_i32_24 = arith.constant 255 : i32
    %50 = tpu.dynamic_rotate %49 by %c255_i32_24 dim 1 : vector<8x256xf32>, i32 -> vector<8x256xf32>
    %51 = arith.maximumf %49, %50 : vector<8x256xf32>
    %c240_i32_25 = arith.constant 240 : i32
    %52 = tpu.dynamic_rotate %51 by %c240_i32_25 dim 1 : vector<8x256xf32>, i32 -> vector<8x256xf32>
    %53 = arith.maximumf %51, %52 : vector<8x256xf32>
    %c34_i32 = arith.constant 34 : i32
    %54 = tpu.dynamic_rotate %53 by %c34_i32 dim 1 : vector<8x256xf32>, i32 -> vector<8x256xf32>
    %c0_26 = arith.constant 0 : index
    %c0_27 = arith.constant 0 : index
    %55 = vector.load %arg4[%c0_26, %c0_27] : memref<9x256xf32, #tpu.memory_space<vmem>>, vector<1x256xf32>
    %56 = vector.broadcast %55 : vector<1x256xf32> to vector<8x256xf32>
    %57 = arith.mulf %54, %56 : vector<8x256xf32>
    %c32_i32 = arith.constant 32 : i32
    %58 = tpu.dynamic_rotate %53 by %c32_i32 dim 1 : vector<8x256xf32>, i32 -> vector<8x256xf32>
    %c1_28 = arith.constant 1 : index
    %c0_29 = arith.constant 0 : index
    %59 = vector.load %arg4[%c1_28, %c0_29] : memref<9x256xf32, #tpu.memory_space<vmem>>, vector<1x256xf32>
    %60 = vector.broadcast %59 : vector<1x256xf32> to vector<8x256xf32>
    %61 = arith.mulf %58, %60 : vector<8x256xf32>
    %c30_i32 = arith.constant 30 : i32
    %62 = tpu.dynamic_rotate %53 by %c30_i32 dim 1 : vector<8x256xf32>, i32 -> vector<8x256xf32>
    %c2_30 = arith.constant 2 : index
    %c0_31 = arith.constant 0 : index
    %63 = vector.load %arg4[%c2_30, %c0_31] : memref<9x256xf32, #tpu.memory_space<vmem>>, vector<1x256xf32>
    %64 = vector.broadcast %63 : vector<1x256xf32> to vector<8x256xf32>
    %65 = arith.mulf %62, %64 : vector<8x256xf32>
    %c2_i32 = arith.constant 2 : i32
    %66 = tpu.dynamic_rotate %53 by %c2_i32 dim 1 : vector<8x256xf32>, i32 -> vector<8x256xf32>
    %c3_32 = arith.constant 3 : index
    %c0_33 = arith.constant 0 : index
    %67 = vector.load %arg4[%c3_32, %c0_33] : memref<9x256xf32, #tpu.memory_space<vmem>>, vector<1x256xf32>
    %68 = vector.broadcast %67 : vector<1x256xf32> to vector<8x256xf32>
    %69 = arith.mulf %66, %68 : vector<8x256xf32>
    %c254_i32 = arith.constant 254 : i32
    %70 = tpu.dynamic_rotate %53 by %c254_i32 dim 1 : vector<8x256xf32>, i32 -> vector<8x256xf32>
    %c5_34 = arith.constant 5 : index
    %c0_35 = arith.constant 0 : index
    %71 = vector.load %arg4[%c5_34, %c0_35] : memref<9x256xf32, #tpu.memory_space<vmem>>, vector<1x256xf32>
    %72 = vector.broadcast %71 : vector<1x256xf32> to vector<8x256xf32>
    %73 = arith.mulf %70, %72 : vector<8x256xf32>
    %c226_i32 = arith.constant 226 : i32
    %74 = tpu.dynamic_rotate %53 by %c226_i32 dim 1 : vector<8x256xf32>, i32 -> vector<8x256xf32>
    %c6_36 = arith.constant 6 : index
    %c0_37 = arith.constant 0 : index
    %75 = vector.load %arg4[%c6_36, %c0_37] : memref<9x256xf32, #tpu.memory_space<vmem>>, vector<1x256xf32>
    %76 = vector.broadcast %75 : vector<1x256xf32> to vector<8x256xf32>
    %77 = arith.mulf %74, %76 : vector<8x256xf32>
    %c224_i32 = arith.constant 224 : i32
    %78 = tpu.dynamic_rotate %53 by %c224_i32 dim 1 : vector<8x256xf32>, i32 -> vector<8x256xf32>
    %c7_38 = arith.constant 7 : index
    %c0_39 = arith.constant 0 : index
    %79 = vector.load %arg4[%c7_38, %c0_39] : memref<9x256xf32, #tpu.memory_space<vmem>>, vector<1x256xf32>
    %80 = vector.broadcast %79 : vector<1x256xf32> to vector<8x256xf32>
    %81 = arith.mulf %78, %80 : vector<8x256xf32>
    %c222_i32 = arith.constant 222 : i32
    %82 = tpu.dynamic_rotate %53 by %c222_i32 dim 1 : vector<8x256xf32>, i32 -> vector<8x256xf32>
    %c8_40 = arith.constant 8 : index
    %c0_41 = arith.constant 0 : index
    %83 = vector.load %arg4[%c8_40, %c0_41] : memref<9x256xf32, #tpu.memory_space<vmem>>, vector<1x256xf32>
    %84 = vector.broadcast %83 : vector<1x256xf32> to vector<8x256xf32>
    %85 = arith.mulf %82, %84 : vector<8x256xf32>
    %86 = tpu.concatenate %57, %61, %65, %69, %53, %73, %77, %81, %85 in 0 : vector<8x256xf32>, vector<8x256xf32>, vector<8x256xf32>, vector<8x256xf32>, vector<8x256xf32>, vector<8x256xf32>, vector<8x256xf32>, vector<8x256xf32>, vector<8x256xf32> -> vector<72x256xf32>
    %87 = arith.truncf %86 : vector<72x256xf32> to vector<72x256xbf16>
    %c0_42 = arith.constant 0 : index
    %c0_43 = arith.constant 0 : index
    %88 = vector.load %arg5[%c0_42, %c0_43] : memref<256x64xbf16, #tpu.memory_space<vmem>>, vector<256x64xbf16>
    %cst_44 = arith.constant dense<0.000000e+00> : vector<72x64xf32>
    %89 = tpu.matmul %87, %88, %cst_44 {dimension_numbers = #tpu.dot_dimension_numbers<[1], [0], [0], [1], [0, 0, 1, 1], [], []>} : vector<72x256xbf16>, vector<256x64xbf16>, vector<72x64xf32> -> vector<72x64xf32>
    %90 = arith.truncf %4 : vector<16x72xf32> to vector<16x72xbf16>
    %91 = arith.truncf %89 : vector<72x64xf32> to vector<72x64xbf16>
    %cst_45 = arith.constant dense<0.000000e+00> : vector<16x64xf32>
    %92 = tpu.matmul %90, %91, %cst_45 {dimension_numbers = #tpu.dot_dimension_numbers<[1], [0], [0], [1], [0, 0, 1, 1], [], []>} : vector<16x72xbf16>, vector<72x64xbf16>, vector<16x64xf32> -> vector<16x64xf32>
    %93 = vector.broadcast %5 : vector<16x1xf32> to vector<16x64xf32>
    %94 = arith.addf %92, %93 : vector<16x64xf32>
    %cst_46 = arith.constant 0.000000e+00 : f32
    %95 = vector.broadcast %cst_46 : f32 to vector<16x64xf32>
    %96 = arith.maximumf %94, %95 : vector<16x64xf32>
    %97 = arith.truncf %96 : vector<16x64xf32> to vector<16x64xbf16>
    %c0_47 = arith.constant 0 : index
    %c0_48 = arith.constant 0 : index
    %98 = vector.load %arg6[%c0_47, %c0_48] : memref<64x256xbf16, #tpu.memory_space<vmem>>, vector<64x256xbf16>
    %cst_49 = arith.constant dense<0.000000e+00> : vector<16x256xf32>
    %99 = tpu.matmul %97, %98, %cst_49 {dimension_numbers = #tpu.dot_dimension_numbers<[1], [0], [0], [1], [0, 0, 1, 1], [], []>} : vector<16x64xbf16>, vector<64x256xbf16>, vector<16x256xf32> -> vector<16x256xf32>
    %c17_i32_50 = arith.constant 17 : i32
    %100 = tpu.dynamic_rotate %99 by %c17_i32_50 dim 1 : vector<16x256xf32>, i32 -> vector<16x256xf32>
    %c0_51 = arith.constant 0 : index
    %c0_52 = arith.constant 0 : index
    %101 = vector.load %arg3[%c0_51, %c0_52] : memref<9x256xf32, #tpu.memory_space<vmem>>, vector<1x256xf32>
    %102 = vector.broadcast %101 : vector<1x256xf32> to vector<16x256xf32>
    %103 = arith.mulf %100, %102 : vector<16x256xf32>
    %c16_i32_53 = arith.constant 16 : i32
    %104 = tpu.dynamic_rotate %99 by %c16_i32_53 dim 1 : vector<16x256xf32>, i32 -> vector<16x256xf32>
    %c1_54 = arith.constant 1 : index
    %c0_55 = arith.constant 0 : index
    %105 = vector.load %arg3[%c1_54, %c0_55] : memref<9x256xf32, #tpu.memory_space<vmem>>, vector<1x256xf32>
    %106 = vector.broadcast %105 : vector<1x256xf32> to vector<16x256xf32>
    %107 = arith.mulf %104, %106 : vector<16x256xf32>
    %c15_i32_56 = arith.constant 15 : i32
    %108 = tpu.dynamic_rotate %99 by %c15_i32_56 dim 1 : vector<16x256xf32>, i32 -> vector<16x256xf32>
    %c2_57 = arith.constant 2 : index
    %c0_58 = arith.constant 0 : index
    %109 = vector.load %arg3[%c2_57, %c0_58] : memref<9x256xf32, #tpu.memory_space<vmem>>, vector<1x256xf32>
    %110 = vector.broadcast %109 : vector<1x256xf32> to vector<16x256xf32>
    %111 = arith.mulf %108, %110 : vector<16x256xf32>
    %c1_i32_59 = arith.constant 1 : i32
    %112 = tpu.dynamic_rotate %99 by %c1_i32_59 dim 1 : vector<16x256xf32>, i32 -> vector<16x256xf32>
    %c3_60 = arith.constant 3 : index
    %c0_61 = arith.constant 0 : index
    %113 = vector.load %arg3[%c3_60, %c0_61] : memref<9x256xf32, #tpu.memory_space<vmem>>, vector<1x256xf32>
    %114 = vector.broadcast %113 : vector<1x256xf32> to vector<16x256xf32>
    %115 = arith.mulf %112, %114 : vector<16x256xf32>
    %c255_i32_62 = arith.constant 255 : i32
    %116 = tpu.dynamic_rotate %99 by %c255_i32_62 dim 1 : vector<16x256xf32>, i32 -> vector<16x256xf32>
    %c5_63 = arith.constant 5 : index
    %c0_64 = arith.constant 0 : index
    %117 = vector.load %arg3[%c5_63, %c0_64] : memref<9x256xf32, #tpu.memory_space<vmem>>, vector<1x256xf32>
    %118 = vector.broadcast %117 : vector<1x256xf32> to vector<16x256xf32>
    %119 = arith.mulf %116, %118 : vector<16x256xf32>
    %c241_i32_65 = arith.constant 241 : i32
    %120 = tpu.dynamic_rotate %99 by %c241_i32_65 dim 1 : vector<16x256xf32>, i32 -> vector<16x256xf32>
    %c6_66 = arith.constant 6 : index
    %c0_67 = arith.constant 0 : index
    %121 = vector.load %arg3[%c6_66, %c0_67] : memref<9x256xf32, #tpu.memory_space<vmem>>, vector<1x256xf32>
    %122 = vector.broadcast %121 : vector<1x256xf32> to vector<16x256xf32>
    %123 = arith.mulf %120, %122 : vector<16x256xf32>
    %c240_i32_68 = arith.constant 240 : i32
    %124 = tpu.dynamic_rotate %99 by %c240_i32_68 dim 1 : vector<16x256xf32>, i32 -> vector<16x256xf32>
    %c7_69 = arith.constant 7 : index
    %c0_70 = arith.constant 0 : index
    %125 = vector.load %arg3[%c7_69, %c0_70] : memref<9x256xf32, #tpu.memory_space<vmem>>, vector<1x256xf32>
    %126 = vector.broadcast %125 : vector<1x256xf32> to vector<16x256xf32>
    %127 = arith.mulf %124, %126 : vector<16x256xf32>
    %c239_i32_71 = arith.constant 239 : i32
    %128 = tpu.dynamic_rotate %99 by %c239_i32_71 dim 1 : vector<16x256xf32>, i32 -> vector<16x256xf32>
    %c8_72 = arith.constant 8 : index
    %c0_73 = arith.constant 0 : index
    %129 = vector.load %arg3[%c8_72, %c0_73] : memref<9x256xf32, #tpu.memory_space<vmem>>, vector<1x256xf32>
    %130 = vector.broadcast %129 : vector<1x256xf32> to vector<16x256xf32>
    %131 = arith.mulf %128, %130 : vector<16x256xf32>
    %c17_i32_74 = arith.constant 17 : i32
    %132 = tpu.dynamic_rotate %49 by %c17_i32_74 dim 1 : vector<8x256xf32>, i32 -> vector<8x256xf32>
    %c0_75 = arith.constant 0 : index
    %c0_76 = arith.constant 0 : index
    %133 = vector.load %arg3[%c0_75, %c0_76] : memref<9x256xf32, #tpu.memory_space<vmem>>, vector<1x256xf32>
    %134 = vector.broadcast %133 : vector<1x256xf32> to vector<8x256xf32>
    %135 = arith.mulf %132, %134 : vector<8x256xf32>
    %c16_i32_77 = arith.constant 16 : i32
    %136 = tpu.dynamic_rotate %49 by %c16_i32_77 dim 1 : vector<8x256xf32>, i32 -> vector<8x256xf32>
    %c1_78 = arith.constant 1 : index
    %c0_79 = arith.constant 0 : index
    %137 = vector.load %arg3[%c1_78, %c0_79] : memref<9x256xf32, #tpu.memory_space<vmem>>, vector<1x256xf32>
    %138 = vector.broadcast %137 : vector<1x256xf32> to vector<8x256xf32>
    %139 = arith.mulf %136, %138 : vector<8x256xf32>
    %c15_i32_80 = arith.constant 15 : i32
    %140 = tpu.dynamic_rotate %49 by %c15_i32_80 dim 1 : vector<8x256xf32>, i32 -> vector<8x256xf32>
    %c2_81 = arith.constant 2 : index
    %c0_82 = arith.constant 0 : index
    %141 = vector.load %arg3[%c2_81, %c0_82] : memref<9x256xf32, #tpu.memory_space<vmem>>, vector<1x256xf32>
    %142 = vector.broadcast %141 : vector<1x256xf32> to vector<8x256xf32>
    %143 = arith.mulf %140, %142 : vector<8x256xf32>
    %c1_i32_83 = arith.constant 1 : i32
    %144 = tpu.dynamic_rotate %49 by %c1_i32_83 dim 1 : vector<8x256xf32>, i32 -> vector<8x256xf32>
    %c3_84 = arith.constant 3 : index
    %c0_85 = arith.constant 0 : index
    %145 = vector.load %arg3[%c3_84, %c0_85] : memref<9x256xf32, #tpu.memory_space<vmem>>, vector<1x256xf32>
    %146 = vector.broadcast %145 : vector<1x256xf32> to vector<8x256xf32>
    %147 = arith.mulf %144, %146 : vector<8x256xf32>
    %c255_i32_86 = arith.constant 255 : i32
    %148 = tpu.dynamic_rotate %49 by %c255_i32_86 dim 1 : vector<8x256xf32>, i32 -> vector<8x256xf32>
    %c5_87 = arith.constant 5 : index
    %c0_88 = arith.constant 0 : index
    %149 = vector.load %arg3[%c5_87, %c0_88] : memref<9x256xf32, #tpu.memory_space<vmem>>, vector<1x256xf32>
    %150 = vector.broadcast %149 : vector<1x256xf32> to vector<8x256xf32>
    %151 = arith.mulf %148, %150 : vector<8x256xf32>
    %c241_i32_89 = arith.constant 241 : i32
    %152 = tpu.dynamic_rotate %49 by %c241_i32_89 dim 1 : vector<8x256xf32>, i32 -> vector<8x256xf32>
    %c6_90 = arith.constant 6 : index
    %c0_91 = arith.constant 0 : index
    %153 = vector.load %arg3[%c6_90, %c0_91] : memref<9x256xf32, #tpu.memory_space<vmem>>, vector<1x256xf32>
    %154 = vector.broadcast %153 : vector<1x256xf32> to vector<8x256xf32>
    %155 = arith.mulf %152, %154 : vector<8x256xf32>
    %c240_i32_92 = arith.constant 240 : i32
    %156 = tpu.dynamic_rotate %49 by %c240_i32_92 dim 1 : vector<8x256xf32>, i32 -> vector<8x256xf32>
    %c7_93 = arith.constant 7 : index
    %c0_94 = arith.constant 0 : index
    %157 = vector.load %arg3[%c7_93, %c0_94] : memref<9x256xf32, #tpu.memory_space<vmem>>, vector<1x256xf32>
    %158 = vector.broadcast %157 : vector<1x256xf32> to vector<8x256xf32>
    %159 = arith.mulf %156, %158 : vector<8x256xf32>
    %c239_i32_95 = arith.constant 239 : i32
    %160 = tpu.dynamic_rotate %49 by %c239_i32_95 dim 1 : vector<8x256xf32>, i32 -> vector<8x256xf32>
    %c8_96 = arith.constant 8 : index
    %c0_97 = arith.constant 0 : index
    %161 = vector.load %arg3[%c8_96, %c0_97] : memref<9x256xf32, #tpu.memory_space<vmem>>, vector<1x256xf32>
    %162 = vector.broadcast %161 : vector<1x256xf32> to vector<8x256xf32>
    %163 = arith.mulf %160, %162 : vector<8x256xf32>
    %164 = tpu.concatenate %103, %107, %111, %115, %99, %119, %123, %127, %131, %135, %139, %143, %147, %49, %151, %155 in 0 : vector<16x256xf32>, vector<16x256xf32>, vector<16x256xf32>, vector<16x256xf32>, vector<16x256xf32>, vector<16x256xf32>, vector<16x256xf32>, vector<16x256xf32>, vector<16x256xf32>, vector<8x256xf32>, vector<8x256xf32>, vector<8x256xf32>, vector<8x256xf32>, vector<8x256xf32>, vector<8x256xf32>, vector<8x256xf32> -> vector<200x256xf32>
    %165 = tpu.concatenate %159, %163 in 0 : vector<8x256xf32>, vector<8x256xf32> -> vector<16x256xf32>
    %166 = tpu.concatenate %164, %165 in 0 : vector<200x256xf32>, vector<16x256xf32> -> vector<216x256xf32>
    %167 = arith.truncf %6 : vector<8x216xf32> to vector<8x216xbf16>
    %168 = arith.truncf %166 : vector<216x256xf32> to vector<216x256xbf16>
    %cst_98 = arith.constant dense<0.000000e+00> : vector<8x256xf32>
    %169 = tpu.matmul %167, %168, %cst_98 {dimension_numbers = #tpu.dot_dimension_numbers<[1], [0], [0], [1], [0, 0, 1, 1], [], []>} : vector<8x216xbf16>, vector<216x256xbf16>, vector<8x256xf32> -> vector<8x256xf32>
    %170 = vector.broadcast %7 : vector<8x1xf32> to vector<8x256xf32>
    %171 = arith.addf %169, %170 : vector<8x256xf32>
    %cst_99 = arith.constant 0.000000e+00 : f32
    %172 = vector.broadcast %cst_99 : f32 to vector<8x256xf32>
    %173 = arith.maximumf %171, %172 : vector<8x256xf32>
    %174 = arith.truncf %8 : vector<8x8xf32> to vector<8x8xbf16>
    %175 = arith.truncf %173 : vector<8x256xf32> to vector<8x256xbf16>
    %cst_100 = arith.constant dense<0.000000e+00> : vector<8x256xf32>
    %176 = tpu.matmul %174, %175, %cst_100 {dimension_numbers = #tpu.dot_dimension_numbers<[1], [0], [0], [1], [0, 0, 1, 1], [], []>} : vector<8x8xbf16>, vector<8x256xbf16>, vector<8x256xf32> -> vector<8x256xf32>
    %177 = vector.broadcast %9 : vector<8x1xf32> to vector<8x256xf32>
    %178 = arith.addf %176, %177 : vector<8x256xf32>
    %c40 = arith.constant 40 : index
    %c0_101 = arith.constant 0 : index
    %179 = vector.load %arg2[%c40, %c0_101] : memref<80x217xf32, #tpu.memory_space<vmem>>, vector<8x72xf32>
    %c40_102 = arith.constant 40 : index
    %c72_103 = arith.constant 72 : index
    %180 = vector.load %arg2[%c40_102, %c72_103] : memref<80x217xf32, #tpu.memory_space<vmem>>, vector<8x1xf32>
    %c48 = arith.constant 48 : index
    %c0_104 = arith.constant 0 : index
    %181 = vector.load %arg2[%c48, %c0_104] : memref<80x217xf32, #tpu.memory_space<vmem>>, vector<16x72xf32>
    %c48_105 = arith.constant 48 : index
    %c72_106 = arith.constant 72 : index
    %182 = vector.load %arg2[%c48_105, %c72_106] : memref<80x217xf32, #tpu.memory_space<vmem>>, vector<16x1xf32>
    %c64 = arith.constant 64 : index
    %c0_107 = arith.constant 0 : index
    %183 = vector.load %arg2[%c64, %c0_107] : memref<80x217xf32, #tpu.memory_space<vmem>>, vector<8x216xf32>
    %c64_108 = arith.constant 64 : index
    %c216_109 = arith.constant 216 : index
    %184 = vector.load %arg2[%c64_108, %c216_109] : memref<80x217xf32, #tpu.memory_space<vmem>>, vector<8x1xf32>
    %c72_110 = arith.constant 72 : index
    %c0_111 = arith.constant 0 : index
    %185 = vector.load %arg2[%c72_110, %c0_111] : memref<80x217xf32, #tpu.memory_space<vmem>>, vector<8x8xf32>
    %c72_112 = arith.constant 72 : index
    %c8_113 = arith.constant 8 : index
    %186 = vector.load %arg2[%c72_112, %c8_113] : memref<80x217xf32, #tpu.memory_space<vmem>>, vector<8x1xf32>
    %c17_i32_114 = arith.constant 17 : i32
    %187 = tpu.dynamic_rotate %178 by %c17_i32_114 dim 1 : vector<8x256xf32>, i32 -> vector<8x256xf32>
    %c0_115 = arith.constant 0 : index
    %c0_116 = arith.constant 0 : index
    %188 = vector.load %arg3[%c0_115, %c0_116] : memref<9x256xf32, #tpu.memory_space<vmem>>, vector<1x256xf32>
    %189 = vector.broadcast %188 : vector<1x256xf32> to vector<8x256xf32>
    %190 = arith.mulf %187, %189 : vector<8x256xf32>
    %c16_i32_117 = arith.constant 16 : i32
    %191 = tpu.dynamic_rotate %178 by %c16_i32_117 dim 1 : vector<8x256xf32>, i32 -> vector<8x256xf32>
    %c1_118 = arith.constant 1 : index
    %c0_119 = arith.constant 0 : index
    %192 = vector.load %arg3[%c1_118, %c0_119] : memref<9x256xf32, #tpu.memory_space<vmem>>, vector<1x256xf32>
    %193 = vector.broadcast %192 : vector<1x256xf32> to vector<8x256xf32>
    %194 = arith.mulf %191, %193 : vector<8x256xf32>
    %c15_i32_120 = arith.constant 15 : i32
    %195 = tpu.dynamic_rotate %178 by %c15_i32_120 dim 1 : vector<8x256xf32>, i32 -> vector<8x256xf32>
    %c2_121 = arith.constant 2 : index
    %c0_122 = arith.constant 0 : index
    %196 = vector.load %arg3[%c2_121, %c0_122] : memref<9x256xf32, #tpu.memory_space<vmem>>, vector<1x256xf32>
    %197 = vector.broadcast %196 : vector<1x256xf32> to vector<8x256xf32>
    %198 = arith.mulf %195, %197 : vector<8x256xf32>
    %c1_i32_123 = arith.constant 1 : i32
    %199 = tpu.dynamic_rotate %178 by %c1_i32_123 dim 1 : vector<8x256xf32>, i32 -> vector<8x256xf32>
    %c3_124 = arith.constant 3 : index
    %c0_125 = arith.constant 0 : index
    %200 = vector.load %arg3[%c3_124, %c0_125] : memref<9x256xf32, #tpu.memory_space<vmem>>, vector<1x256xf32>
    %201 = vector.broadcast %200 : vector<1x256xf32> to vector<8x256xf32>
    %202 = arith.mulf %199, %201 : vector<8x256xf32>
    %c255_i32_126 = arith.constant 255 : i32
    %203 = tpu.dynamic_rotate %178 by %c255_i32_126 dim 1 : vector<8x256xf32>, i32 -> vector<8x256xf32>
    %c5_127 = arith.constant 5 : index
    %c0_128 = arith.constant 0 : index
    %204 = vector.load %arg3[%c5_127, %c0_128] : memref<9x256xf32, #tpu.memory_space<vmem>>, vector<1x256xf32>
    %205 = vector.broadcast %204 : vector<1x256xf32> to vector<8x256xf32>
    %206 = arith.mulf %203, %205 : vector<8x256xf32>
    %c241_i32_129 = arith.constant 241 : i32
    %207 = tpu.dynamic_rotate %178 by %c241_i32_129 dim 1 : vector<8x256xf32>, i32 -> vector<8x256xf32>
    %c6_130 = arith.constant 6 : index
    %c0_131 = arith.constant 0 : index
    %208 = vector.load %arg3[%c6_130, %c0_131] : memref<9x256xf32, #tpu.memory_space<vmem>>, vector<1x256xf32>
    %209 = vector.broadcast %208 : vector<1x256xf32> to vector<8x256xf32>
    %210 = arith.mulf %207, %209 : vector<8x256xf32>
    %c240_i32_132 = arith.constant 240 : i32
    %211 = tpu.dynamic_rotate %178 by %c240_i32_132 dim 1 : vector<8x256xf32>, i32 -> vector<8x256xf32>
    %c7_133 = arith.constant 7 : index
    %c0_134 = arith.constant 0 : index
    %212 = vector.load %arg3[%c7_133, %c0_134] : memref<9x256xf32, #tpu.memory_space<vmem>>, vector<1x256xf32>
    %213 = vector.broadcast %212 : vector<1x256xf32> to vector<8x256xf32>
    %214 = arith.mulf %211, %213 : vector<8x256xf32>
    %c239_i32_135 = arith.constant 239 : i32
    %215 = tpu.dynamic_rotate %178 by %c239_i32_135 dim 1 : vector<8x256xf32>, i32 -> vector<8x256xf32>
    %c8_136 = arith.constant 8 : index
    %c0_137 = arith.constant 0 : index
    %216 = vector.load %arg3[%c8_136, %c0_137] : memref<9x256xf32, #tpu.memory_space<vmem>>, vector<1x256xf32>
    %217 = vector.broadcast %216 : vector<1x256xf32> to vector<8x256xf32>
    %218 = arith.mulf %215, %217 : vector<8x256xf32>
    %219 = tpu.concatenate %190, %194, %198, %202, %178, %206, %210, %214, %218 in 0 : vector<8x256xf32>, vector<8x256xf32>, vector<8x256xf32>, vector<8x256xf32>, vector<8x256xf32>, vector<8x256xf32>, vector<8x256xf32>, vector<8x256xf32>, vector<8x256xf32> -> vector<72x256xf32>
    %220 = arith.truncf %179 : vector<8x72xf32> to vector<8x72xbf16>
    %221 = arith.truncf %219 : vector<72x256xf32> to vector<72x256xbf16>
    %cst_138 = arith.constant dense<0.000000e+00> : vector<8x256xf32>
    %222 = tpu.matmul %220, %221, %cst_138 {dimension_numbers = #tpu.dot_dimension_numbers<[1], [0], [0], [1], [0, 0, 1, 1], [], []>} : vector<8x72xbf16>, vector<72x256xbf16>, vector<8x256xf32> -> vector<8x256xf32>
    %223 = vector.broadcast %180 : vector<8x1xf32> to vector<8x256xf32>
    %224 = arith.addf %222, %223 : vector<8x256xf32>
    %cst_139 = arith.constant 0.000000e+00 : f32
    %225 = vector.broadcast %cst_139 : f32 to vector<8x256xf32>
    %226 = arith.maximumf %224, %225 : vector<8x256xf32>
    %c255_i32_140 = arith.constant 255 : i32
    %227 = tpu.dynamic_rotate %226 by %c255_i32_140 dim 1 : vector<8x256xf32>, i32 -> vector<8x256xf32>
    %228 = arith.maximumf %226, %227 : vector<8x256xf32>
    %c240_i32_141 = arith.constant 240 : i32
    %229 = tpu.dynamic_rotate %228 by %c240_i32_141 dim 1 : vector<8x256xf32>, i32 -> vector<8x256xf32>
    %230 = arith.maximumf %228, %229 : vector<8x256xf32>
    %c34_i32_142 = arith.constant 34 : i32
    %231 = tpu.dynamic_rotate %230 by %c34_i32_142 dim 1 : vector<8x256xf32>, i32 -> vector<8x256xf32>
    %c0_143 = arith.constant 0 : index
    %c0_144 = arith.constant 0 : index
    %232 = vector.load %arg4[%c0_143, %c0_144] : memref<9x256xf32, #tpu.memory_space<vmem>>, vector<1x256xf32>
    %233 = vector.broadcast %232 : vector<1x256xf32> to vector<8x256xf32>
    %234 = arith.mulf %231, %233 : vector<8x256xf32>
    %c32_i32_145 = arith.constant 32 : i32
    %235 = tpu.dynamic_rotate %230 by %c32_i32_145 dim 1 : vector<8x256xf32>, i32 -> vector<8x256xf32>
    %c1_146 = arith.constant 1 : index
    %c0_147 = arith.constant 0 : index
    %236 = vector.load %arg4[%c1_146, %c0_147] : memref<9x256xf32, #tpu.memory_space<vmem>>, vector<1x256xf32>
    %237 = vector.broadcast %236 : vector<1x256xf32> to vector<8x256xf32>
    %238 = arith.mulf %235, %237 : vector<8x256xf32>
    %c30_i32_148 = arith.constant 30 : i32
    %239 = tpu.dynamic_rotate %230 by %c30_i32_148 dim 1 : vector<8x256xf32>, i32 -> vector<8x256xf32>
    %c2_149 = arith.constant 2 : index
    %c0_150 = arith.constant 0 : index
    %240 = vector.load %arg4[%c2_149, %c0_150] : memref<9x256xf32, #tpu.memory_space<vmem>>, vector<1x256xf32>
    %241 = vector.broadcast %240 : vector<1x256xf32> to vector<8x256xf32>
    %242 = arith.mulf %239, %241 : vector<8x256xf32>
    %c2_i32_151 = arith.constant 2 : i32
    %243 = tpu.dynamic_rotate %230 by %c2_i32_151 dim 1 : vector<8x256xf32>, i32 -> vector<8x256xf32>
    %c3_152 = arith.constant 3 : index
    %c0_153 = arith.constant 0 : index
    %244 = vector.load %arg4[%c3_152, %c0_153] : memref<9x256xf32, #tpu.memory_space<vmem>>, vector<1x256xf32>
    %245 = vector.broadcast %244 : vector<1x256xf32> to vector<8x256xf32>
    %246 = arith.mulf %243, %245 : vector<8x256xf32>
    %c254_i32_154 = arith.constant 254 : i32
    %247 = tpu.dynamic_rotate %230 by %c254_i32_154 dim 1 : vector<8x256xf32>, i32 -> vector<8x256xf32>
    %c5_155 = arith.constant 5 : index
    %c0_156 = arith.constant 0 : index
    %248 = vector.load %arg4[%c5_155, %c0_156] : memref<9x256xf32, #tpu.memory_space<vmem>>, vector<1x256xf32>
    %249 = vector.broadcast %248 : vector<1x256xf32> to vector<8x256xf32>
    %250 = arith.mulf %247, %249 : vector<8x256xf32>
    %c226_i32_157 = arith.constant 226 : i32
    %251 = tpu.dynamic_rotate %230 by %c226_i32_157 dim 1 : vector<8x256xf32>, i32 -> vector<8x256xf32>
    %c6_158 = arith.constant 6 : index
    %c0_159 = arith.constant 0 : index
    %252 = vector.load %arg4[%c6_158, %c0_159] : memref<9x256xf32, #tpu.memory_space<vmem>>, vector<1x256xf32>
    %253 = vector.broadcast %252 : vector<1x256xf32> to vector<8x256xf32>
    %254 = arith.mulf %251, %253 : vector<8x256xf32>
    %c224_i32_160 = arith.constant 224 : i32
    %255 = tpu.dynamic_rotate %230 by %c224_i32_160 dim 1 : vector<8x256xf32>, i32 -> vector<8x256xf32>
    %c7_161 = arith.constant 7 : index
    %c0_162 = arith.constant 0 : index
    %256 = vector.load %arg4[%c7_161, %c0_162] : memref<9x256xf32, #tpu.memory_space<vmem>>, vector<1x256xf32>
    %257 = vector.broadcast %256 : vector<1x256xf32> to vector<8x256xf32>
    %258 = arith.mulf %255, %257 : vector<8x256xf32>
    %c222_i32_163 = arith.constant 222 : i32
    %259 = tpu.dynamic_rotate %230 by %c222_i32_163 dim 1 : vector<8x256xf32>, i32 -> vector<8x256xf32>
    %c8_164 = arith.constant 8 : index
    %c0_165 = arith.constant 0 : index
    %260 = vector.load %arg4[%c8_164, %c0_165] : memref<9x256xf32, #tpu.memory_space<vmem>>, vector<1x256xf32>
    %261 = vector.broadcast %260 : vector<1x256xf32> to vector<8x256xf32>
    %262 = arith.mulf %259, %261 : vector<8x256xf32>
    %263 = tpu.concatenate %234, %238, %242, %246, %230, %250, %254, %258, %262 in 0 : vector<8x256xf32>, vector<8x256xf32>, vector<8x256xf32>, vector<8x256xf32>, vector<8x256xf32>, vector<8x256xf32>, vector<8x256xf32>, vector<8x256xf32>, vector<8x256xf32> -> vector<72x256xf32>
    %264 = arith.truncf %263 : vector<72x256xf32> to vector<72x256xbf16>
    %c0_166 = arith.constant 0 : index
    %c0_167 = arith.constant 0 : index
    %265 = vector.load %arg5[%c0_166, %c0_167] : memref<256x64xbf16, #tpu.memory_space<vmem>>, vector<256x64xbf16>
    %cst_168 = arith.constant dense<0.000000e+00> : vector<72x64xf32>
    %266 = tpu.matmul %264, %265, %cst_168 {dimension_numbers = #tpu.dot_dimension_numbers<[1], [0], [0], [1], [0, 0, 1, 1], [], []>} : vector<72x256xbf16>, vector<256x64xbf16>, vector<72x64xf32> -> vector<72x64xf32>
    %267 = arith.truncf %181 : vector<16x72xf32> to vector<16x72xbf16>
    %268 = arith.truncf %266 : vector<72x64xf32> to vector<72x64xbf16>
    %cst_169 = arith.constant dense<0.000000e+00> : vector<16x64xf32>
    %269 = tpu.matmul %267, %268, %cst_169 {dimension_numbers = #tpu.dot_dimension_numbers<[1], [0], [0], [1], [0, 0, 1, 1], [], []>} : vector<16x72xbf16>, vector<72x64xbf16>, vector<16x64xf32> -> vector<16x64xf32>
    %270 = vector.broadcast %182 : vector<16x1xf32> to vector<16x64xf32>
    %271 = arith.addf %269, %270 : vector<16x64xf32>
    %cst_170 = arith.constant 0.000000e+00 : f32
    %272 = vector.broadcast %cst_170 : f32 to vector<16x64xf32>
    %273 = arith.maximumf %271, %272 : vector<16x64xf32>
    %274 = arith.truncf %273 : vector<16x64xf32> to vector<16x64xbf16>
    %c0_171 = arith.constant 0 : index
    %c0_172 = arith.constant 0 : index
    %275 = vector.load %arg6[%c0_171, %c0_172] : memref<64x256xbf16, #tpu.memory_space<vmem>>, vector<64x256xbf16>
    %cst_173 = arith.constant dense<0.000000e+00> : vector<16x256xf32>
    %276 = tpu.matmul %274, %275, %cst_173 {dimension_numbers = #tpu.dot_dimension_numbers<[1], [0], [0], [1], [0, 0, 1, 1], [], []>} : vector<16x64xbf16>, vector<64x256xbf16>, vector<16x256xf32> -> vector<16x256xf32>
    %c17_i32_174 = arith.constant 17 : i32
    %277 = tpu.dynamic_rotate %276 by %c17_i32_174 dim 1 : vector<16x256xf32>, i32 -> vector<16x256xf32>
    %c0_175 = arith.constant 0 : index
    %c0_176 = arith.constant 0 : index
    %278 = vector.load %arg3[%c0_175, %c0_176] : memref<9x256xf32, #tpu.memory_space<vmem>>, vector<1x256xf32>
    %279 = vector.broadcast %278 : vector<1x256xf32> to vector<16x256xf32>
    %280 = arith.mulf %277, %279 : vector<16x256xf32>
    %c16_i32_177 = arith.constant 16 : i32
    %281 = tpu.dynamic_rotate %276 by %c16_i32_177 dim 1 : vector<16x256xf32>, i32 -> vector<16x256xf32>
    %c1_178 = arith.constant 1 : index
    %c0_179 = arith.constant 0 : index
    %282 = vector.load %arg3[%c1_178, %c0_179] : memref<9x256xf32, #tpu.memory_space<vmem>>, vector<1x256xf32>
    %283 = vector.broadcast %282 : vector<1x256xf32> to vector<16x256xf32>
    %284 = arith.mulf %281, %283 : vector<16x256xf32>
    %c15_i32_180 = arith.constant 15 : i32
    %285 = tpu.dynamic_rotate %276 by %c15_i32_180 dim 1 : vector<16x256xf32>, i32 -> vector<16x256xf32>
    %c2_181 = arith.constant 2 : index
    %c0_182 = arith.constant 0 : index
    %286 = vector.load %arg3[%c2_181, %c0_182] : memref<9x256xf32, #tpu.memory_space<vmem>>, vector<1x256xf32>
    %287 = vector.broadcast %286 : vector<1x256xf32> to vector<16x256xf32>
    %288 = arith.mulf %285, %287 : vector<16x256xf32>
    %c1_i32_183 = arith.constant 1 : i32
    %289 = tpu.dynamic_rotate %276 by %c1_i32_183 dim 1 : vector<16x256xf32>, i32 -> vector<16x256xf32>
    %c3_184 = arith.constant 3 : index
    %c0_185 = arith.constant 0 : index
    %290 = vector.load %arg3[%c3_184, %c0_185] : memref<9x256xf32, #tpu.memory_space<vmem>>, vector<1x256xf32>
    %291 = vector.broadcast %290 : vector<1x256xf32> to vector<16x256xf32>
    %292 = arith.mulf %289, %291 : vector<16x256xf32>
    %c255_i32_186 = arith.constant 255 : i32
    %293 = tpu.dynamic_rotate %276 by %c255_i32_186 dim 1 : vector<16x256xf32>, i32 -> vector<16x256xf32>
    %c5_187 = arith.constant 5 : index
    %c0_188 = arith.constant 0 : index
    %294 = vector.load %arg3[%c5_187, %c0_188] : memref<9x256xf32, #tpu.memory_space<vmem>>, vector<1x256xf32>
    %295 = vector.broadcast %294 : vector<1x256xf32> to vector<16x256xf32>
    %296 = arith.mulf %293, %295 : vector<16x256xf32>
    %c241_i32_189 = arith.constant 241 : i32
    %297 = tpu.dynamic_rotate %276 by %c241_i32_189 dim 1 : vector<16x256xf32>, i32 -> vector<16x256xf32>
    %c6_190 = arith.constant 6 : index
    %c0_191 = arith.constant 0 : index
    %298 = vector.load %arg3[%c6_190, %c0_191] : memref<9x256xf32, #tpu.memory_space<vmem>>, vector<1x256xf32>
    %299 = vector.broadcast %298 : vector<1x256xf32> to vector<16x256xf32>
    %300 = arith.mulf %297, %299 : vector<16x256xf32>
    %c240_i32_192 = arith.constant 240 : i32
    %301 = tpu.dynamic_rotate %276 by %c240_i32_192 dim 1 : vector<16x256xf32>, i32 -> vector<16x256xf32>
    %c7_193 = arith.constant 7 : index
    %c0_194 = arith.constant 0 : index
    %302 = vector.load %arg3[%c7_193, %c0_194] : memref<9x256xf32, #tpu.memory_space<vmem>>, vector<1x256xf32>
    %303 = vector.broadcast %302 : vector<1x256xf32> to vector<16x256xf32>
    %304 = arith.mulf %301, %303 : vector<16x256xf32>
    %c239_i32_195 = arith.constant 239 : i32
    %305 = tpu.dynamic_rotate %276 by %c239_i32_195 dim 1 : vector<16x256xf32>, i32 -> vector<16x256xf32>
    %c8_196 = arith.constant 8 : index
    %c0_197 = arith.constant 0 : index
    %306 = vector.load %arg3[%c8_196, %c0_197] : memref<9x256xf32, #tpu.memory_space<vmem>>, vector<1x256xf32>
    %307 = vector.broadcast %306 : vector<1x256xf32> to vector<16x256xf32>
    %308 = arith.mulf %305, %307 : vector<16x256xf32>
    %c17_i32_198 = arith.constant 17 : i32
    %309 = tpu.dynamic_rotate %226 by %c17_i32_198 dim 1 : vector<8x256xf32>, i32 -> vector<8x256xf32>
    %c0_199 = arith.constant 0 : index
    %c0_200 = arith.constant 0 : index
    %310 = vector.load %arg3[%c0_199, %c0_200] : memref<9x256xf32, #tpu.memory_space<vmem>>, vector<1x256xf32>
    %311 = vector.broadcast %310 : vector<1x256xf32> to vector<8x256xf32>
    %312 = arith.mulf %309, %311 : vector<8x256xf32>
    %c16_i32_201 = arith.constant 16 : i32
    %313 = tpu.dynamic_rotate %226 by %c16_i32_201 dim 1 : vector<8x256xf32>, i32 -> vector<8x256xf32>
    %c1_202 = arith.constant 1 : index
    %c0_203 = arith.constant 0 : index
    %314 = vector.load %arg3[%c1_202, %c0_203] : memref<9x256xf32, #tpu.memory_space<vmem>>, vector<1x256xf32>
    %315 = vector.broadcast %314 : vector<1x256xf32> to vector<8x256xf32>
    %316 = arith.mulf %313, %315 : vector<8x256xf32>
    %c15_i32_204 = arith.constant 15 : i32
    %317 = tpu.dynamic_rotate %226 by %c15_i32_204 dim 1 : vector<8x256xf32>, i32 -> vector<8x256xf32>
    %c2_205 = arith.constant 2 : index
    %c0_206 = arith.constant 0 : index
    %318 = vector.load %arg3[%c2_205, %c0_206] : memref<9x256xf32, #tpu.memory_space<vmem>>, vector<1x256xf32>
    %319 = vector.broadcast %318 : vector<1x256xf32> to vector<8x256xf32>
    %320 = arith.mulf %317, %319 : vector<8x256xf32>
    %c1_i32_207 = arith.constant 1 : i32
    %321 = tpu.dynamic_rotate %226 by %c1_i32_207 dim 1 : vector<8x256xf32>, i32 -> vector<8x256xf32>
    %c3_208 = arith.constant 3 : index
    %c0_209 = arith.constant 0 : index
    %322 = vector.load %arg3[%c3_208, %c0_209] : memref<9x256xf32, #tpu.memory_space<vmem>>, vector<1x256xf32>
    %323 = vector.broadcast %322 : vector<1x256xf32> to vector<8x256xf32>
    %324 = arith.mulf %321, %323 : vector<8x256xf32>
    %c255_i32_210 = arith.constant 255 : i32
    %325 = tpu.dynamic_rotate %226 by %c255_i32_210 dim 1 : vector<8x256xf32>, i32 -> vector<8x256xf32>
    %c5_211 = arith.constant 5 : index
    %c0_212 = arith.constant 0 : index
    %326 = vector.load %arg3[%c5_211, %c0_212] : memref<9x256xf32, #tpu.memory_space<vmem>>, vector<1x256xf32>
    %327 = vector.broadcast %326 : vector<1x256xf32> to vector<8x256xf32>
    %328 = arith.mulf %325, %327 : vector<8x256xf32>
    %c241_i32_213 = arith.constant 241 : i32
    %329 = tpu.dynamic_rotate %226 by %c241_i32_213 dim 1 : vector<8x256xf32>, i32 -> vector<8x256xf32>
    %c6_214 = arith.constant 6 : index
    %c0_215 = arith.constant 0 : index
    %330 = vector.load %arg3[%c6_214, %c0_215] : memref<9x256xf32, #tpu.memory_space<vmem>>, vector<1x256xf32>
    %331 = vector.broadcast %330 : vector<1x256xf32> to vector<8x256xf32>
    %332 = arith.mulf %329, %331 : vector<8x256xf32>
    %c240_i32_216 = arith.constant 240 : i32
    %333 = tpu.dynamic_rotate %226 by %c240_i32_216 dim 1 : vector<8x256xf32>, i32 -> vector<8x256xf32>
    %c7_217 = arith.constant 7 : index
    %c0_218 = arith.constant 0 : index
    %334 = vector.load %arg3[%c7_217, %c0_218] : memref<9x256xf32, #tpu.memory_space<vmem>>, vector<1x256xf32>
    %335 = vector.broadcast %334 : vector<1x256xf32> to vector<8x256xf32>
    %336 = arith.mulf %333, %335 : vector<8x256xf32>
    %c239_i32_219 = arith.constant 239 : i32
    %337 = tpu.dynamic_rotate %226 by %c239_i32_219 dim 1 : vector<8x256xf32>, i32 -> vector<8x256xf32>
    %c8_220 = arith.constant 8 : index
    %c0_221 = arith.constant 0 : index
    %338 = vector.load %arg3[%c8_220, %c0_221] : memref<9x256xf32, #tpu.memory_space<vmem>>, vector<1x256xf32>
    %339 = vector.broadcast %338 : vector<1x256xf32> to vector<8x256xf32>
    %340 = arith.mulf %337, %339 : vector<8x256xf32>
    %341 = tpu.concatenate %280, %284, %288, %292, %276, %296, %300, %304, %308, %312, %316, %320, %324, %226, %328, %332 in 0 : vector<16x256xf32>, vector<16x256xf32>, vector<16x256xf32>, vector<16x256xf32>, vector<16x256xf32>, vector<16x256xf32>, vector<16x256xf32>, vector<16x256xf32>, vector<16x256xf32>, vector<8x256xf32>, vector<8x256xf32>, vector<8x256xf32>, vector<8x256xf32>, vector<8x256xf32>, vector<8x256xf32>, vector<8x256xf32> -> vector<200x256xf32>
    %342 = tpu.concatenate %336, %340 in 0 : vector<8x256xf32>, vector<8x256xf32> -> vector<16x256xf32>
    %343 = tpu.concatenate %341, %342 in 0 : vector<200x256xf32>, vector<16x256xf32> -> vector<216x256xf32>
    %344 = arith.truncf %183 : vector<8x216xf32> to vector<8x216xbf16>
    %345 = arith.truncf %343 : vector<216x256xf32> to vector<216x256xbf16>
    %cst_222 = arith.constant dense<0.000000e+00> : vector<8x256xf32>
    %346 = tpu.matmul %344, %345, %cst_222 {dimension_numbers = #tpu.dot_dimension_numbers<[1], [0], [0], [1], [0, 0, 1, 1], [], []>} : vector<8x216xbf16>, vector<216x256xbf16>, vector<8x256xf32> -> vector<8x256xf32>
    %347 = vector.broadcast %184 : vector<8x1xf32> to vector<8x256xf32>
    %348 = arith.addf %346, %347 : vector<8x256xf32>
    %cst_223 = arith.constant 0.000000e+00 : f32
    %349 = vector.broadcast %cst_223 : f32 to vector<8x256xf32>
    %350 = arith.maximumf %348, %349 : vector<8x256xf32>
    %351 = arith.truncf %185 : vector<8x8xf32> to vector<8x8xbf16>
    %352 = arith.truncf %350 : vector<8x256xf32> to vector<8x256xbf16>
    %cst_224 = arith.constant dense<0.000000e+00> : vector<8x256xf32>
    %353 = tpu.matmul %351, %352, %cst_224 {dimension_numbers = #tpu.dot_dimension_numbers<[1], [0], [0], [1], [0, 0, 1, 1], [], []>} : vector<8x8xbf16>, vector<8x256xbf16>, vector<8x256xf32> -> vector<8x256xf32>
    %354 = vector.broadcast %186 : vector<8x1xf32> to vector<8x256xf32>
    %355 = arith.addf %353, %354 : vector<8x256xf32>
    %356 = vector.extract_strided_slice %178 {offsets = [0, 0], sizes = [4, 256], strides = [1, 1]} : vector<8x256xf32> to vector<4x256xf32>
    %c0_225 = arith.constant 0 : index
    %c0_226 = arith.constant 0 : index
    %c0_227 = arith.constant 0 : index
    %357 = vector.load %arg7[%c0_225, %c0_226, %c0_227] : memref<1x4x256xf32, #tpu.memory_space<vmem>>, vector<1x4x256xf32>
    %358 = vector.shape_cast %357 : vector<1x4x256xf32> to vector<4x256xf32>
    %359 = vector.shape_cast %356 : vector<4x256xf32> to vector<1x4x256xf32>
    tpu.vector_store %arg7[%c0_225, %c0_226, %c0_227], %359 {strides = array<i32>} : memref<1x4x256xf32, #tpu.memory_space<vmem>>, vector<1x4x256xf32>,
    %360 = vector.extract_strided_slice %355 {offsets = [0, 0], sizes = [4, 256], strides = [1, 1]} : vector<8x256xf32> to vector<4x256xf32>
    %c0_228 = arith.constant 0 : index
    %c0_229 = arith.constant 0 : index
    %c0_230 = arith.constant 0 : index
    %361 = vector.load %arg8[%c0_228, %c0_229, %c0_230] : memref<1x4x256xf32, #tpu.memory_space<vmem>>, vector<1x4x256xf32>
    %362 = vector.shape_cast %361 : vector<1x4x256xf32> to vector<4x256xf32>
    %363 = vector.shape_cast %360 : vector<4x256xf32> to vector<1x4x256xf32>
    tpu.vector_store %arg8[%c0_228, %c0_229, %c0_230], %363 {strides = array<i32>} : memref<1x4x256xf32, #tpu.memory_space<vmem>>, vector<1x4x256xf32>,
    return
  }
  func.func @transform_0(%arg0: i32) -> (i32, i32, i32) {
    %c0_i32 = arith.constant 0 : i32
    %c0_i32_0 = arith.constant 0 : i32
    %c0_i32_1 = arith.constant 0 : i32
    return %arg0, %c0_i32, %c0_i32_0 : i32, i32, i32
  }
  func.func @transform_1(%arg0: i32) -> (i32, i32) {
    %c0_i32 = arith.constant 0 : i32
    %c0_i32_0 = arith.constant 0 : i32
    %c0_i32_1 = arith.constant 0 : i32
    return %c0_i32, %c0_i32_0 : i32, i32
  }
  func.func @transform_2(%arg0: i32) -> (i32, i32) {
    %c0_i32 = arith.constant 0 : i32
    %c0_i32_0 = arith.constant 0 : i32
    %c0_i32_1 = arith.constant 0 : i32
    return %c0_i32, %c0_i32_0 : i32, i32
  }
  func.func @transform_3(%arg0: i32) -> (i32, i32) {
    %c0_i32 = arith.constant 0 : i32
    %c0_i32_0 = arith.constant 0 : i32
    %c0_i32_1 = arith.constant 0 : i32
    return %c0_i32, %c0_i32_0 : i32, i32
  }
  func.func @transform_4(%arg0: i32) -> (i32, i32) {
    %c0_i32 = arith.constant 0 : i32
    %c0_i32_0 = arith.constant 0 : i32
    %c0_i32_1 = arith.constant 0 : i32
    return %c0_i32, %c0_i32_0 : i32, i32
  }
  func.func @transform_5(%arg0: i32) -> (i32, i32) {
    %c0_i32 = arith.constant 0 : i32
    %c0_i32_0 = arith.constant 0 : i32
    %c0_i32_1 = arith.constant 0 : i32
    return %c0_i32, %c0_i32_0 : i32, i32
  }
  func.func @transform_6(%arg0: i32) -> (i32, i32, i32) {
    %c0_i32 = arith.constant 0 : i32
    %c0_i32_0 = arith.constant 0 : i32
    %c0_i32_1 = arith.constant 0 : i32
    return %arg0, %c0_i32, %c0_i32_0 : i32, i32, i32
  }
  func.func @transform_7(%arg0: i32) -> (i32, i32, i32) {
    %c0_i32 = arith.constant 0 : i32
    %c0_i32_0 = arith.constant 0 : i32
    %c0_i32_1 = arith.constant 0 : i32
    return %arg0, %c0_i32, %c0_i32_0 : i32, i32, i32
  }
}

</mosaic_0001>

<bundles_post_ra>
// kernel: model3_forward.1
= control target key start
LH: loop header
LB: loop body
LE: loop exit
PB: predicated region body
PF: predicated region fallthrough
CT: control target
= control target key end

     0   :  { %s2646_s24 = smov 0   ;;  %s4084_s0 = inlined_call_operand.vmem [shape: f32[2,8,256], index: 0, kind: input, shape index: {}]   ;;  %s4085_s1 = inlined_call_operand.vmem [shape: f32[80,217], index: 1, kind: input, shape index: {}]   ;;  %s4086_s2 = inlined_call_operand.vmem [shape: f32[9,256], index: 2, kind: input, shape index: {}]   ;;  %s4087_s3 = inlined_call_operand.vmem [shape: f32[9,256], index: 3, kind: input, shape index: {}]   ;;  %s4088_s4 = inlined_call_operand.vmem [shape: bf16[256,64], index: 4, kind: input, shape index: {}]   ;;  %s4089_s5 = inlined_call_operand.vmem [shape: bf16[64,256], index: 5, kind: input, shape index: {}]   ;;  %s4090_s6 = inlined_call_operand.vmem [shape: f32[2,4,256], index: 6, kind: output, shape index: {0}]   ;;  %s4091_s7 = inlined_call_operand.vmem [shape: f32[2,4,256], index: 7, kind: output, shape index: {1}]  }
   0x1 LB: > { %s2284_s25 = sadd.s32 4294967295, %s2582_s24   ;;  %p2288_p0 = scmp.ge.s32.totalorder %s2582_s24, 1  ;;  %s2582_s24 = sphi %s2646_s24, %s18_s24  }
   0x2   : > { %p240_p1 = scmp.lt.s32.totalorder %s2582_s24, 3 }
   0x4   : > { %p241_p2 = pnand %p2288_p0, %p240_p1 }
   0x6   : > { %244 = sbr.rel (%p241_p2) target bundleno = 4151 (0x1037), region = 44 }
   0xd   : > { %p277_p3 = scmp.lt.s32.totalorder %s2284_s25, 1  ;;  %s2584_s30 = smov 16   ;;  %v4104_v2 = vmov 0   ;;  %v4106_v3 = vmov 72   ;;  %v2702_v4 = vld [vmem:[%s4085_s1] sm:$0xff]  ;;  %v305_v5 = vlaneseq  ;;  %vm498_vm8 = vcmask 1043456  }
   0xe   : > { %s2585_s8 = smov 17   ;;  %s2586_s9 = smov 15   ;;  %537 = vmatprep.mubr.bf16.mxu1 %v4104_v2  ;;  %2516 = vset.pattern.permute.xlu0 %v4106_v3  ;;  %v310_v10 = vld [vmem:[%s4086_s2] ss:$8 sm:$0x3]  ;;  %vm494_vm9 = vcmask 588800  }
   0xf   : > { %s4166_s25 = smov (!%p277_p3, %s2284_s25), 1  ;;  %s2587_s10 = smov 1   ;;  %2517 = vset.pattern.permute.xlu1 %v4106_v3  ;;  %v313_v6 = vshrl.u32 %v305_v5, 7  ;;  %v2705_v7 = vand.u32 127, %v305_v5 }
  0x10   : > { %s2351_s26 = sshll.u32 %s4166_s25, 4  ;;  %s2588_s11 = smov 127   ;;  %v2295_v11 = vld [vmem:[%s4086_s2 + $0x1] ss:$8 sm:$0x3] }
  0x11   : > { %s281_s29 = scalar_lea.vmem %s4084_s0, %s2351_s26  ;;  %s4122_s12 = smov 113   ;;  %v2707_v8 = vsub.s32 0, %v313_v6  ;;  %v2709_v9 = vsub.s32 1, %v313_v6  ;;  %vm328_vm0 = vcmp.lt.s32.totalorder %v2705_v7, 16  ;;  %vm307_vm1 = vcmp.lt.s32.totalorder %v2705_v7, 17 }
  0x12   : > { %v2660_v0 = vld [vmem:[%s281_s29] sm:$0xff]  ;;  %v2666_v1 = vld [vmem:[%s281_s29 + $0x8] sm:$0xff]  ;;  %s2591_s13 = smov 112   ;;  %s4120_s14 = smov 111   ;;  %vm350_vm2 = vcmp.lt.s32.totalorder %v2705_v7, 15  ;;  %vm372_vm3 = vcmp.lt.s32.totalorder %v2705_v7, 1 }
  0x13   : > { %324 = vrot.lane.b32.xlu1 %v2660_v0, %s2584_s30  ;;  %301 = vrot.lane.b32.xlu0 %v2660_v0, %s2585_s8  ;;  %v2720_v14 = vrot.slane %v310_v10, %v2709_v9  ;;  %v2723_v15 = vrot.slane %v2295_v11, %v2709_v9  ;;  %v2726_v16 = vrot.slane %v310_v10, %v2707_v8  ;;  %v2296_v28 = vld [vmem:[%s4086_s2 + $0x2] ss:$8 sm:$0x3]  ;;  %v2297_v29 = vld [vmem:[%s4086_s2 + $0x3] ss:$8 sm:$0x3] }
  0x14   : > { %v2729_v17 = vrot.slane %v2295_v11, %v2707_v8  ;;  %v2752_v34 = vrot.slane %v2296_v28, %v2707_v8  ;;  %v2755_v35 = vrot.slane %v2296_v28, %v2709_v9  ;;  %v2758_v36 = vrot.slane %v2297_v29, %v2707_v8  ;;  %v2298_v38 = vld [vmem:[%s4086_s2 + $0x5] ss:$8 sm:$0x3]  ;;  %v2299_v59 = vld [vmem:[%s4086_s2 + $0x6] ss:$8 sm:$0x3] }
  0x15   : > { %v2761_v37 = vrot.slane %v2297_v29, %v2709_v9  ;;  %vm394_vm4 = vcmp.lt.s32.totalorder %v2705_v7, 127  ;;  %v2776_v45 = vrot.slane %v2298_v38, %v2707_v8  ;;  %v2779_v46 = vrot.slane %v2298_v38, %v2709_v9  ;;  %v2300_v60 = vld [vmem:[%s4086_s2 + $0x7] ss:$8 sm:$0x3]  ;;  %s2594_s28 = smov 34   ;;  %s2595_s29 = smov 32  }
  0x16   : > { %vm416_vm5 = vcmp.lt.s32.totalorder %v2705_v7, 113  ;;  %v2801_v6 = vrot.slane %v2299_v59, %v2707_v8  ;;  %v2804_v10 = vrot.slane %v2299_v59, %v2709_v9  ;;  %vm438_vm6 = vcmp.lt.s32.totalorder %v2705_v7, 112  ;;  %s2596_s15 = smov 30   ;;  %s2597_s16 = smov 2  }
  0x17   : > { %326 = vrot.lane.b32.xlu1 %v2666_v1, %s2584_s30  ;;  %303 = vrot.lane.b32.xlu0 %v2666_v1, %s2585_s8  ;;  %v2808_v11 = vrot.slane %v2300_v60, %v2707_v8  ;;  %vm460_vm7 = vcmp.lt.s32.totalorder %v2705_v7, 111  ;;  %s2598_s17 = smov 126   ;;  %s4099_s18 = smov 98   ;;  %vm568_vm10 = vcmp.lt.s32.totalorder %v2705_v7, 34  ;;  %vm589_vm11 = vcmp.lt.s32.totalorder %v2705_v7, 32 }
  0x18   : > { %s4097_s19 = smov 96   ;;  %s4092_s20 = smov 94   ;;  %vm611_vm12 = vcmp.lt.s32.totalorder %v2705_v7, 30  ;;  %vm4095_vm13 = vcmp.lt.s32.totalorder %v2705_v7, 2  ;;  %vm4094_vm14 = vcmp.lt.s32.totalorder %v2705_v7, 126  ;;  %vm677_vm15 = vcmp.lt.s32.totalorder %v2705_v7, 98 }
  0x19   : > { %s4162_s26 = smov 113   ;;  %s4164_s27 = sshll.u32 %s4166_s25, 3 }
  0x1b   : > { %348 = vrot.lane.b32.xlu1 %v2666_v1, %s2586_s9  ;;  %346 = vrot.lane.b32.xlu0 %v2660_v0, %s2586_s9 }
  0x1f   : > { %370 = vrot.lane.b32.xlu1 %v2666_v1, %s2587_s10  ;;  %368 = vrot.lane.b32.xlu0 %v2660_v0, %s2587_s10 }
  0x23   : > { %392 = vrot.lane.b32.xlu1 %v2666_v1, %s2588_s11  ;;  %390 = vrot.lane.b32.xlu0 %v2660_v0, %s2588_s11 }
  0x27   : > { %414 = vrot.lane.b32.xlu1 %v2666_v1, %s4122_s12  ;;  %412 = vrot.lane.b32.xlu0 %v2660_v0, %s4122_s12 }
  0x2b   : > { %436 = vrot.lane.b32.xlu1 %v2666_v1, %s2591_s13  ;;  %434 = vrot.lane.b32.xlu0 %v2660_v0, %s2591_s13 }
  0x2f   : > { %458 = vrot.lane.b32.xlu1 %v2666_v1, %s4120_s14  ;;  %456 = vrot.lane.b32.xlu0 %v2660_v0, %s4120_s14 }
  0x33   : > { %491 = vperm.xlu0 %2516, %v2702_v4  }
  0x85   : > { %v325_v12 = vpop.permute.xlu1 %324  ;;  %v302_v13 = vpop.permute.xlu0 %301 }
  0x89   : > { %v327_v18 = vpop.permute.xlu1 %326  ;;  %v304_v19 = vpop.permute.xlu0 %303 }
  0x8a   : > { %v330_v20 = vsel %vm328_vm0, %v327_v18, %v325_v12  ;;  %v309_v21 = vsel %vm307_vm1, %v304_v19, %v302_v13  ;;  %v308_v22 = vsel %vm307_vm1, %v302_v13, %v304_v19  ;;  %v329_v23 = vsel %vm328_vm0, %v325_v12, %v327_v18 }
  0x8b   : > { %v323_v24 = vmul.f32 %v2720_v14, %v308_v22  ;;  %v345_v25 = vmul.f32 %v2723_v15, %v329_v23  ;;  %v322_v26 = vmul.f32 %v2726_v16, %v309_v21  ;;  %v344_v27 = vmul.f32 %v2729_v17, %v330_v20 }
  0x8c   : > { %v2811_v12 = vrot.slane %v2300_v60, %v2709_v9  ;;  %v2524_v60 = vld [vmem:[%s4088_s4 + $0x40] sm:$0xff]  }
  0x8d   : > { %v349_v30 = vpop.permute.xlu1 %348  ;;  %v347_v31 = vpop.permute.xlu0 %346  ;;  %v480_v32 = vpack.c.bf16 %v345_v25, %v323_v24  ;;  %v479_v33 = vpack.c.bf16 %v344_v27, %v322_v26 }
  0x8e   : > { %v351_v39 = vsel %vm350_vm2, %v347_v31, %v349_v30  ;;  %v352_v40 = vsel %vm350_vm2, %v349_v30, %v347_v31 }
  0x8f   : > { %505 = vmatprep.subr.bf16.mxu1 %v480_v32  ;;  %v366_v47 = vmul.f32 %v2752_v34, %v352_v40  ;;  %v367_v48 = vmul.f32 %v2755_v35, %v351_v39 }
  0x90   : > { %506 = vmatpush1.bf16.msra.mxu1 %v479_v33 }
  0x91   : > { %v371_v41 = vpop.permute.xlu1 %370  ;;  %v369_v42 = vpop.permute.xlu0 %368 }
  0x92   : > { %v373_v43 = vsel %vm372_vm3, %v369_v42, %v371_v41  ;;  %v374_v44 = vsel %vm372_vm3, %v371_v41, %v369_v42 }
  0x93   : > { %v388_v49 = vmul.f32 %v2758_v36, %v374_v44  ;;  %v389_v50 = vmul.f32 %v2761_v37, %v373_v43  ;;  %v478_v43 = vpack.c.bf16 %v2702_v4, %v2702_v4 }
  0x95   : > { %v393_v51 = vpop.permute.xlu1 %392  ;;  %v391_v52 = vpop.permute.xlu0 %390  ;;  %v482_v53 = vpack.c.bf16 %v389_v50, %v367_v48  ;;  %v481_v54 = vpack.c.bf16 %v388_v49, %v366_v47 }
  0x96   : > { %v395_v55 = vsel %vm394_vm4, %v391_v52, %v393_v51  ;;  %v396_v56 = vsel %vm394_vm4, %v393_v51, %v391_v52 }
  0x97   : > { %v410_v57 = vmul.f32 %v2776_v45, %v395_v55  ;;  %v411_v58 = vmul.f32 %v2779_v46, %v396_v56  ;;  %507 = vmatprep.subr.bf16.mxu1 %v482_v53 }
  0x98   : > { %508 = vmatpush1.bf16.msra.mxu1 %v481_v54 }
  0x99   : > { %v415_v61 = vpop.permute.xlu1 %414  ;;  %v413_v62 = vpop.permute.xlu0 %412  ;;  %v484_v63 = vpack.c.bf16 %v411_v58, %v2666_v1  ;;  %v483_v5 = vpack.c.bf16 %v410_v57, %v2660_v0  ;;  %v2301_v1 = vld [vmem:[%s4086_s2 + $0x10] ss:$8 sm:$0x3] }
  0x9a   : > { %v417_v0 = vsel %vm416_vm5, %v413_v62, %v415_v61  ;;  %v418_v13 = vsel %vm416_vm5, %v415_v61, %v413_v62  ;;  %v2826_v22 = vrot.slane %v2301_v1, %v2709_v9  ;;  %v2829_v23 = vrot.slane %v2301_v1, %v2707_v8  ;;  %v2525_v61 = vld [vmem:[%s4088_s4] sm:$0xff]   ;;  %v2526_v62 = vld [vmem:[%s4088_s4 + $0x48] sm:$0xff]   ;;  %v2529_v1 = vld [vmem:[%s4088_s4 + $0x10] sm:$0xff]  }
  0x9b   : > { %509 = vmatprep.subr.bf16.mxu1 %v484_v63  ;;  %v432_v24 = vmul.f32 %v2801_v6, %v417_v0  ;;  %v433_v25 = vmul.f32 %v2804_v10, %v418_v13  ;;  %v2527_v63 = vld [vmem:[%s4088_s4 + $0x8] sm:$0xff]   ;;  %v2530_v0 = vld [vmem:[%s4088_s4 + $0x58] sm:$0xff]  }
  0x9c   : > { %510 = vmatpush1.bf16.msra.mxu1 %v483_v5  ;;  %v2528_v5 = vld [vmem:[%s4088_s4 + $0x50] sm:$0xff]   ;;  %v2531_v13 = vld [vmem:[%s4088_s4 + $0x18] sm:$0xff]  }
  0x9d   : > { %v437_v18 = vpop.permute.xlu1 %436  ;;  %v435_v19 = vpop.permute.xlu0 %434 }
  0x9e   : > { %v439_v20 = vsel %vm438_vm6, %v435_v19, %v437_v18  ;;  %v440_v21 = vsel %vm438_vm6, %v437_v18, %v435_v19  ;;  %v2532_v18 = vld [vmem:[%s4088_s4 + $0x60] sm:$0xff]  }
  0x9f   : > { %v454_v26 = vmul.f32 %v2808_v11, %v439_v20  ;;  %v455_v27 = vmul.f32 %v2811_v12, %v440_v21  ;;  %v2533_v19 = vld [vmem:[%s4088_s4 + $0x20] sm:$0xff]   ;;  %v2534_v20 = vld [vmem:[%s4088_s4 + $0x68] sm:$0xff]  }
  0xa0   : > { %v2535_v21 = vld [vmem:[%s4088_s4 + $0x28] sm:$0xff]  }
  0xa1   : > { %v459_v28 = vpop.permute.xlu1 %458  ;;  %v457_v29 = vpop.permute.xlu0 %456  ;;  %v486_v30 = vpack.c.bf16 %v455_v27, %v433_v25  ;;  %v485_v31 = vpack.c.bf16 %v454_v26, %v432_v24  ;;  %v2536_v24 = vld [vmem:[%s4088_s4 + $0x70] sm:$0xff]   ;;  %v2538_v26 = vld [vmem:[%s4088_s4 + $0x78] sm:$0xff]  }
  0xa2   : > { %v461_v32 = vsel %vm460_vm7, %v457_v29, %v459_v28  ;;  %v462_v33 = vsel %vm460_vm7, %v459_v28, %v457_v29  ;;  %v2537_v25 = vld [vmem:[%s4088_s4 + $0x30] sm:$0xff]   ;;  %v2539_v27 = vld [vmem:[%s4088_s4 + $0x38] sm:$0xff]  }
  0xa3   : > { %v477_v38 = vmul.f32 %v2826_v22, %v462_v33  ;;  %511 = vmatprep.subr.bf16.mxu1 %v486_v30  ;;  %v476_v39 = vmul.f32 %v2829_v23, %v461_v32 }
  0xa4   : > { %512 = vmatpush1.bf16.msra.mxu1 %v485_v31 }
  0xa5   : > { %v488_v40 = vpack.c.bf16 %v477_v38, %v477_v38  ;;  %v487_v41 = vpack.c.bf16 %v476_v39, %v476_v39  ;;  %v2959_v38 = vld [vmem:[%s4085_s1 + $0x20] sm:$0xff]  ;;  %v2964_v39 = vld [vmem:[%s4085_s1 + $0x10] sm:$0xff] }
  0xa7   : > { %2302 = vmatprep.subr.msk.bf16.mxu1 %vm498_vm8, %v488_v40  ;;  %v500_v42 = vsel %vm498_vm8, %v487_v41, 0  ;;  %v571_v40 = vld [vmem:[%s4087_s3] ss:$8 sm:$0x3] }
  0xa8   : > { %514 = vmatpush1.bf16.msra.mxu1 %v500_v42  ;;  %v2304_v41 = vld [vmem:[%s4087_s3 + $0x1] ss:$8 sm:$0x3] }
  0xa9   : > { %2354 = vmatprep.subr.bf16.mxu1 %v2524_v60 }
  0xab   : > { %2303 = vmatmul.mubr.msk.bf16.vlgmr.msra.gmra.mrb[0].mxu1 %vm494_vm9, %v478_v43 }
  0xac   : > { %2355 = vmatpush3.bf16.msra.mxu1 %v2525_v61 }
  0xad   : > { %2356 = vmatprep.subr.bf16.mxu1 %v2526_v62 }
  0xb0   : > { %2357 = vmatpush3.bf16.msra.mxu1 %v2527_v63  ;;  %v2305_v63 = vld [vmem:[%s4087_s3 + $0x2] ss:$8 sm:$0x3] }
  0xb1   : > { %2358 = vmatprep.subr.bf16.mxu1 %v2528_v5  ;;  %v2306_v5 = vld [vmem:[%s4087_s3 + $0x3] ss:$8 sm:$0x3] }
  0xb2   : > { %v492_v44 = vpop.permute.xlu0 %491 }
  0xb4   : > { %2359 = vmatpush3.bf16.msra.mxu1 %v2529_v1 }
  0xb5   : > { %2360 = vmatprep.subr.bf16.mxu1 %v2530_v0 }
  0xb8   : > { %2361 = vmatpush3.bf16.msra.mxu1 %v2531_v13 }
  0xb9   : > { %2362 = vmatprep.subr.bf16.mxu1 %v2532_v18 }
  0xbc   : > { %2363 = vmatpush3.bf16.msra.mxu1 %v2533_v19  ;;  %v3012_v19 = vrot.slane %v2305_v63, %v2707_v8 }
  0xbd   : > { %2364 = vmatprep.subr.bf16.mxu1 %v2534_v20  ;;  %v3015_v20 = vrot.slane %v2305_v63, %v2709_v9  ;;  %v2309_v63 = vld [vmem:[%s4087_s3 + $0x7] ss:$8 sm:$0x3] }
  0xc0   : > { %2365 = vmatpush3.bf16.msra.mxu1 %v2535_v21  ;;  %v3019_v21 = vrot.slane %v2306_v5, %v2707_v8 }
  0xc1   : > { %2366 = vmatprep.subr.bf16.mxu1 %v2536_v24  ;;  %v3022_v24 = vrot.slane %v2306_v5, %v2709_v9 }
  0xc2   : > { %4124 = vst [vmem:[#allocation2_spill] sm:$0xff] %v3019_v21 }
  0xc3   : > { %4125 = vst [vmem:[#allocation3_spill] sm:$0xff] %v3022_v24 }
  0xc4   : > { %2367 = vmatpush3.bf16.msra.mxu1 %v2537_v25  ;;  %v2307_v25 = vld [vmem:[%s4087_s3 + $0x5] ss:$8 sm:$0x3] }
  0xc5   : > { %2368 = vmatprep.subr.bf16.mxu1 %v2538_v26 }
  0xc8   : > { %2369 = vmatpush3.bf16.msra.mxu1 %v2539_v27 }
 0x17e   : > { %v539_v47 = vpop.f32.mrb[0].mxu1 }
 0x17f   : > { %v540_v48 = vadd.f32 %v539_v47, %v492_v44  ;;  %v541_v49 = vpop.f32.mrb[1].mxu1  ;;  %v2983_v47 = vrot.slane %v571_v40, %v2709_v9 }
 0x180   : > { %v543_v50 = vpop.f32.mrb[2].mxu1  ;;  %v542_v52 = vadd.f32 %v541_v49, %v492_v44  ;;  %v2980_v44 = vrot.slane %v571_v40, %v2707_v8  ;;  %v2990_v49 = vrot.slane %v2304_v41, %v2709_v9  ;;  %v3037_v40 = vrot.slane %v2307_v25, %v2709_v9 }
 0x181   : > { %v2846_v51 = vmax.f32 %v540_v48, 0.0  ;;  %v544_v53 = vpop.f32.mrb[3].mxu1  ;;  %v2987_v48 = vrot.slane %v2304_v41, %v2707_v8 }
 0x182   : > { %v2850_v54 = vmax.f32 %v542_v52, 0.0  ;;  %4126 = vst [vmem:[#allocation4_spill] sm:$0xff] %v3037_v40 }
 0x183   : > { %548 = vrot.lane.b32.xlu1 %v2846_v51, %s2588_s11 }
 0x187   : > { %550 = vrot.lane.b32.xlu1 %v2850_v54, %s2588_s11 }
 0x1f5   : > { %v549_v4 = vpop.permute.xlu1 %548 }
 0x1f9   : > { %v551_v55 = vpop.permute.xlu1 %550 }
 0x1fa   : > { %v2856_v56 = vsel %vm394_vm4, %v549_v4, %v551_v55  ;;  %v2860_v57 = vsel %vm394_vm4, %v551_v55, %v549_v4 }
 0x1fb   : > { %v555_v58 = vmax.f32 %v2850_v54, %v2860_v57  ;;  %v554_v59 = vmax.f32 %v2846_v51, %v2856_v56 }
 0x1fd   : > { %558 = vrot.lane.b32.xlu1 %v555_v58, %s2591_s13  ;;  %556 = vrot.lane.b32.xlu0 %v554_v59, %s2591_s13 }
 0x26f   : > { %v559_v28 = vpop.permute.xlu1 %558  ;;  %v557_v29 = vpop.permute.xlu0 %556 }
 0x270   : > { %v560_v30 = vsel %vm438_vm6, %v557_v29, %v559_v28  ;;  %v561_v31 = vsel %vm438_vm6, %v559_v28, %v557_v29 }
 0x271   : > { %v2920_v32 = vmax.f32 %v554_v59, %v560_v30  ;;  %v2922_v33 = vmax.f32 %v555_v58, %v561_v31 }
 0x273   : > { %566 = vrot.lane.b32.xlu1 %v2922_v33, %s2594_s28  ;;  %564 = vrot.lane.b32.xlu0 %v2920_v32, %s2594_s28 }
 0x277   : > { %587 = vrot.lane.b32.xlu1 %v2922_v33, %s2595_s29  ;;  %585 = vrot.lane.b32.xlu0 %v2920_v32, %s2595_s29 }
 0x27b   : > { %609 = vrot.lane.b32.xlu1 %v2922_v33, %s2596_s15  ;;  %607 = vrot.lane.b32.xlu0 %v2920_v32, %s2596_s15 }
 0x27f   : > { %631 = vrot.lane.b32.xlu1 %v2922_v33, %s2597_s16  ;;  %629 = vrot.lane.b32.xlu0 %v2920_v32, %s2597_s16 }
 0x283   : > { %653 = vrot.lane.b32.xlu1 %v2922_v33, %s2598_s17  ;;  %651 = vrot.lane.b32.xlu0 %v2920_v32, %s2598_s17 }
 0x287   : > { %675 = vrot.lane.b32.xlu1 %v2922_v33, %s4099_s18  ;;  %673 = vrot.lane.b32.xlu0 %v2920_v32, %s4099_s18 }
 0x28b   : > { %697 = vrot.lane.b32.xlu1 %v2922_v33, %s4097_s19  ;;  %695 = vrot.lane.b32.xlu0 %v2920_v32, %s4097_s19 }
 0x28f   : > { %719 = vrot.lane.b32.xlu1 %v2922_v33, %s4092_s20  ;;  %717 = vrot.lane.b32.xlu0 %v2920_v32, %s4092_s20  ;;  %s4119_s20 = sshll.u32 %s4166_s25, 3 }
 0x290   : > { %s286_s19 = scalar_lea.vmem %s4090_s6, %s4119_s20  ;;  %s4163_s20 = smov 111  }
 0x293   : > { %962 = vperm.xlu1 %2517, %v2959_v38   ;;  %957 = vperm.xlu0 %2516, %v2964_v39  }
 0x297   : > { %1240 = vrot.lane.b32.xlu1 %v2850_v54, %s2585_s8  ;;  %1238 = vrot.lane.b32.xlu0 %v2846_v51, %s2585_s8 }
 0x2e5   : > { %v567_v42 = vpop.permute.xlu1 %566  ;;  %v565_v43 = vpop.permute.xlu0 %564 }
 0x2e6   : > { %v569_v50 = vsel %vm568_vm10, %v565_v43, %v567_v42  ;;  %v570_v52 = vsel %vm568_vm10, %v567_v42, %v565_v43 }
 0x2e7   : > { %v583_v59 = vmul.f32 %v2980_v44, %v570_v52  ;;  %v584_v60 = vmul.f32 %v2983_v47, %v569_v50 }
 0x2e9   : > { %v588_v53 = vpop.permute.xlu1 %587  ;;  %v586_v4 = vpop.permute.xlu0 %585 }
 0x2ea   : > { %v590_v55 = vsel %vm589_vm11, %v586_v4, %v588_v53  ;;  %v591_v58 = vsel %vm589_vm11, %v588_v53, %v586_v4 }
 0x2eb   : > { %v605_v61 = vmul.f32 %v2987_v48, %v591_v58  ;;  %v606_v62 = vmul.f32 %v2990_v49, %v590_v55  ;;  %v3044_v58 = vrot.slane %v2307_v25, %v2707_v8  ;;  %v3065_v25 = vrot.slane %v2309_v63, %v2709_v9 }
 0x2ed   : > { %v739_v1 = vpack.c.bf16 %v605_v61, %v583_v59  ;;  %v610_v0 = vpop.permute.xlu1 %609  ;;  %v608_v13 = vpop.permute.xlu0 %607  ;;  %v740_v18 = vpack.c.bf16 %v606_v62, %v584_v60  ;;  %4127 = vst [vmem:[#allocation5_spill] sm:$0xff] %v3044_v58  ;;  %v2308_v62 = vld [vmem:[%s4087_s3 + $0x6] ss:$8 sm:$0x3]  ;;  %4129 = vst [vmem:[#allocation7_spill] sm:$0xff] %v3065_v25 }
 0x2ee   : > { %v612_v26 = vsel %vm611_vm12, %v608_v13, %v610_v0  ;;  %v613_v27 = vsel %vm611_vm12, %v610_v0, %v608_v13 }
 0x2ef   : > { %909 = vmatprep.mubr.bf16.mxu1 %v740_v18  ;;  %v627_v41 = vmul.f32 %v3012_v19, %v613_v27  ;;  %v628_v42 = vmul.f32 %v3015_v20, %v612_v26  ;;  %v3061_v18 = vrot.slane %v2308_v62, %v2709_v9  ;;  %v2310_v27 = vld [vmem:[%s4087_s3 + $0x10] ss:$8 sm:$0x3] }
 0x2f0   : > { %910 = vmatmul.mubr.bf16.vlgmr.msra.gmra.mrb[4].mxu1 %v739_v1 }
 0x2f1   : > { %v632_v28 = vpop.permute.xlu1 %631  ;;  %v630_v29 = vpop.permute.xlu0 %629  ;;  %4128 = vst [vmem:[#allocation6_spill] sm:$0xff] %v3061_v18 }
 0x2f2   : > { %v634_v30 = vsel %vm4095_vm13, %v630_v29, %v632_v28  ;;  %v635_v31 = vsel %vm4095_vm13, %v632_v28, %v630_v29  ;;  %v3073_v29 = vrot.slane %v2309_v63, %v2707_v8  ;;  %vm4101_vm13 = vcmp.lt.s32.totalorder %v2705_v7, 94 }
 0x2f3   : > { %v649_v43 = vmul.f32 %v3019_v21, %v635_v31  ;;  %v650_v50 = vmul.f32 %v3022_v24, %v634_v30 }
 0x2f4   : > { %4130 = vst [vmem:[#allocation8_spill] sm:$0xff] %v3073_v29 }
 0x2f5   : > { %v654_v52 = vpop.permute.xlu1 %653  ;;  %v652_v53 = vpop.permute.xlu0 %651  ;;  %v742_v4 = vpack.c.bf16 %v650_v50, %v628_v42  ;;  %v741_v55 = vpack.c.bf16 %v649_v43, %v627_v41  ;;  %v3084_v50 = vrot.slane %v2310_v27, %v2709_v9 }
 0x2f6   : > { %v657_v59 = vsel %vm4094_vm14, %v654_v52, %v652_v53  ;;  %v656_v60 = vsel %vm4094_vm14, %v652_v53, %v654_v52  ;;  %vm4096_vm14 = vcmp.lt.s32.totalorder %v2705_v7, 96  ;;  %v3087_v52 = vrot.slane %v2308_v62, %v2707_v8 }
 0x2f7   : > { %v672_v61 = vmul.f32 %v3037_v40, %v657_v59  ;;  %917 = vmatprep.mubr.bf16.mxu1 %v742_v4  ;;  %v671_v13 = vmul.f32 %v3044_v58, %v656_v60  ;;  %4131 = vst [vmem:[#allocation9_spill] sm:$0xff] %v3084_v50  ;;  %v3097_v62 = vrot.slane %v2310_v27, %v2707_v8 }
 0x2f8   : > { %918 = vmatmul.mubr.bf16.gmra.mrb[8].mxu1 %v741_v55  ;;  %4132 = vst [vmem:[#allocation10_spill] sm:$0xff] %v3087_v52 }
 0x2f9   : > { %v676_v5 = vpop.permute.xlu1 %675  ;;  %v674_v1 = vpop.permute.xlu0 %673  ;;  %v744_v0 = vpack.c.bf16 %v672_v61, %v2922_v33  ;;  %v743_v31 = vpack.c.bf16 %v671_v13, %v2920_v32  ;;  %4133 = vst [vmem:[#allocation11_spill] sm:$0xff] %v3097_v62 }
 0x2fa   : > { %v679_v26 = vsel %vm677_vm15, %v676_v5, %v674_v1  ;;  %v678_v53 = vsel %vm677_vm15, %v674_v1, %v676_v5 }
 0x2fb   : > { %925 = vmatprep.mubr.bf16.mxu1 %v744_v0  ;;  %v694_v41 = vmul.f32 %v3061_v18, %v679_v26  ;;  %v693_v9 = vmul.f32 %v3087_v52, %v678_v53  ;;  %v4107_v26 = vmov 0.0  }
 0x2fc   : > { %2458 = vmatprep.subr.bf16.mxu0 %v4107_v26 }
 0x2fd   : > { %v698_v28 = vpop.permute.xlu1 %697  ;;  %v696_v33 = vpop.permute.xlu0 %695 }
 0x2fe   : > { %v701_v30 = vsel %vm4096_vm14, %v698_v28, %v696_v33  ;;  %v700_v42 = vsel %vm4096_vm14, %v696_v33, %v698_v28  ;;  %vm2603_vm14 = vmmov 0  }
 0x2ff   : > { %v716_v43 = vmul.f32 %v3065_v25, %v701_v30  ;;  %v715_v59 = vmul.f32 %v3073_v29, %v700_v42  ;;  %2468 = vmatprep.mubr.msk.bf16.mxu0 %vm2603_vm14, %v4107_v26 }
 0x300   : > { %926 = vmatmul.mubr.bf16.gmra.mrb[12].mxu1 %v743_v31 }
 0x301   : > { %v720_v32 = vpop.permute.xlu1 %719  ;;  %v718_v4 = vpop.permute.xlu0 %717  ;;  %v746_v55 = vpack.c.bf16 %v716_v43, %v694_v41  ;;  %v745_v63 = vpack.c.bf16 %v715_v59, %v693_v9 }
 0x302   : > { %v723_v60 = vsel %vm4101_vm13, %v720_v32, %v718_v4  ;;  %v722_v5 = vsel %vm4101_vm13, %v718_v4, %v720_v32  ;;  %vm4102_vm13 = vcmask 523264  }
 0x303   : > { %933 = vmatprep.mubr.bf16.mxu1 %v746_v55  ;;  %v738_v61 = vmul.f32 %v3084_v50, %v723_v60  ;;  %v737_v0 = vmul.f32 %v3097_v62, %v722_v5 }
 0x305   : > { %v748_v1 = vpack.c.bf16 %v738_v61, %v738_v61  ;;  %v747_v13 = vpack.c.bf16 %v737_v0, %v737_v0 }
 0x308   : > { %934 = vmatmul.mubr.bf16.gmra.mrb[16].mxu1 %v745_v63 }
 0x309   : > { %941 = vmatprep.mubr.bf16.mxu1 %v748_v1 }
 0x310   : > { %942 = vmatmul.mubr.bf16.gmra.mrb[20].mxu1 %v747_v13 }
 0x3c3   : > { %v2370_v28 = vpop.f32.mrb[4].mxu1 }
 0x3c4   : > { %v2371_v8 = vpop.f32.mrb[5].mxu1 }
 0x3c5   : > { %v2372_v27 = vadd.f32 %v2371_v8, %v2370_v28  ;;  %v2373_v33 = vpop.f32.mrb[6].mxu1 }
 0x3c6   : > { %v2374_v30 = vpop.f32.mrb[7].mxu1 }
 0x3c7   : > { %v2375_v31 = vadd.f32 %v2374_v30, %v2373_v33 }
 0x3c9   : > { %v950_v41 = vpack.c.bf16 %v2375_v31, %v2372_v27 }
 0x3cb   : > { %v2376_v42 = vpop.f32.mrb[8].mxu1  ;;  %2459 = vmatpush3.bf16.msra.mxu0 %v950_v41 }
 0x3cc   : > { %v2377_v43 = vpop.f32.mrb[9].mxu1  ;;  %2460 = vmatprep.subr.bf16.mxu0 %v4107_v26 }
 0x3cd   : > { %v2378_v53 = vadd.f32 %v2377_v43, %v2376_v42  ;;  %v2379_v32 = vpop.f32.mrb[10].mxu1 }
 0x3ce   : > { %v2380_v4 = vpop.f32.mrb[11].mxu1 }
 0x3cf   : > { %v2381_v55 = vadd.f32 %v2380_v4, %v2379_v32 }
 0x3d1   : > { %v951_v59 = vpack.c.bf16 %v2381_v55, %v2378_v53  ;;  %v2542_v55 = vld [vmem:[%s4089_s5 + $0x4] ss:$8 sps:$4 sm:$0xff]  }
 0x3d3   : > { %v2382_v60 = vpop.f32.mrb[12].mxu1  ;;  %2461 = vmatpush3.bf16.msra.mxu0 %v951_v59  ;;  %v949_v59 = vpack.c.bf16 %v2959_v38, %v2964_v39  ;;  %v2548_v38 = vld [vmem:[%s4089_s5 + $0x24] ss:$8 sps:$4 sm:$0xff]   ;;  %v2546_v39 = vld [vmem:[%s4089_s5 + $0x20] ss:$8 sps:$4 sm:$0xff]  }
 0x3d4   : > { %v2383_v61 = vpop.f32.mrb[13].mxu1  ;;  %2462 = vmatprep.subr.bf16.mxu0 %v4107_v26 }
 0x3d5   : > { %v2384_v9 = vadd.f32 %v2383_v61, %v2382_v60  ;;  %v2385_v63 = vpop.f32.mrb[14].mxu1  ;;  %v2540_v61 = vld [vmem:[%s4089_s5] ss:$8 sps:$4 sm:$0xff]  }
 0x3d6   : > { %v2386_v5 = vpop.f32.mrb[15].mxu1 }
 0x3d7   : > { %v2387_v1 = vadd.f32 %v2386_v5, %v2385_v63  ;;  %v2543_v63 = vld [vmem:[%s4089_s5 + $0x10] ss:$8 sps:$4 sm:$0xff]   ;;  %v2551_v5 = vld [vmem:[%s4089_s5 + $0x34] ss:$8 sps:$4 sm:$0xff]  }
 0x3d9   : > { %v952_v0 = vpack.c.bf16 %v2387_v1, %v2384_v9  ;;  %v2545_v9 = vld [vmem:[%s4089_s5 + $0x14] ss:$8 sps:$4 sm:$0xff]   ;;  %v2549_v1 = vld [vmem:[%s4089_s5 + $0x30] ss:$8 sps:$4 sm:$0xff]  }
 0x3db   : > { %v2388_v13 = vpop.f32.mrb[16].mxu1  ;;  %2463 = vmatpush3.bf16.msra.mxu0 %v952_v0  ;;  %v958_v0 = vpop.permute.xlu0 %957 }
 0x3dc   : > { %v2389_v28 = vpop.f32.mrb[17].mxu1  ;;  %2464 = vmatprep.subr.bf16.mxu0 %v4107_v26 }
 0x3dd   : > { %v2390_v8 = vadd.f32 %v2389_v28, %v2388_v13  ;;  %v2391_v27 = vpop.f32.mrb[18].mxu1 }
 0x3de   : > { %v2392_v33 = vpop.f32.mrb[19].mxu1 }
 0x3df   : > { %v2393_v30 = vadd.f32 %v2392_v33, %v2391_v27  ;;  %v963_v27 = vpop.permute.xlu1 %962 }
 0x3e1   : > { %v953_v31 = vpack.c.bf16 %v2393_v30, %v2390_v8 }
 0x3e3   : > { %v2394_v41 = vpop.f32.mrb[20].mxu1  ;;  %2465 = vmatpush3.bf16.msra.mxu0 %v953_v31 }
 0x3e4   : > { %v2395_v42 = vpop.f32.mrb[21].mxu1  ;;  %2466 = vmatprep.subr.bf16.mxu0 %v4107_v26 }
 0x3e5   : > { %v2396_v43 = vadd.f32 %v2395_v42, %v2394_v41  ;;  %v2397_v53 = vpop.f32.mrb[22].mxu1 }
 0x3e6   : > { %v2398_v32 = vpop.f32.mrb[23].mxu1 }
 0x3e7   : > { %v954_v4 = vpack.c.bf16 %v2396_v43, %v2396_v43 }
 0x3e9   : > { %v969_v60 = vsel %vm498_vm8, %v954_v4, 0 }
 0x3ea   : > { %2467 = vmatpush3.bf16.msra.mxu0 %v969_v60 }
 0x3eb   : > { %1067 = vmatprep.subr.bf16.mxu0 %v2542_v55 }
 0x3ed   : > { %2469 = vmatmul.mubr.msk.bf16.vlgmr.msra.gmra.mrb[0].mxu0 %vm494_vm9, %v949_v59 }
 0x3ee   : > { %1068 = vmatpush1.bf16.msra.mxu0 %v2540_v61  ;;  %1099 = vmatprep.mubr.bf16.mxu0 %v4104_v2  ;;  %v299_v61 = vld [vmem:[%s4085_s1 + $0x38] sm:$0xff] }
 0x3ef   : > { %1069 = vmatprep.subr.bf16.mxu0 %v2545_v9  ;;  %v1297_v9 = vpack.c.bf16 %v299_v61, %v299_v61 }
 0x3f2   : > { %1070 = vmatpush1.bf16.msra.mxu0 %v2543_v63  ;;  %v4103_v63 = vmov 88  }
 0x3f3   : > { %1071 = vmatprep.subr.bf16.mxu0 %v2548_v38  ;;  %2518 = vset.pattern.permute.xlu0 %v4103_v63  ;;  %v3246_v38 = vpop.permute.xlu0 %1238 }
 0x3f6   : > { %1072 = vmatpush1.bf16.msra.mxu0 %v2546_v39  ;;  %v3248_v39 = vpop.permute.xlu1 %1240 }
 0x3f7   : > { %1073 = vmatprep.subr.bf16.mxu0 %v2551_v5 }
 0x3fa   : > { %1074 = vmatpush1.bf16.msra.mxu0 %v2549_v1 }
 0x4c0   : > { %v1005_v13 = vpop.f32.mrb[0].mxu0 }
 0x4c1   : > { %v1006_v28 = vadd.f32 %v1005_v13, %v958_v0  ;;  %v2470_v8 = vpop.f32.mrb[1].mxu0 }
 0x4c2   : > { %v1008_v33 = vpop.f32.mrb[2].mxu0 }
 0x4c3   : > { %v1009_v30 = vadd.f32 %v1008_v33, %v963_v27  ;;  %v2471_v31 = vpop.f32.mrb[3].mxu0  ;;  %v1012_v41 = vmax.f32 %v1006_v28, 0.0 }
 0x4c5   : > { %v1013_v42 = vmax.f32 %v1009_v30, 0.0 }
 0x4c7   : > { %v1014_v43 = vpack.c.bf16 %v1013_v42, %v1012_v41 }
 0x4c9   : > { %2336 = vmatmul.mubr.msk.bf16.vlgmr.msra.gmra.mrb[4].mxu0 %vm4102_vm13, %v1014_v43  ;;  %vm1331_vm13 = vcmask 719872  }
 0x4ca   : > { %1434 = vmatprep.mubr.bf16.mxu0 %v4104_v2  ;;  %2338 = vmatprep.mubr.msk.bf16.mxu1 %vm1331_vm13, %v1297_v9 }
 0x59c   : > { %v3140_v53 = vpop.f32.mrb[4].mxu0 }
 0x59d   : > { %1110 = vrot.lane.b32.xlu0 %v3140_v53, %s2585_s8  ;;  %v3144_v32 = vpop.f32.mrb[5].mxu0 }
 0x59e   : > { %v3146_v4 = vpop.f32.mrb[6].mxu0 }
 0x59f   : > { %1112 = vrot.lane.b32.xlu1 %v3146_v4, %s2585_s8  ;;  %v3150_v55 = vpop.f32.mrb[7].mxu0 }
 0x5a1   : > { %1126 = vrot.lane.b32.xlu0 %v3140_v53, %s2584_s30 }
 0x5a3   : > { %1128 = vrot.lane.b32.xlu1 %v3146_v4, %s2584_s30 }
 0x5a5   : > { %1142 = vrot.lane.b32.xlu0 %v3140_v53, %s2586_s9 }
 0x5a7   : > { %1144 = vrot.lane.b32.xlu1 %v3146_v4, %s2586_s9 }
 0x5a9   : > { %1158 = vrot.lane.b32.xlu0 %v3140_v53, %s2587_s10 }
 0x5ab   : > { %1160 = vrot.lane.b32.xlu1 %v3146_v4, %s2587_s10 }
 0x5ad   : > { %1174 = vrot.lane.b32.xlu0 %v3140_v53, %s2588_s11 }
 0x5af   : > { %1176 = vrot.lane.b32.xlu1 %v3146_v4, %s2588_s11 }
 0x5b1   : > { %1190 = vrot.lane.b32.xlu0 %v3140_v53, %s4122_s12 }
 0x5b3   : > { %1192 = vrot.lane.b32.xlu1 %v3146_v4, %s4122_s12 }
 0x5b5   : > { %1206 = vrot.lane.b32.xlu0 %v3140_v53, %s2591_s13 }
 0x5b7   : > { %1208 = vrot.lane.b32.xlu1 %v3146_v4, %s2591_s13 }
 0x5b9   : > { %1222 = vrot.lane.b32.xlu0 %v3140_v53, %s4120_s14 }
 0x5bb   : > { %1224 = vrot.lane.b32.xlu1 %v3146_v4, %s4120_s14 }
 0x5bd   : > { %1114 = vrot.lane.b32.xlu0 %v3144_v32, %s2585_s8 }
 0x5bf   : > { %1116 = vrot.lane.b32.xlu1 %v3150_v55, %s2585_s8 }
 0x5c1   : > { %1130 = vrot.lane.b32.xlu0 %v3144_v32, %s2584_s30 }
 0x5c3   : > { %1132 = vrot.lane.b32.xlu1 %v3150_v55, %s2584_s30 }
 0x5c5   : > { %1146 = vrot.lane.b32.xlu0 %v3144_v32, %s2586_s9 }
 0x5c7   : > { %1148 = vrot.lane.b32.xlu1 %v3150_v55, %s2586_s9 }
 0x5c9   : > { %1162 = vrot.lane.b32.xlu0 %v3144_v32, %s2587_s10 }
 0x5cb   : > { %1164 = vrot.lane.b32.xlu1 %v3150_v55, %s2587_s10 }
 0x5cd   : > { %1246 = vrot.lane.b32.xlu0 %v2846_v51, %s2584_s30 }
 0x5cf   : > { %1248 = vrot.lane.b32.xlu1 %v2850_v54, %s2584_s30 }
 0x5d1   : > { %1178 = vrot.lane.b32.xlu0 %v3144_v32, %s2588_s11 }
 0x5d3   : > { %1180 = vrot.lane.b32.xlu1 %v3150_v55, %s2588_s11 }
 0x5d5   : > { %1194 = vrot.lane.b32.xlu0 %v3144_v32, %s4122_s12 }
 0x5d7   : > { %1196 = vrot.lane.b32.xlu1 %v3150_v55, %s4122_s12 }
 0x5d9   : > { %1210 = vrot.lane.b32.xlu0 %v3144_v32, %s2591_s13 }
 0x5db   : > { %1212 = vrot.lane.b32.xlu1 %v3150_v55, %s2591_s13 }
 0x5dd   : > { %1226 = vrot.lane.b32.xlu0 %v3144_v32, %s4120_s14 }
 0x5df   : > { %1228 = vrot.lane.b32.xlu1 %v3150_v55, %s4120_s14 }
 0x5e1   : > { %1254 = vrot.lane.b32.xlu0 %v2846_v51, %s2586_s9 }
 0x5e3   : > { %1256 = vrot.lane.b32.xlu1 %v2850_v54, %s2586_s9 }
 0x5e5   : > { %1262 = vrot.lane.b32.xlu0 %v2846_v51, %s2587_s10 }
 0x5e7   : > { %1264 = vrot.lane.b32.xlu1 %v2850_v54, %s2587_s10 }
 0x5e9   : > { %1272 = vrot.lane.b32.xlu0 %v2846_v51, %s4122_s12 }
 0x5eb   : > { %1274 = vrot.lane.b32.xlu1 %v2850_v54, %s4122_s12 }
 0x5ed   : > { %1280 = vrot.lane.b32.xlu0 %v2846_v51, %s2591_s13 }
 0x5ef   : > { %1282 = vrot.lane.b32.xlu1 %v2850_v54, %s2591_s13 }
 0x5f1   : > { %1288 = vrot.lane.b32.xlu0 %v2846_v51, %s4120_s14 }
 0x5f3   : > { %1290 = vrot.lane.b32.xlu1 %v2850_v54, %s4120_s14 }
 0x5f5   : > { %1328 = vperm.xlu0 %2518, %v299_v61  }
 0x5f9   : > { %2521 = vset.pattern.permute.xlu0 %v4106_v3 }
 0x60f   : > { %v1111_v5 = vpop.permute.xlu0 %1110 }
 0x611   : > { %v1113_v1 = vpop.permute.xlu1 %1112 }
 0x613   : > { %v1127_v0 = vpop.permute.xlu0 %1126 }
 0x615   : > { %v1129_v13 = vpop.permute.xlu1 %1128 }
 0x617   : > { %v1143_v28 = vpop.permute.xlu0 %1142 }
 0x619   : > { %v1145_v8 = vpop.permute.xlu1 %1144 }
 0x61b   : > { %v1159_v27 = vpop.permute.xlu0 %1158 }
 0x61d   : > { %v1161_v33 = vpop.permute.xlu1 %1160 }
 0x61f   : > { %v3250_v30 = vpop.permute.xlu0 %1174 }
 0x621   : > { %v3252_v31 = vpop.permute.xlu1 %1176 }
 0x623   : > { %v3254_v41 = vpop.permute.xlu0 %1190 }
 0x625   : > { %v3256_v42 = vpop.permute.xlu1 %1192 }
 0x627   : > { %v3258_v43 = vpop.permute.xlu0 %1206 }
 0x629   : > { %v3260_v61 = vpop.permute.xlu1 %1208 }
 0x62b   : > { %v3262_v9 = vpop.permute.xlu0 %1222 }
 0x62d   : > { %v3264_v63 = vpop.permute.xlu1 %1224 }
 0x62f   : > { %v1115_v2 = vpop.permute.xlu0 %1114 }
 0x630   : > { %v1118_v3 = vsel %vm307_vm1, %v1111_v5, %v1115_v2  ;;  %v1120_v26 = vsel %vm307_vm1, %v1115_v2, %v1111_v5 }
 0x631   : > { %v1117_v59 = vpop.permute.xlu1 %1116  ;;  %v1122_v52 = vmul.f32 %v1120_v26, %v2726_v16  ;;  %v1123_v50 = vmul.f32 %v1118_v3, %v2720_v14 }
 0x632   : > { %v1119_v60 = vsel %vm307_vm1, %v1113_v1, %v1117_v59  ;;  %v1121_v62 = vsel %vm307_vm1, %v1117_v59, %v1113_v1 }
 0x633   : > { %v1124_v29 = vmul.f32 %v1121_v62, %v2726_v16  ;;  %v1125_v25 = vmul.f32 %v1119_v60, %v2720_v14  ;;  %v1131_v18 = vpop.permute.xlu0 %1130 }
 0x634   : > { %v1134_v58 = vsel %vm328_vm0, %v1127_v0, %v1131_v18  ;;  %v1136_v2 = vsel %vm328_vm0, %v1131_v18, %v1127_v0 }
 0x635   : > { %v1298_v5 = vpack.c.bf16 %v1124_v29, %v1122_v52  ;;  %v1133_v40 = vpop.permute.xlu1 %1132  ;;  %v1299_v24 = vpack.c.bf16 %v1125_v25, %v1123_v50  ;;  %v1138_v62 = vmul.f32 %v1136_v2, %v2729_v17  ;;  %v1139_v26 = vmul.f32 %v1134_v58, %v2723_v15 }
 0x636   : > { %v1135_v59 = vsel %vm328_vm0, %v1129_v13, %v1133_v40  ;;  %v1137_v3 = vsel %vm328_vm0, %v1133_v40, %v1129_v13 }
 0x637   : > { %v1140_v60 = vmul.f32 %v1137_v3, %v2729_v17  ;;  %v1141_v1 = vmul.f32 %v1135_v59, %v2723_v15  ;;  %1341 = vmatprep.subr.bf16.mxu1 %v1299_v24  ;;  %v1147_v21 = vpop.permute.xlu0 %1146 }
 0x638   : > { %v1150_v18 = vsel %vm350_vm2, %v1143_v28, %v1147_v21  ;;  %v1152_v25 = vsel %vm350_vm2, %v1147_v21, %v1143_v28  ;;  %1342 = vmatpush1.bf16.msra.mxu1 %v1298_v5 }
 0x639   : > { %v1300_v29 = vpack.c.bf16 %v1140_v60, %v1138_v62  ;;  %v1149_v50 = vpop.permute.xlu1 %1148  ;;  %v1301_v40 = vpack.c.bf16 %v1141_v1, %v1139_v26  ;;  %v1154_v0 = vmul.f32 %v1152_v25, %v2752_v34  ;;  %v1155_v24 = vmul.f32 %v1150_v18, %v2755_v35 }
 0x63a   : > { %v1151_v52 = vsel %vm350_vm2, %v1145_v8, %v1149_v50  ;;  %v1153_v58 = vsel %vm350_vm2, %v1149_v50, %v1145_v8 }
 0x63b   : > { %v1156_v13 = vmul.f32 %v1153_v58, %v2752_v34  ;;  %v1157_v2 = vmul.f32 %v1151_v52, %v2755_v35  ;;  %1343 = vmatprep.subr.bf16.mxu1 %v1301_v40  ;;  %v1163_v21 = vpop.permute.xlu0 %1162 }
 0x63c   : > { %v1166_v28 = vsel %vm372_vm3, %v1159_v27, %v1163_v21  ;;  %v1168_v5 = vsel %vm372_vm3, %v1163_v21, %v1159_v27  ;;  %1344 = vmatpush1.bf16.msra.mxu1 %v1300_v29 }
 0x63d   : > { %v1302_v59 = vpack.c.bf16 %v1156_v13, %v1154_v0  ;;  %v1165_v3 = vpop.permute.xlu1 %1164  ;;  %v1303_v8 = vpack.c.bf16 %v1157_v2, %v1155_v24  ;;  %v1170_v60 = vmul.f32 %v1168_v5, %v2758_v36  ;;  %v1171_v1 = vmul.f32 %v1166_v28, %v2761_v37 }
 0x63e   : > { %v1167_v62 = vsel %vm372_vm3, %v1161_v33, %v1165_v3  ;;  %v1169_v26 = vsel %vm372_vm3, %v1165_v3, %v1161_v33  ;;  %v4134_v24 = vpack.c.bf16 %v3150_v55, %v3144_v32 }
 0x63f   : > { %v1172_v18 = vmul.f32 %v1169_v26, %v2758_v36  ;;  %v1173_v25 = vmul.f32 %v1167_v62, %v2761_v37  ;;  %1345 = vmatprep.subr.bf16.mxu1 %v1303_v8  ;;  %v1247_v27 = vpop.permute.xlu0 %1246 }
 0x640   : > { %1346 = vmatpush1.bf16.msra.mxu1 %v1302_v59 }
 0x641   : > { %v1304_v29 = vpack.c.bf16 %v1172_v18, %v1170_v60  ;;  %v1249_v50 = vpop.permute.xlu1 %1248  ;;  %v1305_v40 = vpack.c.bf16 %v1173_v25, %v1171_v1 }
 0x643   : > { %1347 = vmatprep.subr.bf16.mxu1 %v1305_v40  ;;  %v1179_v52 = vpop.permute.xlu0 %1178 }
 0x644   : > { %v1182_v33 = vsel %vm394_vm4, %v3250_v30, %v1179_v52  ;;  %v1184_v58 = vsel %vm394_vm4, %v1179_v52, %v3250_v30  ;;  %1348 = vmatpush1.bf16.msra.mxu1 %v1304_v29 }
 0x645   : > { %v1181_v0 = vpop.permute.xlu1 %1180  ;;  %1349 = vmatprep.subr.bf16.mxu1 %v4134_v24  ;;  %v1186_v21 = vmul.f32 %v1182_v33, %v2776_v45  ;;  %v1187_v28 = vmul.f32 %v1184_v58, %v2779_v46  ;;  %v1250_v33 = vsel %vm328_vm0, %v1247_v27, %v1249_v50 }
 0x646   : > { %v1183_v13 = vsel %vm394_vm4, %v3252_v31, %v1181_v0  ;;  %v1185_v2 = vsel %vm394_vm4, %v1181_v0, %v3252_v31  ;;  %v4135_v31 = vpack.c.bf16 %v3146_v4, %v3140_v53 }
 0x647   : > { %v1188_v30 = vmul.f32 %v1183_v13, %v2776_v45  ;;  %v1189_v5 = vmul.f32 %v1185_v2, %v2779_v46  ;;  %v1195_v59 = vpop.permute.xlu0 %1194 }
 0x648   : > { %v1198_v32 = vsel %vm416_vm5, %v3254_v41, %v1195_v59  ;;  %v1200_v55 = vsel %vm416_vm5, %v1195_v59, %v3254_v41  ;;  %1350 = vmatpush1.bf16.msra.mxu1 %v4135_v31  ;;  %v1253_v31 = vmul.f32 %v1250_v33, %v2723_v15 }
 0x649   : > { %v1308_v3 = vpack.c.bf16 %v1188_v30, %v1186_v21  ;;  %v1197_v8 = vpop.permute.xlu1 %1196  ;;  %v1309_v62 = vpack.c.bf16 %v1189_v5, %v1187_v28  ;;  %v1202_v1 = vmul.f32 %v1198_v32, %v2801_v6  ;;  %v1203_v18 = vmul.f32 %v1200_v55, %v2804_v10 }
 0x64a   : > { %v1199_v26 = vsel %vm416_vm5, %v3256_v42, %v1197_v8  ;;  %v1201_v60 = vsel %vm416_vm5, %v1197_v8, %v3256_v42  ;;  %v1251_v55 = vsel %vm328_vm0, %v1249_v50, %v1247_v27  ;;  %v1243_v50 = vsel %vm307_vm1, %v3248_v39, %v3246_v38 }
 0x64b   : > { %v1204_v41 = vmul.f32 %v1199_v26, %v2801_v6  ;;  %v1205_v53 = vmul.f32 %v1201_v60, %v2804_v10  ;;  %1351 = vmatprep.subr.bf16.mxu1 %v1309_v62  ;;  %v1211_v4 = vpop.permute.xlu0 %1210 }
 0x64c   : > { %v1214_v25 = vsel %vm438_vm6, %v3258_v43, %v1211_v4  ;;  %v1216_v29 = vsel %vm438_vm6, %v1211_v4, %v3258_v43  ;;  %1352 = vmatpush1.bf16.msra.mxu1 %v1308_v3 }
 0x64d   : > { %v1310_v42 = vpack.c.bf16 %v1204_v41, %v1202_v1  ;;  %v1213_v40 = vpop.permute.xlu1 %1212  ;;  %v1311_v52 = vpack.c.bf16 %v1205_v53, %v1203_v18  ;;  %v1218_v24 = vmul.f32 %v1214_v25, %v2808_v11  ;;  %v1219_v13 = vmul.f32 %v1216_v29, %v2811_v12 }
 0x64e   : > { %v1215_v58 = vsel %vm438_vm6, %v3260_v61, %v1213_v40  ;;  %v1217_v0 = vsel %vm438_vm6, %v1213_v40, %v3260_v61  ;;  %v1242_v61 = vsel %vm307_vm1, %v3246_v38, %v3248_v39  ;;  %v1252_v53 = vmul.f32 %v1251_v55, %v2729_v17 }
 0x64f   : > { %v1220_v43 = vmul.f32 %v1215_v58, %v2808_v11  ;;  %v1221_v2 = vmul.f32 %v1217_v0, %v2811_v12  ;;  %1353 = vmatprep.subr.bf16.mxu1 %v1311_v52  ;;  %v1227_v21 = vpop.permute.xlu0 %1226  ;;  %v1245_v1 = vmul.f32 %v1242_v61, %v2720_v14  ;;  %v1244_v29 = vmul.f32 %v1243_v50, %v2726_v16 }
 0x650   : > { %v1230_v28 = vsel %vm460_vm7, %v3262_v9, %v1227_v21  ;;  %v1232_v30 = vsel %vm460_vm7, %v1227_v21, %v3262_v9  ;;  %1354 = vmatpush1.bf16.msra.mxu1 %v1310_v42  ;;  %v1271_v39 = vmul.f32 %v2860_v57, %v2779_v46 }
 0x651   : > { %v1312_v5 = vpack.c.bf16 %v1220_v43, %v1218_v24  ;;  %v1229_v59 = vpop.permute.xlu1 %1228  ;;  %v1313_v32 = vpack.c.bf16 %v1221_v2, %v1219_v13  ;;  %v1234_v8 = vmul.f32 %v1230_v28, %v2829_v23  ;;  %v1235_v62 = vmul.f32 %v1232_v30, %v2826_v22 }
 0x652   : > { %v1231_v3 = vsel %vm460_vm7, %v3264_v63, %v1229_v59  ;;  %v1233_v9 = vsel %vm460_vm7, %v1229_v59, %v3264_v63  ;;  %v1317_v25 = vpack.c.bf16 %v1253_v31, %v1245_v1  ;;  %v1316_v52 = vpack.c.bf16 %v1252_v53, %v1244_v29 }
 0x653   : > { %v1236_v26 = vmul.f32 %v1231_v3, %v2829_v23  ;;  %v1237_v60 = vmul.f32 %v1233_v9, %v2826_v22  ;;  %1355 = vmatprep.subr.bf16.mxu1 %v1313_v32  ;;  %v1255_v27 = vpop.permute.xlu0 %1254  ;;  %v1270_v30 = vmul.f32 %v2856_v56, %v2776_v45 }
 0x654   : > { %1356 = vmatpush1.bf16.msra.mxu1 %v1312_v5  ;;  %v1321_v5 = vpack.c.bf16 %v1271_v39, %v2850_v54  ;;  %v4137_v39 = vmov 72  }
 0x655   : > { %v1314_v18 = vpack.c.bf16 %v1236_v26, %v1234_v8  ;;  %v1257_v63 = vpop.permute.xlu1 %1256  ;;  %v1315_v41 = vpack.c.bf16 %v1237_v60, %v1235_v62  ;;  %v1320_v31 = vpack.c.bf16 %v1270_v30, %v2846_v51 }
 0x656   : > { %v1258_v42 = vsel %vm350_vm2, %v1255_v27, %v1257_v63  ;;  %v1259_v40 = vsel %vm350_vm2, %v1257_v63, %v1255_v27 }
 0x657   : > { %1357 = vmatprep.subr.bf16.mxu1 %v1315_v41  ;;  %v1263_v4 = vpop.permute.xlu0 %1262  ;;  %v1260_v0 = vmul.f32 %v1259_v40, %v2752_v34  ;;  %v1261_v24 = vmul.f32 %v1258_v42, %v2755_v35  ;;  %v298_v41 = vld [vmem:[%s4085_s1 + $0x30] sm:$0xff]  ;;  %v4136_v42 = vmov 0.0   ;;  %v300_v40 = vld [vmem:[%s4085_s1 + $0x40] sm:$0xff] }
 0x658   : > { %1358 = vmatpush1.bf16.msra.mxu1 %v1314_v18  ;;  %v1296_v29 = vpack.c.bf16 %v298_v41, %v298_v41 }
 0x659   : > { %v1265_v38 = vpop.permute.xlu1 %1264  ;;  %1359 = vmatprep.subr.bf16.mxu1 %v1317_v25 }
 0x65a   : > { %v1266_v33 = vsel %vm372_vm3, %v1263_v4, %v1265_v38  ;;  %v1267_v58 = vsel %vm372_vm3, %v1265_v38, %v1263_v4  ;;  %v2605_v38 = vmov 8  }
 0x65b   : > { %v1268_v13 = vmul.f32 %v1267_v58, %v2758_v36  ;;  %v1269_v43 = vmul.f32 %v1266_v33, %v2761_v37  ;;  %v1273_v2 = vpop.permute.xlu0 %1272  ;;  %2519 = vset.pattern.permute.xlu1 %v2605_v38 }
 0x65c   : > { %1360 = vmatpush1.bf16.msra.mxu1 %v1316_v52  ;;  %1389 = vperm.xlu1 %2519, %v300_v40  }
 0x65d   : > { %v1318_v21 = vpack.c.bf16 %v1268_v13, %v1260_v0  ;;  %v1275_v28 = vpop.permute.xlu1 %1274  ;;  %v1319_v57 = vpack.c.bf16 %v1269_v43, %v1261_v24 }
 0x65e   : > { %v1276_v59 = vsel %vm416_vm5, %v1273_v2, %v1275_v28  ;;  %v1277_v32 = vsel %vm416_vm5, %v1275_v28, %v1273_v2 }
 0x65f   : > { %1361 = vmatprep.subr.bf16.mxu1 %v1319_v57  ;;  %v1281_v61 = vpop.permute.xlu0 %1280  ;;  %v1278_v9 = vmul.f32 %v1276_v59, %v2801_v6  ;;  %v1279_v54 = vmul.f32 %v1277_v32, %v2804_v10 }
 0x660   : > { %1362 = vmatpush1.bf16.msra.mxu1 %v1318_v21  ;;  %2520 = vset.pattern.permute.xlu1 %v4137_v39 }
 0x661   : > { %v1283_v55 = vpop.permute.xlu1 %1282  ;;  %1363 = vmatprep.subr.bf16.mxu1 %v1321_v5  ;;  %v4138_v5 = vmov 0  }
 0x662   : > { %v1284_v3 = vsel %vm438_vm6, %v1281_v61, %v1283_v55  ;;  %v1285_v56 = vsel %vm438_vm6, %v1283_v55, %v1281_v61  ;;  %v1384_v61 = vpack.c.bf16 %v300_v40, %v300_v40 }
 0x663   : > { %v1286_v8 = vmul.f32 %v1284_v3, %v2808_v11  ;;  %v1287_v62 = vmul.f32 %v1285_v56, %v2811_v12  ;;  %v1289_v60 = vpop.permute.xlu0 %1288 }
 0x664   : > { %1364 = vmatpush1.bf16.msra.mxu1 %v1320_v31 }
 0x665   : > { %v1322_v26 = vpack.c.bf16 %v1286_v8, %v1278_v9  ;;  %v1291_v27 = vpop.permute.xlu1 %1290  ;;  %v1323_v50 = vpack.c.bf16 %v1287_v62, %v1279_v54  ;;  %v3500_v8 = vld [vmem:[%s4085_s1 + $0x50] sm:$0xff] }
 0x666   : > { %v1292_v51 = vsel %vm460_vm7, %v1289_v60, %v1291_v27  ;;  %v1293_v1 = vsel %vm460_vm7, %v1291_v27, %v1289_v60 }
 0x667   : > { %v1294_v18 = vmul.f32 %v1292_v51, %v2829_v23  ;;  %v1295_v63 = vmul.f32 %v1293_v1, %v2826_v22  ;;  %1365 = vmatprep.subr.bf16.mxu1 %v1323_v50 }
 0x668   : > { %1366 = vmatpush1.bf16.msra.mxu1 %v1322_v26 }
 0x669   : > { %v1324_v53 = vpack.c.bf16 %v1294_v18, %v1294_v18  ;;  %v1325_v4 = vpack.c.bf16 %v1295_v63, %v1295_v63 }
 0x66b   : > { %2337 = vmatprep.subr.msk.bf16.mxu1 %vm498_vm8, %v1325_v4  ;;  %v1336_v25 = vsel %vm498_vm8, %v1324_v53, 0 }
 0x66c   : > { %1368 = vmatpush1.bf16.msra.mxu1 %v1336_v25 }
 0x66d   : > { %2472 = vmatprep.subr.bf16.mxu1 %v4136_v42 }
 0x66f   : > { %1374 = vmatmul.mubr.bf16.vlgmr.msra.gmra.mrb[24].mxu1 %v1296_v29 }
 0x670   : > { %2482 = vmatprep.mubr.msk.bf16.mxu1 %vm2603_vm14, %v4136_v42  ;;  %vm1392_vm14 = vcmask 64512  }
 0x674   : > { %v1329_v52 = vpop.permute.xlu0 %1328 }
 0x6db   : > { %v1390_v59 = vpop.permute.xlu1 %1389 }
 0x742   : > { %v1375_v33 = vpop.f32.mrb[24].mxu1 }
 0x743   : > { %v1376_v58 = vadd.f32 %v1375_v33, %v1329_v52  ;;  %v1377_v0 = vpop.f32.mrb[25].mxu1 }
 0x744   : > { %v1378_v24 = vadd.f32 %v1377_v0, %v1329_v52  ;;  %v1379_v13 = vpop.f32.mrb[26].mxu1 }
 0x745   : > { %v1382_v43 = vmax.f32 %v1376_v58, 0.0  ;;  %v1380_v2 = vpop.f32.mrb[27].mxu1 }
 0x746   : > { %v1383_v21 = vmax.f32 %v1378_v24, 0.0 }
 0x747   : > { %v1385_v28 = vpack.c.bf16 %v1382_v43, %v1382_v43 }
 0x748   : > { %v1386_v57 = vpack.c.bf16 %v1383_v21, %v1383_v21 }
 0x749   : > { %v1397_v30 = vsel %vm498_vm8, %v1385_v28, 0 }
 0x74a   : > { %2339 = vmatprep.subr.msk.bf16.mxu0 %vm498_vm8, %v1386_v57 }
 0x74b   : > { %1403 = vmatpush1.bf16.msra.mxu0 %v1397_v30 }
 0x74e   : > { %2340 = vmatmul.mubr.msk.bf16.vlgmr.msra.gmra.mrb[8].mxu0 %vm1392_vm14, %v1384_v61 }
 0x74f   : > { %1570 = vmatprep.mubr.bf16.mxu0 %v4138_v5 }
 0x821   : > { %v1436_v32 = vpop.f32.mrb[8].mxu0 }
 0x822   : > { %v3454_v55 = vadd.f32 %v1436_v32, %v1390_v59  ;;  %v1438_v31 = vpop.f32.mrb[9].mxu0 }
 0x823   : > { %v3456_v3 = vadd.f32 %v1438_v31, %v1390_v59  ;;  %v1440_v56 = vpop.f32.mrb[10].mxu0 }
 0x824   : > { %v1441_v9 = vpop.f32.mrb[11].mxu0  ;;  %1449 = vrot.lane.b32.xlu1 %v3454_v55, %s2585_s8 }
 0x825   : > { %1451 = vrot.lane.b32.xlu0 %v3456_v3, %s2585_s8  ;;  %v2188_v54 = vcombine.low %v3454_v55, %v3456_v3 }
 0x827   : > { %2190 = vst [vmem:[%s286_s19] sm:$0xff] %v2188_v54 }
 0x828   : > { %1457 = vrot.lane.b32.xlu1 %v3454_v55, %s2584_s30 }
 0x829   : > { %1459 = vrot.lane.b32.xlu0 %v3456_v3, %s2584_s30 }
 0x82c   : > { %1465 = vrot.lane.b32.xlu1 %v3454_v55, %s2586_s9 }
 0x82d   : > { %1467 = vrot.lane.b32.xlu0 %v3456_v3, %s2586_s9 }
 0x830   : > { %1473 = vrot.lane.b32.xlu1 %v3454_v55, %s2587_s10 }
 0x831   : > { %1475 = vrot.lane.b32.xlu0 %v3456_v3, %s2587_s10 }
 0x834   : > { %1481 = vrot.lane.b32.xlu1 %v3454_v55, %s2588_s11 }
 0x835   : > { %1483 = vrot.lane.b32.xlu0 %v3456_v3, %s2588_s11 }
 0x838   : > { %1489 = vrot.lane.b32.xlu1 %v3454_v55, %s4122_s12 }
 0x839   : > { %1491 = vrot.lane.b32.xlu0 %v3456_v3, %s4122_s12  ;;  %s291_s12 = scalar_lea.vmem %s4091_s7, %s4164_s27 }
 0x83c   : > { %1497 = vrot.lane.b32.xlu1 %v3454_v55, %s2591_s13 }
 0x83d   : > { %1499 = vrot.lane.b32.xlu0 %v3456_v3, %s2591_s13 }
 0x840   : > { %1505 = vrot.lane.b32.xlu1 %v3454_v55, %s4120_s14 }
 0x841   : > { %1507 = vrot.lane.b32.xlu0 %v3456_v3, %s4120_s14 }
 0x844   : > { %1526 = vperm.xlu1 %2520, %v3500_v8  }
 0x896   : > { %v1450_v62 = vpop.permute.xlu1 %1449 }
 0x897   : > { %v1452_v26 = vpop.permute.xlu0 %1451 }
 0x898   : > { %v1453_v60 = vsel %vm307_vm1, %v1450_v62, %v1452_v26  ;;  %v1454_v27 = vsel %vm307_vm1, %v1452_v26, %v1450_v62 }
 0x899   : > { %v1455_v63 = vmul.f32 %v1454_v27, %v2726_v16  ;;  %v1456_v41 = vmul.f32 %v1453_v60, %v2720_v14 }
 0x89a   : > { %v1458_v50 = vpop.permute.xlu1 %1457 }
 0x89b   : > { %v1460_v51 = vpop.permute.xlu0 %1459 }
 0x89c   : > { %v1461_v1 = vsel %vm328_vm0, %v1458_v50, %v1460_v51  ;;  %v1462_v18 = vsel %vm328_vm0, %v1460_v51, %v1458_v50 }
 0x89d   : > { %v1463_v53 = vmul.f32 %v1462_v18, %v2729_v17  ;;  %v1464_v4 = vmul.f32 %v1461_v1, %v2723_v15 }
 0x89e   : > { %v1466_v25 = vpop.permute.xlu1 %1465 }
 0x89f   : > { %v1514_v29 = vpack.c.bf16 %v1463_v53, %v1455_v63  ;;  %v1468_v40 = vpop.permute.xlu0 %1467  ;;  %v1515_v39 = vpack.c.bf16 %v1464_v4, %v1456_v41 }
 0x8a0   : > { %v1469_v52 = vsel %vm350_vm2, %v1466_v25, %v1468_v40  ;;  %v1470_v33 = vsel %vm350_vm2, %v1468_v40, %v1466_v25 }
 0x8a1   : > { %1538 = vmatprep.subr.bf16.mxu0 %v1515_v39  ;;  %v1471_v43 = vmul.f32 %v1470_v33, %v2752_v34  ;;  %v1472_v2 = vmul.f32 %v1469_v52, %v2755_v35 }
 0x8a2   : > { %1539 = vmatpush1.bf16.msra.mxu0 %v1514_v29  ;;  %v1474_v58 = vpop.permute.xlu1 %1473 }
 0x8a3   : > { %v1476_v0 = vpop.permute.xlu0 %1475 }
 0x8a4   : > { %v1477_v24 = vsel %vm372_vm3, %v1474_v58, %v1476_v0  ;;  %v1478_v13 = vsel %vm372_vm3, %v1476_v0, %v1474_v58 }
 0x8a5   : > { %v1479_v21 = vmul.f32 %v1478_v13, %v2758_v36  ;;  %v1480_v28 = vmul.f32 %v1477_v24, %v2761_v37 }
 0x8a6   : > { %v1482_v57 = vpop.permute.xlu1 %1481 }
 0x8a7   : > { %v1516_v30 = vpack.c.bf16 %v1479_v21, %v1471_v43  ;;  %v1484_v61 = vpop.permute.xlu0 %1483  ;;  %v1517_v59 = vpack.c.bf16 %v1480_v28, %v1472_v2  ;;  %v1513_v43 = vpack.c.bf16 %v3500_v8, %v3500_v8  ;;  %v2552_v2 = vld [vmem:[%s4088_s4 + $0x40] sm:$0xff]   ;;  %v2554_v28 = vld [vmem:[%s4088_s4 + $0x48] sm:$0xff]  }
 0x8a8   : > { %v1485_v32 = vsel %vm394_vm4, %v1482_v57, %v1484_v61  ;;  %v1486_v31 = vsel %vm394_vm4, %v1484_v61, %v1482_v57  ;;  %v2553_v21 = vld [vmem:[%s4088_s4] sm:$0xff]   ;;  %v2555_v8 = vld [vmem:[%s4088_s4 + $0x8] sm:$0xff]   ;;  %v2556_v57 = vld [vmem:[%s4088_s4 + $0x50] sm:$0xff]  }
 0x8a9   : > { %v1487_v56 = vmul.f32 %v1485_v32, %v2776_v45  ;;  %v1488_v9 = vmul.f32 %v1486_v31, %v2779_v46  ;;  %1540 = vmatprep.subr.bf16.mxu0 %v1517_v59  ;;  %v2558_v61 = vld [vmem:[%s4088_s4 + $0x58] sm:$0xff]   ;;  %v2560_v32 = vld [vmem:[%s4088_s4 + $0x60] sm:$0xff]  }
 0x8aa   : > { %1541 = vmatpush1.bf16.msra.mxu0 %v1516_v30  ;;  %v1490_v54 = vpop.permute.xlu1 %1489  ;;  %v2557_v30 = vld [vmem:[%s4088_s4 + $0x10] sm:$0xff]   ;;  %v2559_v59 = vld [vmem:[%s4088_s4 + $0x18] sm:$0xff]   ;;  %v2561_v31 = vld [vmem:[%s4088_s4 + $0x20] sm:$0xff]  }
 0x8ab   : > { %v1518_v62 = vpack.c.bf16 %v1487_v56, %v3454_v55  ;;  %v1492_v26 = vpop.permute.xlu0 %1491  ;;  %v1519_v60 = vpack.c.bf16 %v1488_v9, %v3456_v3  ;;  %v2562_v56 = vld [vmem:[%s4088_s4 + $0x68] sm:$0xff]  }
 0x8ac   : > { %v1493_v27 = vsel %vm416_vm5, %v1490_v54, %v1492_v26  ;;  %v1494_v50 = vsel %vm416_vm5, %v1492_v26, %v1490_v54  ;;  %v2563_v9 = vld [vmem:[%s4088_s4 + $0x28] sm:$0xff]   ;;  %v2564_v54 = vld [vmem:[%s4088_s4 + $0x70] sm:$0xff]   ;;  %v2566_v26 = vld [vmem:[%s4088_s4 + $0x78] sm:$0xff]  }
 0x8ad   : > { %1542 = vmatprep.subr.bf16.mxu0 %v1519_v60  ;;  %v1495_v55 = vmul.f32 %v1493_v27, %v2801_v6  ;;  %v1496_v3 = vmul.f32 %v1494_v50, %v2804_v10  ;;  %v2567_v60 = vld [vmem:[%s4088_s4 + $0x38] sm:$0xff]  }
 0x8ae   : > { %1543 = vmatpush1.bf16.msra.mxu0 %v1518_v62  ;;  %v1498_v51 = vpop.permute.xlu1 %1497  ;;  %v2565_v62 = vld [vmem:[%s4088_s4 + $0x30] sm:$0xff]  }
 0x8af   : > { %v1500_v1 = vpop.permute.xlu0 %1499 }
 0x8b0   : > { %v1501_v18 = vsel %vm438_vm6, %v1498_v51, %v1500_v1  ;;  %v1502_v63 = vsel %vm438_vm6, %v1500_v1, %v1498_v51 }
 0x8b1   : > { %v1503_v41 = vmul.f32 %v1501_v18, %v2808_v11  ;;  %v1504_v53 = vmul.f32 %v1502_v63, %v2811_v12 }
 0x8b2   : > { %v1506_v4 = vpop.permute.xlu1 %1505 }
 0x8b3   : > { %v1520_v25 = vpack.c.bf16 %v1503_v41, %v1495_v55  ;;  %v1508_v29 = vpop.permute.xlu0 %1507  ;;  %v1521_v40 = vpack.c.bf16 %v1504_v53, %v1496_v3 }
 0x8b4   : > { %v1509_v39 = vsel %vm460_vm7, %v1506_v4, %v1508_v29  ;;  %v1510_v52 = vsel %vm460_vm7, %v1508_v29, %v1506_v4 }
 0x8b5   : > { %v1511_v33 = vmul.f32 %v1509_v39, %v2829_v23  ;;  %v1512_v58 = vmul.f32 %v1510_v52, %v2826_v22  ;;  %1544 = vmatprep.subr.bf16.mxu0 %v1521_v40 }
 0x8b6   : > { %1545 = vmatpush1.bf16.msra.mxu0 %v1520_v25 }
 0x8b7   : > { %v1522_v0 = vpack.c.bf16 %v1511_v33, %v1511_v33  ;;  %v1523_v24 = vpack.c.bf16 %v1512_v58, %v1512_v58 }
 0x8b9   : > { %2341 = vmatprep.subr.msk.bf16.mxu0 %vm498_vm8, %v1523_v24  ;;  %v1533_v13 = vsel %vm498_vm8, %v1522_v0, 0 }
 0x8ba   : > { %1547 = vmatpush1.bf16.msra.mxu0 %v1533_v13 }
 0x8bb   : > { %2406 = vmatprep.subr.bf16.mxu0 %v2552_v2  ;;  %v3676_v2 = vld [vmem:[%s4085_s1 + $0x60] sm:$0xff] }
 0x8bd   : > { %2342 = vmatmul.mubr.msk.bf16.vlgmr.msra.gmra.mrb[12].mxu0 %vm494_vm9, %v1513_v43  ;;  %v3671_v43 = vld [vmem:[%s4085_s1 + $0x70] sm:$0xff] }
 0x8be   : > { %2407 = vmatpush3.bf16.msra.mxu0 %v2553_v21  ;;  %v4142_v21 = vmov 88  }
 0x8bf   : > { %2408 = vmatprep.subr.bf16.mxu0 %v2554_v28 }
 0x8c2   : > { %2409 = vmatpush3.bf16.msra.mxu0 %v2555_v8 }
 0x8c3   : > { %2410 = vmatprep.subr.bf16.mxu0 %v2556_v57  ;;  %v1527_v27 = vpop.permute.xlu1 %1526 }
 0x8c6   : > { %2411 = vmatpush3.bf16.msra.mxu0 %v2557_v30 }
 0x8c7   : > { %2412 = vmatprep.subr.bf16.mxu0 %v2558_v61 }
 0x8ca   : > { %2413 = vmatpush3.bf16.msra.mxu0 %v2559_v59 }
 0x8cb   : > { %2414 = vmatprep.subr.bf16.mxu0 %v2560_v32 }
 0x8ce   : > { %2415 = vmatpush3.bf16.msra.mxu0 %v2561_v31 }
 0x8cf   : > { %2416 = vmatprep.subr.bf16.mxu0 %v2562_v56 }
 0x8d2   : > { %2417 = vmatpush3.bf16.msra.mxu0 %v2563_v9 }
 0x8d3   : > { %2418 = vmatprep.subr.bf16.mxu0 %v2564_v54 }
 0x8d6   : > { %2419 = vmatpush3.bf16.msra.mxu0 %v2565_v62 }
 0x8d7   : > { %2420 = vmatprep.subr.bf16.mxu0 %v2566_v26 }
 0x8da   : > { %2421 = vmatpush3.bf16.msra.mxu0 %v2567_v60 }
 0x990   : > { %v1572_v50 = vpop.f32.mrb[12].mxu0 }
 0x991   : > { %v1573_v51 = vadd.f32 %v1572_v50, %v1527_v27  ;;  %v1574_v1 = vpop.f32.mrb[13].mxu0 }
 0x992   : > { %v1575_v18 = vadd.f32 %v1574_v1, %v1527_v27  ;;  %v1576_v63 = vpop.f32.mrb[14].mxu0 }
 0x993   : > { %v3606_v55 = vmax.f32 %v1573_v51, 0.0  ;;  %v1577_v3 = vpop.f32.mrb[15].mxu0  ;;  %v4145_v63 = vld [vmem:[#allocation2_spill] sm:$0xff] }
 0x994   : > { %v3608_v41 = vmax.f32 %v1575_v18, 0.0 }
 0x995   : > { %1581 = vrot.lane.b32.xlu0 %v3606_v55, %s2588_s11 }
 0x996   : > { %1583 = vrot.lane.b32.xlu1 %v3608_v41, %s2588_s11 }
 0xa07   : > { %v1582_v53 = vpop.permute.xlu0 %1581 }
 0xa08   : > { %v1584_v4 = vpop.permute.xlu1 %1583 }
 0xa09   : > { %v3616_v25 = vsel %vm394_vm4, %v1582_v53, %v1584_v4  ;;  %v3620_v29 = vsel %vm394_vm4, %v1584_v4, %v1582_v53  ;;  %v4146_v53 = vld [vmem:[#allocation3_spill] sm:$0xff] }
 0xa0a   : > { %v1587_v40 = vmax.f32 %v3606_v55, %v3616_v25  ;;  %v1588_v39 = vmax.f32 %v3608_v41, %v3620_v29 }
 0xa0c   : > { %1591 = vrot.lane.b32.xlu1 %v1588_v39, %s2591_s13  ;;  %1589 = vrot.lane.b32.xlu0 %v1587_v40, %s2591_s13 }
 0xa7e   : > { %v1592_v52 = vpop.permute.xlu1 %1591  ;;  %v1590_v33 = vpop.permute.xlu0 %1589 }
 0xa7f   : > { %v1593_v58 = vsel %vm438_vm6, %v1590_v33, %v1592_v52  ;;  %v1594_v0 = vsel %vm438_vm6, %v1592_v52, %v1590_v33 }
 0xa80   : > { %v3632_v24 = vmax.f32 %v1587_v40, %v1593_v58  ;;  %v3634_v13 = vmax.f32 %v1588_v39, %v1594_v0 }
 0xa82   : > { %1599 = vrot.lane.b32.xlu1 %v3634_v13, %s2594_s28  ;;  %1597 = vrot.lane.b32.xlu0 %v3632_v24, %s2594_s28  ;;  %s4139_s28 = smov 98  }
 0xa86   : > { %1607 = vrot.lane.b32.xlu1 %v3634_v13, %s2595_s29  ;;  %1605 = vrot.lane.b32.xlu0 %v3632_v24, %s2595_s29  ;;  %s4140_s29 = smov 96  }
 0xa8a   : > { %1615 = vrot.lane.b32.xlu1 %v3634_v13, %s2596_s15  ;;  %1613 = vrot.lane.b32.xlu0 %v3632_v24, %s2596_s15  ;;  %s4141_s15 = smov 94  }
 0xa8e   : > { %1623 = vrot.lane.b32.xlu1 %v3634_v13, %s2597_s16  ;;  %1621 = vrot.lane.b32.xlu0 %v3632_v24, %s2597_s16 }
 0xa92   : > { %1631 = vrot.lane.b32.xlu1 %v3634_v13, %s2598_s17  ;;  %1629 = vrot.lane.b32.xlu0 %v3632_v24, %s2598_s17 }
 0xa96   : > { %1639 = vrot.lane.b32.xlu1 %v3634_v13, %s4139_s28  ;;  %1637 = vrot.lane.b32.xlu0 %v3632_v24, %s4139_s28 }
 0xa9a   : > { %1647 = vrot.lane.b32.xlu1 %v3634_v13, %s4140_s29  ;;  %1645 = vrot.lane.b32.xlu0 %v3632_v24, %s4140_s29 }
 0xa9e   : > { %1655 = vrot.lane.b32.xlu1 %v3634_v13, %s4141_s15  ;;  %1653 = vrot.lane.b32.xlu0 %v3632_v24, %s4141_s15 }
 0xaa2   : > { %1756 = vperm.xlu1 %2520, %v3671_v43   ;;  %1751 = vperm.xlu0 %2521, %v3676_v2  }
 0xaa6   : > { %1983 = vrot.lane.b32.xlu1 %v3606_v55, %s2585_s8  ;;  %1985 = vrot.lane.b32.xlu0 %v3608_v41, %s2585_s8 }
 0xaa7   : > { %2522 = vset.pattern.permute.xlu1 %v4142_v21  ;;  %2523 = vset.pattern.permute.xlu0 %v2605_v38  ;;  %v4149_v21 = vld [vmem:[#allocation4_spill] sm:$0xff] }
 0xaf4   : > { %v1600_v28 = vpop.permute.xlu1 %1599  ;;  %v1598_v8 = vpop.permute.xlu0 %1597 }
 0xaf5   : > { %v1601_v57 = vsel %vm568_vm10, %v1598_v8, %v1600_v28  ;;  %v1602_v30 = vsel %vm568_vm10, %v1600_v28, %v1598_v8  ;;  %vm4143_vm10 = vcmp.lt.s32.totalorder %v2705_v7, 2 }
 0xaf6   : > { %v1603_v56 = vmul.f32 %v1602_v30, %v2980_v44  ;;  %v1604_v38 = vmul.f32 %v1601_v57, %v2983_v47  ;;  %v4150_v57 = vld [vmem:[#allocation5_spill] sm:$0xff] }
 0xaf8   : > { %v1608_v61 = vpop.permute.xlu1 %1607  ;;  %v1606_v59 = vpop.permute.xlu0 %1605 }
 0xaf9   : > { %v1609_v32 = vsel %vm589_vm11, %v1606_v59, %v1608_v61  ;;  %v1610_v31 = vsel %vm589_vm11, %v1608_v61, %v1606_v59  ;;  %vm4144_vm11 = vmmov %vm4143_vm10 }
 0xafa   : > { %v1611_v9 = vmul.f32 %v1610_v31, %v2987_v48  ;;  %v1612_v54 = vmul.f32 %v1609_v32, %v2990_v49 }
 0xafc   : > { %v1661_v62 = vpack.c.bf16 %v1611_v9, %v1603_v56  ;;  %v1616_v26 = vpop.permute.xlu1 %1615  ;;  %v1614_v60 = vpop.permute.xlu0 %1613  ;;  %v1662_v27 = vpack.c.bf16 %v1612_v54, %v1604_v38  ;;  %v4152_v38 = vld [vmem:[#allocation6_spill] sm:$0xff] }
 0xafd   : > { %v1617_v50 = vsel %vm611_vm12, %v1614_v60, %v1616_v26  ;;  %v1618_v51 = vsel %vm611_vm12, %v1616_v26, %v1614_v60  ;;  %vm4147_vm12 = vcmp.lt.s32.totalorder %v2705_v7, 126 }
 0xafe   : > { %1703 = vmatprep.mubr.bf16.mxu0 %v1662_v27  ;;  %v1619_v49 = vmul.f32 %v1618_v51, %v3012_v19  ;;  %v1620_v18 = vmul.f32 %v1617_v50, %v3015_v20  ;;  %v4155_v51 = vld [vmem:[#allocation8_spill] sm:$0xff] }
 0xaff   : > { %1704 = vmatmul.mubr.bf16.vlgmr.msra.gmra.mrb[16].mxu0 %v1661_v62  ;;  %v4154_v62 = vld [vmem:[#allocation7_spill] sm:$0xff] }
 0xb00   : > { %v1624_v1 = vpop.permute.xlu1 %1623  ;;  %v1622_v44 = vpop.permute.xlu0 %1621 }
 0xb01   : > { %v1625_v47 = vsel %vm4143_vm10, %v1622_v44, %v1624_v1  ;;  %v1626_v48 = vsel %vm4144_vm11, %v1624_v1, %v1622_v44  ;;  %vm4148_vm10 = vmmov %vm4147_vm12  ;;  %vm4151_vm11 = vcmp.lt.s32.totalorder %v2705_v7, 96 }
 0xb02   : > { %v1627_v3 = vmul.f32 %v1626_v48, %v4145_v63  ;;  %v1628_v4 = vmul.f32 %v1625_v47, %v4146_v53  ;;  %v4158_v48 = vld [vmem:[#allocation10_spill] sm:$0xff]  ;;  %v4160_v53 = vld [vmem:[#allocation11_spill] sm:$0xff] }
 0xb04   : > { %v1632_v40 = vpop.permute.xlu1 %1631  ;;  %v1630_v39 = vpop.permute.xlu0 %1629  ;;  %v1664_v52 = vpack.c.bf16 %v1628_v4, %v1620_v18  ;;  %v1663_v33 = vpack.c.bf16 %v1627_v3, %v1619_v49 }
 0xb05   : > { %v1634_v58 = vsel %vm4147_vm12, %v1632_v40, %v1630_v39  ;;  %v1633_v0 = vsel %vm4148_vm10, %v1630_v39, %v1632_v40  ;;  %vm4153_vm12 = vmmov %vm4151_vm11  ;;  %vm4156_vm10 = vcmp.lt.s32.totalorder %v2705_v7, 94  ;;  %v1448_v7 = vld [vmem:[%s4085_s1 + $0x90] sm:$0xff] }
 0xb06   : > { %v1636_v28 = vmul.f32 %v1634_v58, %v4149_v21  ;;  %1711 = vmatprep.mubr.bf16.mxu0 %v1664_v52  ;;  %v1635_v30 = vmul.f32 %v1633_v0, %v4150_v57 }
 0xb07   : > { %1712 = vmatmul.mubr.bf16.gmra.mrb[20].mxu0 %v1663_v33 }
 0xb08   : > { %v1640_v19 = vpop.permute.xlu1 %1639  ;;  %v1638_v20 = vpop.permute.xlu0 %1637  ;;  %v1666_v8 = vpack.c.bf16 %v1636_v28, %v3634_v13  ;;  %v1665_v56 = vpack.c.bf16 %v1635_v30, %v3632_v24  ;;  %v4157_v24 = vld [vmem:[#allocation9_spill] sm:$0xff] }
 0xb09   : > { %v1642_v61 = vsel %vm677_vm15, %v1640_v19, %v1638_v20  ;;  %v1641_v26 = vsel %vm677_vm15, %v1638_v20, %v1640_v19 }
 0xb0a   : > { %1719 = vmatprep.mubr.bf16.mxu0 %v1666_v8  ;;  %v1644_v9 = vmul.f32 %v1642_v61, %v4152_v38  ;;  %v1643_v49 = vmul.f32 %v1641_v26, %v4158_v48 }
 0xb0c   : > { %v1648_v59 = vpop.permute.xlu1 %1647  ;;  %v1646_v32 = vpop.permute.xlu0 %1645 }
 0xb0d   : > { %v1650_v31 = vsel %vm4151_vm11, %v1648_v59, %v1646_v32  ;;  %v1649_v54 = vsel %vm4153_vm12, %v1646_v32, %v1648_v59  ;;  %vm4159_vm11 = vmmov %vm4156_vm10 }
 0xb0e   : > { %v1652_v13 = vmul.f32 %v1650_v31, %v4154_v62  ;;  %v1651_v1 = vmul.f32 %v1649_v54, %v4155_v51 }
 0xb0f   : > { %1720 = vmatmul.mubr.bf16.gmra.mrb[24].mxu0 %v1665_v56 }
 0xb10   : > { %v1656_v60 = vpop.permute.xlu1 %1655  ;;  %v1654_v27 = vpop.permute.xlu0 %1653  ;;  %v1668_v50 = vpack.c.bf16 %v1652_v13, %v1644_v9  ;;  %v1667_v18 = vpack.c.bf16 %v1651_v1, %v1643_v49 }
 0xb11   : > { %v1658_v44 = vsel %vm4156_vm10, %v1656_v60, %v1654_v27  ;;  %v1657_v63 = vsel %vm4159_vm11, %v1654_v27, %v1656_v60 }
 0xb12   : > { %v1660_v47 = vmul.f32 %v1658_v44, %v4157_v24  ;;  %1727 = vmatprep.mubr.bf16.mxu0 %v1668_v50  ;;  %v1659_v4 = vmul.f32 %v1657_v63, %v4160_v53  ;;  %v1743_v63 = vpack.c.bf16 %v3671_v43, %v3676_v2  ;;  %v2568_v53 = vld [vmem:[%s4089_s5 + $0x4] ss:$8 sps:$4 sm:$0xff]   ;;  %v2570_v43 = vld [vmem:[%s4089_s5 + $0x14] ss:$8 sps:$4 sm:$0xff]   ;;  %v2571_v2 = vld [vmem:[%s4089_s5 + $0x10] ss:$8 sps:$4 sm:$0xff]  }
 0xb14   : > { %v1670_v3 = vpack.c.bf16 %v1660_v47, %v1660_v47  ;;  %v1669_v40 = vpack.c.bf16 %v1659_v4, %v1659_v4  ;;  %v2572_v4 = vld [vmem:[%s4089_s5 + $0x24] ss:$8 sps:$4 sm:$0xff]  }
 0xb17   : > { %1728 = vmatmul.mubr.bf16.gmra.mrb[28].mxu0 %v1667_v18 }
 0xb18   : > { %1735 = vmatprep.mubr.bf16.mxu0 %v1670_v3 }
 0xb1f   : > { %1736 = vmatmul.mubr.bf16.gmra.mrb[32].mxu0 %v1669_v40  ;;  %v2573_v40 = vld [vmem:[%s4089_s5 + $0x20] ss:$8 sps:$4 sm:$0xff]  }
 0xbd2   : > { %v2422_v39 = vpop.f32.mrb[16].mxu0 }
 0xbd3   : > { %v2423_v52 = vpop.f32.mrb[17].mxu0 }
 0xbd4   : > { %v2424_v33 = vadd.f32 %v2423_v52, %v2422_v39  ;;  %v2425_v58 = vpop.f32.mrb[18].mxu0  ;;  %v2574_v39 = vld [vmem:[%s4089_s5 + $0x34] ss:$8 sps:$4 sm:$0xff]   ;;  %v2575_v52 = vld [vmem:[%s4089_s5 + $0x30] ss:$8 sps:$4 sm:$0xff]  }
 0xbd5   : > { %v2426_v0 = vpop.f32.mrb[19].mxu0 }
 0xbd6   : > { %v2427_v21 = vadd.f32 %v2426_v0, %v2425_v58 }
 0xbd8   : > { %v1744_v28 = vpack.c.bf16 %v2427_v21, %v2424_v33  ;;  %v1752_v33 = vpop.permute.xlu0 %1751 }
 0xbda   : > { %v2428_v19 = vpop.f32.mrb[20].mxu0  ;;  %2473 = vmatpush3.bf16.msra.mxu1 %v1744_v28  ;;  %v1757_v28 = vpop.permute.xlu1 %1756 }
 0xbdb   : > { %v2429_v20 = vpop.f32.mrb[21].mxu0  ;;  %2474 = vmatprep.subr.bf16.mxu1 %v4136_v42 }
 0xbdc   : > { %v2430_v8 = vadd.f32 %v2429_v20, %v2428_v19  ;;  %v2431_v57 = vpop.f32.mrb[22].mxu0 }
 0xbdd   : > { %v2432_v30 = vpop.f32.mrb[23].mxu0 }
 0xbde   : > { %v2433_v61 = vadd.f32 %v2432_v30, %v2431_v57 }
 0xbe0   : > { %v1745_v59 = vpack.c.bf16 %v2433_v61, %v2430_v8 }
 0xbe2   : > { %v2434_v32 = vpop.f32.mrb[24].mxu0  ;;  %2475 = vmatpush3.bf16.msra.mxu1 %v1745_v59 }
 0xbe3   : > { %v2435_v31 = vpop.f32.mrb[25].mxu0  ;;  %2476 = vmatprep.subr.bf16.mxu1 %v4136_v42 }
 0xbe4   : > { %v2436_v56 = vadd.f32 %v2435_v31, %v2434_v32  ;;  %v2437_v38 = vpop.f32.mrb[26].mxu0 }
 0xbe5   : > { %v2438_v9 = vpop.f32.mrb[27].mxu0 }
 0xbe6   : > { %v2439_v54 = vadd.f32 %v2438_v9, %v2437_v38  ;;  %v1447_v9 = vld [vmem:[%s4085_s1 + $0x88] sm:$0xff] }
 0xbe8   : > { %v1746_v62 = vpack.c.bf16 %v2439_v54, %v2436_v56  ;;  %v2042_v54 = vpack.c.bf16 %v1447_v9, %v1447_v9 }
 0xbea   : > { %v2440_v13 = vpop.f32.mrb[28].mxu0  ;;  %2477 = vmatpush3.bf16.msra.mxu1 %v1746_v62  ;;  %2346 = vmatprep.mubr.msk.bf16.mxu0 %vm1331_vm13, %v2042_v54  ;;  %v3875_v62 = vpop.permute.xlu1 %1983 }
 0xbeb   : > { %v2441_v26 = vpop.f32.mrb[29].mxu0  ;;  %2478 = vmatprep.subr.bf16.mxu1 %v4136_v42 }
 0xbec   : > { %v2442_v60 = vadd.f32 %v2441_v26, %v2440_v13  ;;  %v2443_v27 = vpop.f32.mrb[30].mxu0  ;;  %v3877_v13 = vpop.permute.xlu0 %1985 }
 0xbed   : > { %v2444_v50 = vpop.f32.mrb[31].mxu0 }
 0xbee   : > { %v2445_v51 = vadd.f32 %v2444_v50, %v2443_v27 }
 0xbf0   : > { %v1747_v1 = vpack.c.bf16 %v2445_v51, %v2442_v60 }
 0xbf2   : > { %v2446_v44 = vpop.f32.mrb[32].mxu0  ;;  %2479 = vmatpush3.bf16.msra.mxu1 %v1747_v1 }
 0xbf3   : > { %v2447_v24 = vpop.f32.mrb[33].mxu0  ;;  %2480 = vmatprep.subr.bf16.mxu1 %v4136_v42  ;;  %v2569_v42 = vld [vmem:[%s4089_s5] ss:$8 sps:$4 sm:$0xff]  }
 0xbf4   : > { %v2448_v47 = vadd.f32 %v2447_v24, %v2446_v44  ;;  %v2449_v48 = vpop.f32.mrb[34].mxu0 }
 0xbf5   : > { %v2450_v49 = vpop.f32.mrb[35].mxu0 }
 0xbf6   : > { %v1748_v18 = vpack.c.bf16 %v2448_v47, %v2448_v47 }
 0xbf8   : > { %v1763_v3 = vsel %vm498_vm8, %v1748_v18, 0 }
 0xbf9   : > { %2481 = vmatpush3.bf16.msra.mxu1 %v1763_v3 }
 0xbfa   : > { %1812 = vmatprep.subr.bf16.mxu1 %v2568_v53 }
 0xbfc   : > { %2483 = vmatmul.mubr.msk.bf16.vlgmr.msra.gmra.mrb[28].mxu1 %vm494_vm9, %v1743_v63  ;;  %vm4161_vm9 = vcmask 523264  }
 0xbfd   : > { %1813 = vmatpush1.bf16.msra.mxu1 %v2569_v42  ;;  %1844 = vmatprep.mubr.bf16.mxu1 %v4138_v5 }
 0xbfe   : > { %1814 = vmatprep.subr.bf16.mxu1 %v2570_v43 }
 0xc01   : > { %1815 = vmatpush1.bf16.msra.mxu1 %v2571_v2 }
 0xc02   : > { %1816 = vmatprep.subr.bf16.mxu1 %v2572_v4 }
 0xc05   : > { %1817 = vmatpush1.bf16.msra.mxu1 %v2573_v40 }
 0xc06   : > { %1818 = vmatprep.subr.bf16.mxu1 %v2574_v39 }
 0xc09   : > { %1819 = vmatpush1.bf16.msra.mxu1 %v2575_v52 }
 0xccf   : > { %v1799_v58 = vpop.f32.mrb[28].mxu1 }
 0xcd0   : > { %v1800_v0 = vadd.f32 %v1799_v58, %v1752_v33  ;;  %v2484_v21 = vpop.f32.mrb[29].mxu1 }
 0xcd1   : > { %v1802_v19 = vpop.f32.mrb[30].mxu1 }
 0xcd2   : > { %v1803_v20 = vadd.f32 %v1802_v19, %v1757_v28  ;;  %v2485_v8 = vpop.f32.mrb[31].mxu1  ;;  %v1806_v57 = vmax.f32 %v1800_v0, 0.0 }
 0xcd4   : > { %v1807_v30 = vmax.f32 %v1803_v20, 0.0 }
 0xcd6   : > { %v1808_v61 = vpack.c.bf16 %v1807_v30, %v1806_v57 }
 0xcd8   : > { %2344 = vmatmul.mubr.msk.bf16.vlgmr.msra.gmra.mrb[32].mxu1 %vm4161_vm9, %v1808_v61 }
 0xcd9   : > { %2177 = vmatprep.mubr.bf16.mxu1 %v4138_v5 }
 0xdab   : > { %v3771_v59 = vpop.f32.mrb[32].mxu1 }
 0xdac   : > { %1855 = vrot.lane.b32.xlu1 %v3771_v59, %s2585_s8  ;;  %v3775_v32 = vpop.f32.mrb[33].mxu1 }
 0xdad   : > { %v3777_v31 = vpop.f32.mrb[34].mxu1 }
 0xdae   : > { %1857 = vrot.lane.b32.xlu0 %v3777_v31, %s2585_s8  ;;  %v3781_v56 = vpop.f32.mrb[35].mxu1  ;;  %v2051_v38 = vpack.c.bf16 %v3777_v31, %v3771_v59 }
 0xdaf   : > { %v2052_v5 = vpack.c.bf16 %v3781_v56, %v3775_v32 }
 0xdb0   : > { %1871 = vrot.lane.b32.xlu1 %v3771_v59, %s2584_s30 }
 0xdb2   : > { %1873 = vrot.lane.b32.xlu0 %v3777_v31, %s2584_s30 }
 0xdb4   : > { %1887 = vrot.lane.b32.xlu1 %v3771_v59, %s2586_s9 }
 0xdb6   : > { %1889 = vrot.lane.b32.xlu0 %v3777_v31, %s2586_s9 }
 0xdb8   : > { %1903 = vrot.lane.b32.xlu1 %v3771_v59, %s2587_s10 }
 0xdba   : > { %1905 = vrot.lane.b32.xlu0 %v3777_v31, %s2587_s10 }
 0xdbc   : > { %1919 = vrot.lane.b32.xlu1 %v3771_v59, %s2588_s11 }
 0xdbe   : > { %1921 = vrot.lane.b32.xlu0 %v3777_v31, %s2588_s11 }
 0xdc0   : > { %1935 = vrot.lane.b32.xlu1 %v3771_v59, %s4162_s26 }
 0xdc2   : > { %1937 = vrot.lane.b32.xlu0 %v3777_v31, %s4162_s26 }
 0xdc4   : > { %1951 = vrot.lane.b32.xlu1 %v3771_v59, %s2591_s13 }
 0xdc6   : > { %1953 = vrot.lane.b32.xlu0 %v3777_v31, %s2591_s13 }
 0xdc8   : > { %1967 = vrot.lane.b32.xlu1 %v3771_v59, %s4163_s20 }
 0xdca   : > { %1969 = vrot.lane.b32.xlu0 %v3777_v31, %s4163_s20 }
 0xdcc   : > { %1859 = vrot.lane.b32.xlu1 %v3775_v32, %s2585_s8 }
 0xdce   : > { %1861 = vrot.lane.b32.xlu0 %v3781_v56, %s2585_s8 }
 0xdd0   : > { %1875 = vrot.lane.b32.xlu1 %v3775_v32, %s2584_s30 }
 0xdd2   : > { %1877 = vrot.lane.b32.xlu0 %v3781_v56, %s2584_s30 }
 0xdd4   : > { %1891 = vrot.lane.b32.xlu1 %v3775_v32, %s2586_s9 }
 0xdd6   : > { %1893 = vrot.lane.b32.xlu0 %v3781_v56, %s2586_s9 }
 0xdd8   : > { %1907 = vrot.lane.b32.xlu1 %v3775_v32, %s2587_s10 }
 0xdda   : > { %1909 = vrot.lane.b32.xlu0 %v3781_v56, %s2587_s10 }
 0xddc   : > { %1991 = vrot.lane.b32.xlu1 %v3606_v55, %s2584_s30 }
 0xdde   : > { %1993 = vrot.lane.b32.xlu0 %v3608_v41, %s2584_s30 }
 0xde0   : > { %1923 = vrot.lane.b32.xlu1 %v3775_v32, %s2588_s11 }
 0xde2   : > { %1925 = vrot.lane.b32.xlu0 %v3781_v56, %s2588_s11 }
 0xde4   : > { %1939 = vrot.lane.b32.xlu1 %v3775_v32, %s4162_s26 }
 0xde6   : > { %1941 = vrot.lane.b32.xlu0 %v3781_v56, %s4162_s26 }
 0xde8   : > { %1955 = vrot.lane.b32.xlu1 %v3775_v32, %s2591_s13 }
 0xdea   : > { %1957 = vrot.lane.b32.xlu0 %v3781_v56, %s2591_s13 }
 0xdec   : > { %1971 = vrot.lane.b32.xlu1 %v3775_v32, %s4163_s20 }
 0xdee   : > { %1973 = vrot.lane.b32.xlu0 %v3781_v56, %s4163_s20 }
 0xdf0   : > { %1999 = vrot.lane.b32.xlu1 %v3606_v55, %s2586_s9 }
 0xdf2   : > { %2001 = vrot.lane.b32.xlu0 %v3608_v41, %s2586_s9 }
 0xdf4   : > { %2007 = vrot.lane.b32.xlu1 %v3606_v55, %s2587_s10 }
 0xdf6   : > { %2009 = vrot.lane.b32.xlu0 %v3608_v41, %s2587_s10 }
 0xdf8   : > { %2017 = vrot.lane.b32.xlu1 %v3606_v55, %s4162_s26 }
 0xdfa   : > { %2019 = vrot.lane.b32.xlu0 %v3608_v41, %s4162_s26 }
 0xdfc   : > { %2025 = vrot.lane.b32.xlu1 %v3606_v55, %s2591_s13 }
 0xdfe   : > { %2027 = vrot.lane.b32.xlu0 %v3608_v41, %s2591_s13 }
 0xe00   : > { %2033 = vrot.lane.b32.xlu1 %v3606_v55, %s4163_s20 }
 0xe02   : > { %2035 = vrot.lane.b32.xlu0 %v3608_v41, %s4163_s20 }
 0xe04   : > { %2073 = vperm.xlu1 %2522, %v1447_v9  }
 0xe06   : > { %2133 = vperm.xlu0 %2523, %v1448_v7  }
 0xe1e   : > { %v1856_v26 = vpop.permute.xlu1 %1855 }
 0xe20   : > { %v1858_v60 = vpop.permute.xlu0 %1857 }
 0xe22   : > { %v1872_v27 = vpop.permute.xlu1 %1871 }
 0xe24   : > { %v1874_v50 = vpop.permute.xlu0 %1873 }
 0xe26   : > { %v1888_v51 = vpop.permute.xlu1 %1887 }
 0xe28   : > { %v1890_v1 = vpop.permute.xlu0 %1889 }
 0xe2a   : > { %v1904_v44 = vpop.permute.xlu1 %1903 }
 0xe2c   : > { %v1906_v24 = vpop.permute.xlu0 %1905 }
 0xe2e   : > { %v3879_v47 = vpop.permute.xlu1 %1919 }
 0xe30   : > { %v3881_v48 = vpop.permute.xlu0 %1921 }
 0xe32   : > { %v3883_v49 = vpop.permute.xlu1 %1935 }
 0xe34   : > { %v3885_v18 = vpop.permute.xlu0 %1937 }
 0xe36   : > { %v3887_v63 = vpop.permute.xlu1 %1951 }
 0xe38   : > { %v3889_v3 = vpop.permute.xlu0 %1953 }
 0xe3a   : > { %v3891_v53 = vpop.permute.xlu1 %1967 }
 0xe3c   : > { %v3893_v42 = vpop.permute.xlu0 %1969 }
 0xe3e   : > { %v1860_v43 = vpop.permute.xlu1 %1859 }
 0xe3f   : > { %v1863_v2 = vsel %vm307_vm1, %v1856_v26, %v1860_v43  ;;  %v1865_v4 = vsel %vm307_vm1, %v1860_v43, %v1856_v26 }
 0xe40   : > { %v1862_v40 = vpop.permute.xlu0 %1861  ;;  %v1867_v33 = vmul.f32 %v1865_v4, %v2726_v16  ;;  %v1868_v58 = vmul.f32 %v1863_v2, %v2720_v14 }
 0xe41   : > { %v1864_v39 = vsel %vm307_vm1, %v1858_v60, %v1862_v40  ;;  %v1866_v52 = vsel %vm307_vm1, %v1862_v40, %v1858_v60 }
 0xe42   : > { %v1869_v0 = vmul.f32 %v1866_v52, %v2726_v16  ;;  %v1870_v21 = vmul.f32 %v1864_v39, %v2720_v14  ;;  %v1876_v28 = vpop.permute.xlu1 %1875 }
 0xe43   : > { %v1879_v19 = vsel %vm328_vm0, %v1872_v27, %v1876_v28  ;;  %v1881_v20 = vsel %vm328_vm0, %v1876_v28, %v1872_v27 }
 0xe44   : > { %v2043_v8 = vpack.c.bf16 %v1869_v0, %v1867_v33  ;;  %v1878_v57 = vpop.permute.xlu0 %1877  ;;  %v2044_v30 = vpack.c.bf16 %v1870_v21, %v1868_v58  ;;  %v1883_v54 = vmul.f32 %v1881_v20, %v2729_v17  ;;  %v1884_v26 = vmul.f32 %v1879_v19, %v2723_v15 }
 0xe45   : > { %v1880_v61 = vsel %vm328_vm0, %v1874_v50, %v1878_v57  ;;  %v1882_v9 = vsel %vm328_vm0, %v1878_v57, %v1874_v50 }
 0xe46   : > { %v1885_v60 = vmul.f32 %v1882_v9, %v2729_v17  ;;  %v1886_v43 = vmul.f32 %v1880_v61, %v2723_v15  ;;  %v1892_v2 = vpop.permute.xlu1 %1891  ;;  %2085 = vmatprep.subr.bf16.mxu0 %v2044_v30 }
 0xe47   : > { %v1895_v27 = vsel %vm350_vm2, %v1888_v51, %v1892_v2  ;;  %v1897_v4 = vsel %vm350_vm2, %v1892_v2, %v1888_v51  ;;  %2086 = vmatpush1.bf16.msra.mxu0 %v2043_v8 }
 0xe48   : > { %v2045_v40 = vpack.c.bf16 %v1885_v60, %v1883_v54  ;;  %v1894_v39 = vpop.permute.xlu0 %1893  ;;  %v2046_v50 = vpack.c.bf16 %v1886_v43, %v1884_v26  ;;  %v1899_v58 = vmul.f32 %v1897_v4, %v2752_v34  ;;  %v1900_v0 = vmul.f32 %v1895_v27, %v2755_v35 }
 0xe49   : > { %v1896_v52 = vsel %vm350_vm2, %v1890_v1, %v1894_v39  ;;  %v1898_v33 = vsel %vm350_vm2, %v1894_v39, %v1890_v1 }
 0xe4a   : > { %v1901_v21 = vmul.f32 %v1898_v33, %v2752_v34  ;;  %v1902_v28 = vmul.f32 %v1896_v52, %v2755_v35  ;;  %v1908_v19 = vpop.permute.xlu1 %1907  ;;  %2087 = vmatprep.subr.bf16.mxu0 %v2046_v50 }
 0xe4b   : > { %v1911_v51 = vsel %vm372_vm3, %v1904_v44, %v1908_v19  ;;  %v1913_v20 = vsel %vm372_vm3, %v1908_v19, %v1904_v44  ;;  %2088 = vmatpush1.bf16.msra.mxu0 %v2045_v40 }
 0xe4c   : > { %v2047_v8 = vpack.c.bf16 %v1901_v21, %v1899_v58  ;;  %v1910_v57 = vpop.permute.xlu0 %1909  ;;  %v2048_v1 = vpack.c.bf16 %v1902_v28, %v1900_v0  ;;  %v1915_v9 = vmul.f32 %v1913_v20, %v2758_v36  ;;  %v1916_v54 = vmul.f32 %v1911_v51, %v2761_v37 }
 0xe4d   : > { %v1912_v30 = vsel %vm372_vm3, %v1906_v24, %v1910_v57  ;;  %v1914_v61 = vsel %vm372_vm3, %v1910_v57, %v1906_v24 }
 0xe4e   : > { %v1917_v26 = vmul.f32 %v1914_v61, %v2758_v36  ;;  %v1918_v60 = vmul.f32 %v1912_v30, %v2761_v37  ;;  %v1992_v43 = vpop.permute.xlu1 %1991  ;;  %2089 = vmatprep.subr.bf16.mxu0 %v2048_v1 }
 0xe4f   : > { %2090 = vmatpush1.bf16.msra.mxu0 %v2047_v8 }
 0xe50   : > { %v2049_v44 = vpack.c.bf16 %v1917_v26, %v1915_v9  ;;  %v1994_v2 = vpop.permute.xlu0 %1993  ;;  %v2050_v27 = vpack.c.bf16 %v1918_v60, %v1916_v54 }
 0xe51   : > { %v1995_v61 = vsel %vm328_vm0, %v1992_v43, %v1994_v2 }
 0xe52   : > { %v1924_v4 = vpop.permute.xlu1 %1923  ;;  %2091 = vmatprep.subr.bf16.mxu0 %v2050_v27 }
 0xe53   : > { %v1927_v24 = vsel %vm394_vm4, %v3879_v47, %v1924_v4  ;;  %v1929_v40 = vsel %vm394_vm4, %v1924_v4, %v3879_v47  ;;  %2092 = vmatpush1.bf16.msra.mxu0 %v2049_v44 }
 0xe54   : > { %2093 = vmatprep.subr.bf16.mxu0 %v2052_v5  ;;  %v1926_v39 = vpop.permute.xlu0 %1925  ;;  %v1931_v33 = vmul.f32 %v1927_v24, %v2776_v45  ;;  %v1932_v58 = vmul.f32 %v1929_v40, %v2779_v46 }
 0xe55   : > { %v1928_v50 = vsel %vm394_vm4, %v3881_v48, %v1926_v39  ;;  %v1930_v52 = vsel %vm394_vm4, %v1926_v39, %v3881_v48 }
 0xe56   : > { %v1933_v47 = vmul.f32 %v1928_v50, %v2776_v45  ;;  %v1934_v0 = vmul.f32 %v1930_v52, %v2779_v46  ;;  %v1940_v21 = vpop.permute.xlu1 %1939  ;;  %v1996_v52 = vsel %vm328_vm0, %v1994_v2, %v1992_v43 }
 0xe57   : > { %v1943_v32 = vsel %vm416_vm5, %v3883_v49, %v1940_v21  ;;  %v1945_v56 = vsel %vm416_vm5, %v1940_v21, %v3883_v49  ;;  %2094 = vmatpush1.bf16.msra.mxu0 %v2051_v38 }
 0xe58   : > { %v2053_v5 = vpack.c.bf16 %v1933_v47, %v1931_v33  ;;  %v1942_v48 = vpop.permute.xlu0 %1941  ;;  %v2054_v28 = vpack.c.bf16 %v1934_v0, %v1932_v58  ;;  %v1947_v20 = vmul.f32 %v1943_v32, %v2801_v6  ;;  %v1948_v8 = vmul.f32 %v1945_v56, %v2804_v10 }
 0xe59   : > { %v1944_v19 = vsel %vm416_vm5, %v3885_v18, %v1942_v48  ;;  %v1946_v51 = vsel %vm416_vm5, %v1942_v48, %v3885_v18  ;;  %v1998_v33 = vmul.f32 %v1995_v61, %v2723_v15  ;;  %v1988_v15 = vsel %vm307_vm1, %v3877_v13, %v3875_v62 }
 0xe5a   : > { %v1949_v49 = vmul.f32 %v1944_v19, %v2801_v6  ;;  %v1950_v59 = vmul.f32 %v1946_v51, %v2804_v10  ;;  %v1956_v31 = vpop.permute.xlu1 %1955  ;;  %2095 = vmatprep.subr.bf16.mxu0 %v2054_v28  ;;  %v1997_v48 = vmul.f32 %v1996_v52, %v2729_v17  ;;  %v1989_v51 = vmul.f32 %v1988_v15, %v2726_v16 }
 0xe5b   : > { %v1959_v38 = vsel %vm438_vm6, %v3887_v63, %v1956_v31  ;;  %v1961_v57 = vsel %vm438_vm6, %v1956_v31, %v3887_v63  ;;  %2096 = vmatpush1.bf16.msra.mxu0 %v2053_v5 }
 0xe5c   : > { %v2055_v18 = vpack.c.bf16 %v1949_v49, %v1947_v20  ;;  %v1958_v1 = vpop.permute.xlu0 %1957  ;;  %v2056_v30 = vpack.c.bf16 %v1950_v59, %v1948_v8  ;;  %v1963_v26 = vmul.f32 %v1959_v38, %v2808_v11  ;;  %v1964_v60 = vmul.f32 %v1961_v57, %v2811_v12 }
 0xe5d   : > { %v1960_v9 = vsel %vm438_vm6, %v3889_v3, %v1958_v1  ;;  %v1962_v54 = vsel %vm438_vm6, %v1958_v1, %v3889_v3  ;;  %v1987_v3 = vsel %vm307_vm1, %v3875_v62, %v3877_v13  ;;  %v2061_v13 = vpack.c.bf16 %v1997_v48, %v1989_v51 }
 0xe5e   : > { %v1965_v63 = vmul.f32 %v1960_v9, %v2808_v11  ;;  %v1966_v44 = vmul.f32 %v1962_v54, %v2811_v12  ;;  %v1972_v27 = vpop.permute.xlu1 %1971  ;;  %2097 = vmatprep.subr.bf16.mxu0 %v2056_v30  ;;  %v1990_v43 = vmul.f32 %v1987_v3, %v2720_v14  ;;  %v2016_v14 = vmul.f32 %v3620_v29, %v2779_v46 }
 0xe5f   : > { %v1975_v4 = vsel %vm460_vm7, %v3891_v53, %v1972_v27  ;;  %v1977_v24 = vsel %vm460_vm7, %v1972_v27, %v3891_v53  ;;  %2098 = vmatpush1.bf16.msra.mxu0 %v2055_v18  ;;  %v2015_v29 = vmul.f32 %v3616_v25, %v2776_v45 }
 0xe60   : > { %v2057_v40 = vpack.c.bf16 %v1965_v63, %v1963_v26  ;;  %v1974_v39 = vpop.permute.xlu0 %1973  ;;  %v2058_v50 = vpack.c.bf16 %v1966_v44, %v1964_v60  ;;  %v1979_v47 = vmul.f32 %v1975_v4, %v2829_v23  ;;  %v1980_v0 = vmul.f32 %v1977_v24, %v2826_v22 }
 0xe61   : > { %v1976_v58 = vsel %vm460_vm7, %v3893_v42, %v1974_v39  ;;  %v1978_v53 = vsel %vm460_vm7, %v1974_v39, %v3893_v42  ;;  %v2062_v19 = vpack.c.bf16 %v1998_v33, %v1990_v43  ;;  %v2066_v61 = vpack.c.bf16 %v2016_v14, %v3608_v41 }
 0xe62   : > { %v1981_v21 = vmul.f32 %v1976_v58, %v2829_v23  ;;  %v1982_v32 = vmul.f32 %v1978_v53, %v2826_v22  ;;  %v2000_v56 = vpop.permute.xlu1 %1999  ;;  %2099 = vmatprep.subr.bf16.mxu0 %v2058_v50 }
 0xe63   : > { %2100 = vmatpush1.bf16.msra.mxu0 %v2057_v40 }
 0xe64   : > { %v2059_v2 = vpack.c.bf16 %v1981_v21, %v1979_v47  ;;  %v2002_v42 = vpop.permute.xlu0 %2001  ;;  %v2060_v5 = vpack.c.bf16 %v1982_v32, %v1980_v0 }
 0xe65   : > { %v2003_v20 = vsel %vm350_vm2, %v2000_v56, %v2002_v42  ;;  %v2004_v8 = vsel %vm350_vm2, %v2002_v42, %v2000_v56  ;;  %v2128_v56 = vpack.c.bf16 %v1448_v7, %v1448_v7 }
 0xe66   : > { %v2008_v28 = vpop.permute.xlu1 %2007  ;;  %2101 = vmatprep.subr.bf16.mxu0 %v2060_v5  ;;  %v2005_v16 = vmul.f32 %v2004_v8, %v2752_v34  ;;  %v2006_v59 = vmul.f32 %v2003_v20, %v2755_v35 }
 0xe67   : > { %2102 = vmatpush1.bf16.msra.mxu0 %v2059_v2 }
 0xe68   : > { %2103 = vmatprep.subr.bf16.mxu0 %v2062_v19  ;;  %v2010_v62 = vpop.permute.xlu0 %2009 }
 0xe69   : > { %v2011_v17 = vsel %vm372_vm3, %v2008_v28, %v2010_v62  ;;  %v2012_v49 = vsel %vm372_vm3, %v2010_v62, %v2008_v28 }
 0xe6a   : > { %v2013_v31 = vmul.f32 %v2012_v49, %v2758_v36  ;;  %v2014_v38 = vmul.f32 %v2011_v17, %v2761_v37  ;;  %v2018_v57 = vpop.permute.xlu1 %2017  ;;  %v2065_v37 = vpack.c.bf16 %v2015_v29, %v3606_v55 }
 0xe6b   : > { %2104 = vmatpush1.bf16.msra.mxu0 %v2061_v13 }
 0xe6c   : > { %v2063_v18 = vpack.c.bf16 %v2013_v31, %v2005_v16  ;;  %v2020_v1 = vpop.permute.xlu0 %2019  ;;  %v2064_v46 = vpack.c.bf16 %v2014_v38, %v2006_v59 }
 0xe6d   : > { %v2021_v34 = vsel %vm416_vm5, %v2018_v57, %v2020_v1  ;;  %v2022_v35 = vsel %vm416_vm5, %v2020_v1, %v2018_v57 }
 0xe6e   : > { %v2026_v30 = vpop.permute.xlu1 %2025  ;;  %2105 = vmatprep.subr.bf16.mxu0 %v2064_v46  ;;  %v2023_v25 = vmul.f32 %v2021_v34, %v2801_v6  ;;  %v2024_v41 = vmul.f32 %v2022_v35, %v2804_v10  ;;  %v1446_v10 = vld [vmem:[%s4085_s1 + $0x80] sm:$0xff] }
 0xe6f   : > { %2106 = vmatpush1.bf16.msra.mxu0 %v2063_v18  ;;  %v2041_v40 = vpack.c.bf16 %v1446_v10, %v1446_v10 }
 0xe70   : > { %2107 = vmatprep.subr.bf16.mxu0 %v2066_v61  ;;  %v2028_v36 = vpop.permute.xlu0 %2027 }
 0xe71   : > { %v2029_v9 = vsel %vm438_vm6, %v2026_v30, %v2028_v36  ;;  %v2030_v45 = vsel %vm438_vm6, %v2028_v36, %v2026_v30 }
 0xe72   : > { %v2031_v54 = vmul.f32 %v2029_v9, %v2808_v11  ;;  %v2032_v26 = vmul.f32 %v2030_v45, %v2811_v12  ;;  %v2034_v63 = vpop.permute.xlu1 %2033 }
 0xe73   : > { %2108 = vmatpush1.bf16.msra.mxu0 %v2065_v37 }
 0xe74   : > { %v2067_v60 = vpack.c.bf16 %v2031_v54, %v2023_v25  ;;  %v2036_v44 = vpop.permute.xlu0 %2035  ;;  %v2068_v27 = vpack.c.bf16 %v2032_v26, %v2024_v41 }
 0xe75   : > { %v2037_v55 = vsel %vm460_vm7, %v2034_v63, %v2036_v44  ;;  %v2038_v4 = vsel %vm460_vm7, %v2036_v44, %v2034_v63 }
 0xe76   : > { %v2039_v24 = vmul.f32 %v2037_v55, %v2829_v23  ;;  %v2040_v6 = vmul.f32 %v2038_v4, %v2826_v22  ;;  %2109 = vmatprep.subr.bf16.mxu0 %v2068_v27 }
 0xe77   : > { %2110 = vmatpush1.bf16.msra.mxu0 %v2067_v60 }
 0xe78   : > { %v2069_v11 = vpack.c.bf16 %v2039_v24, %v2039_v24  ;;  %v2070_v12 = vpack.c.bf16 %v2040_v6, %v2040_v6 }
 0xe7a   : > { %2345 = vmatprep.subr.msk.bf16.mxu0 %vm498_vm8, %v2070_v12  ;;  %v2080_v3 = vsel %vm498_vm8, %v2069_v11, 0 }
 0xe7b   : > { %2112 = vmatpush1.bf16.msra.mxu0 %v2080_v3 }
 0xe7e   : > { %2118 = vmatmul.mubr.bf16.vlgmr.msra.gmra.mrb[36].mxu0 %v2041_v40 }
 0xe83   : > { %v2074_v22 = vpop.permute.xlu1 %2073 }
 0xe85   : > { %v2134_v15 = vpop.permute.xlu0 %2133 }
 0xf51   : > { %v2119_v23 = vpop.f32.mrb[36].mxu0 }
 0xf52   : > { %v2120_v39 = vadd.f32 %v2119_v23, %v2074_v22  ;;  %v2121_v50 = vpop.f32.mrb[37].mxu0 }
 0xf53   : > { %v2122_v52 = vadd.f32 %v2121_v50, %v2074_v22  ;;  %v2123_v33 = vpop.f32.mrb[38].mxu0 }
 0xf54   : > { %v2126_v58 = vmax.f32 %v2120_v39, 0.0  ;;  %v2124_v53 = vpop.f32.mrb[39].mxu0 }
 0xf55   : > { %v2127_v47 = vmax.f32 %v2122_v52, 0.0 }
 0xf56   : > { %v2129_v0 = vpack.c.bf16 %v2126_v58, %v2126_v58 }
 0xf57   : > { %v2130_v21 = vpack.c.bf16 %v2127_v47, %v2127_v47 }
 0xf58   : > { %v2140_v32 = vsel %vm498_vm8, %v2129_v0, 0 }
 0xf59   : > { %2347 = vmatprep.subr.msk.bf16.mxu1 %vm498_vm8, %v2130_v21 }
 0xf5a   : > { %2146 = vmatpush1.bf16.msra.mxu1 %v2140_v32 }
 0xf5d   : > { %2348 = vmatmul.mubr.msk.bf16.vlgmr.msra.gmra.mrb[36].mxu1 %vm1392_vm14, %v2128_v56 }
0x1030   : > { %v2179_v43 = vpop.f32.mrb[36].mxu1 }
0x1031   : > { %v2181_v2 = vpop.f32.mrb[37].mxu1  ;;  %v2180_v42 = vadd.f32 %v2179_v43, %v2134_v15 }
0x1032   : > { %v2183_v5 = vpop.f32.mrb[38].mxu1  ;;  %v2182_v48 = vadd.f32 %v2181_v2, %v2134_v15 }
0x1033   : > { %v2184_v28 = vpop.f32.mrb[39].mxu1 }
0x1034   : > { %v2193_v19 = vcombine.low %v2180_v42, %v2182_v48 }
0x1036   : > { %2195 = vst [vmem:[%s291_s12] sm:$0xff] %v2193_v19 }
0x1037 PF: > { %s18_s24 = sadd.s32 1, %s2582_s24  }
0x1038   : > { %p15_p4 = scmp.ge.s32.totalorder %s18_s24, 4  }
0x103a   :  { %17 = sbr.rel (!%p15_p4) target bundleno = 1 (0x1), region = 100 }

</bundles_post_ra>
